<compile_context>
chip_gen: v5e
topology: v5e:2x2
jax: 0.10.0
libtpu: 0.0.40
codegen_flags: <defaults>
</compile_context>

<pallas_src>
import jax
import jax.numpy as jnp
from jax.experimental import pallas as pl
from jax.experimental.pallas import tpu as pltpu  # noqa: F401  (kept for future tiling knobs)


# ---------------------------------------------------------------------------
# Fused kernel factory (all sizes static).
# ---------------------------------------------------------------------------
def make_cnn_lstm_kernel(num_layers, B, Lc, Cout, H, T):
    P = 4                    # MaxPool1d window (stride 1)
    H2 = 2 * H               # both directions' hidden, interleaved per gate
    G2 = 8 * H               # gate columns for both directions

    def sigmoid(x):
        # sigmoid(x) = 0.5*tanh(0.5*x)+0.5  -> a single EUP push per vreg
        return 0.5 * jnp.tanh(0.5 * x) + 0.5

    def kernel(*refs):
        cols_ref, convw_ref, convb_ref = refs[0:3]
        rest = refs[3:]
        layer_refs = [rest[3 * l:3 * l + 3] for l in range(num_layers)]
        fcw_ref, fcb_ref, dir_ref, h0_ref, c0_ref, out_ref = rest[3 * num_layers:]

        # Column mask selecting the backward direction's gate columns; hoisted
        # (and explicitly broadcast ONCE) so no per-step broadcast_in_dim appears.
        use_bwd = jnp.broadcast_to(dir_ref[...] != 0.0, (B, G2))

        # ---- Conv1d(K) + ReLU + MaxPool1d(4, stride=1): one matmul + VPU maxes.
        # cols rows are time-major (row = l*B + b), so a pool shift of p conv
        # positions is a shift of p*B rows.
        conv = jnp.dot(cols_ref[...], convw_ref[...],
                       preferred_element_type=jnp.float32)
        conv = jnp.maximum(conv + convb_ref[...], 0.0)           # (Lc*B, Cout)
        pooled = conv[0:T * B, :]
        for p in range(1, P):
            pooled = jnp.maximum(pooled, conv[p * B:p * B + T * B, :])  # (T*B, Cout)

        # ---- Bidirectional LSTM stack (fwd+bwd gate-fused, x-projection hoisted)
        feat = pooled                                            # (T*B, D), row = t*B + b
        last_fwd = None
        last_bwd = None
        for l in range(num_layers):
            wih_ref, whh_ref, b_ref = layer_refs[l]
            is_last = (l == num_layers - 1)

            # Hoisted input projection + bias for BOTH directions: one matmul per
            # layer, off the serial dependency chain, kept as a traced value.
            xp = jnp.dot(feat, wih_ref[...],
                         preferred_element_type=jnp.float32) + b_ref[...]   # (T*B, 8H)

            whh = whh_ref[...]                                   # (2H, 8H), gate-interleaved
            h_cat = h0_ref[l]                                    # (B, 2H): [:, :H]=fwd, [:, H:]=bwd
            c_cat = c0_ref[l]

            hf_by_time = [None] * T
            hb_by_time = [None] * T

            # Fully-unrolled recurrence (T is small & static): one MXU push and
            # ~3 EUP pushes per step for both directions.
            # (For larger T switch to lax.fori_loop(..., unroll=k) + pl.ds.)
            for s in range(T):
                hh = jnp.dot(h_cat, whh,
                             preferred_element_type=jnp.float32)            # (B, 8H)
                xf = xp[s * B:(s + 1) * B, :]                    # fwd gates use time s
                xb = xp[(T - 1 - s) * B:(T - s) * B, :]          # bwd gates use time T-1-s
                g = jnp.where(use_bwd, xb, xf) + hh
                act = sigmoid(g[:, 0:3 * H2])                    # i,f,o (both dirs) in one push region
                i = act[:, 0:H2]
                f = act[:, H2:2 * H2]
                o = act[:, 2 * H2:3 * H2]
                gg = jnp.tanh(g[:, 3 * H2:4 * H2])               # cell-candidate gate (both dirs)
                c_cat = f * c_cat + i * gg
                h_cat = o * jnp.tanh(c_cat)
                if not is_last:
                    hf_by_time[s] = h_cat[:, 0:H]                # fwd output at time s
                    hb_by_time[T - 1 - s] = h_cat[:, H:H2]       # bwd output at time T-1-s
                elif s == 0:
                    last_bwd = h_cat[:, H:H2]                    # bwd output at time T-1

            if is_last:
                last_fwd = h_cat[:, 0:H]                         # fwd output at time T-1
            else:
                # Assemble the next layer's input sequence once per layer
                # (leading-axis stacks + one lane concat; off the per-step chain).
                hf_stack = jnp.stack(hf_by_time, axis=0)         # (T, B, H)
                hb_stack = jnp.stack(hb_by_time, axis=0)         # (T, B, H)
                feat = jnp.concatenate([hf_stack, hb_stack],
                                       axis=-1).reshape(T * B, H2)

        # ---- Final Linear on the last time step (== pred[:, -1, :]) -----------
        last = jnp.concatenate([last_fwd, last_bwd], axis=-1)    # (B, 2H)
        out = jnp.dot(last, fcw_ref[...],
                      preferred_element_type=jnp.float32) + fcb_ref[...]
        out_ref[...] = out.astype(out_ref.dtype)

    return kernel


# ---------------------------------------------------------------------------
# Wrapper: im2col + gate-interleaved weight packing in XLA, then one fused
# pallas_call (no grid, everything resident in VMEM).
# ---------------------------------------------------------------------------
@jax.jit
def cnn_lstm_forward(x, conv_w, conv_b, lstm_params, fc_w, fc_b, h0, c0):
    # x: (B, L, input_size); conv_w: (K, Cin, Cout); per-direction LSTM weights
    # pre-transposed: wih_t (D, 4H), whh_t (H, 4H), bias (1, 4H) in PyTorch gate
    # order (i, f, g, o).
    B, L, Cin = x.shape
    K, _, Cout = conv_w.shape
    H = h0.shape[-1]
    num_layers = len(lstm_params)
    Lc = L - K + 1
    T = Lc - 3                       # MaxPool1d(kernel_size=4, stride=1)
    O = fc_w.shape[1]
    assert T >= 1

    # im2col in the wrapper (layout plumbing done by XLA), time-major rows l*B+b.
    cols = jnp.concatenate([x[:, k:k + Lc, :] for k in range(K)], axis=2)  # (B, Lc, K*Cin)
    cols = cols.transpose(1, 0, 2).reshape(Lc * B, K * Cin)

    def split_gates(w):              # (..., 4H) -> i, f, g, o blocks
        return w[..., 0:H], w[..., H:2 * H], w[..., 2 * H:3 * H], w[..., 3 * H:4 * H]

    args = [cols, conv_w.reshape(K * Cin, Cout), conv_b]
    z = jnp.zeros((H, H), jnp.float32)
    for layer in lstm_params:
        (wih_f, whh_f, b_f), (wih_b, whh_b, b_b) = layer
        # Column order: [i_f i_b | f_f f_b | o_f o_b | g_f g_b]  (sigmoid gates
        # first, tanh gate last; directions interleaved per gate).
        i_f, f_f, g_f, o_f = split_gates(wih_f)
        i_b, f_b, g_b, o_b = split_gates(wih_b)
        wih_cat = jnp.concatenate([i_f, i_b, f_f, f_b, o_f, o_b, g_f, g_b], axis=1)  # (D, 8H)
        bi_f, bf_f, bg_f, bo_f = split_gates(b_f)
        bi_b, bf_b, bg_b, bo_b = split_gates(b_b)
        b_cat = jnp.concatenate([bi_f, bi_b, bf_f, bf_b, bo_f, bo_b, bg_f, bg_b], axis=1)  # (1, 8H)
        hi_f, hf_f, hg_f, ho_f = split_gates(whh_f)
        hi_b, hf_b, hg_b, ho_b = split_gates(whh_b)
        row_f = jnp.concatenate([hi_f, z, hf_f, z, ho_f, z, hg_f, z], axis=1)   # (H, 8H)
        row_b = jnp.concatenate([z, hi_b, z, hf_b, z, ho_b, z, hg_b], axis=1)   # (H, 8H)
        whh_cat = jnp.concatenate([row_f, row_b], axis=0)                       # (2H, 8H)
        args += [wih_cat, whh_cat, b_cat]
    args += [fc_w, fc_b]

    # 1.0 on backward-direction gate columns (pattern [0^H 1^H] x 4).
    dir_mask = jnp.tile(
        jnp.concatenate([jnp.zeros((1, H), jnp.float32),
                         jnp.ones((1, H), jnp.float32)], axis=1), (1, 4))       # (1, 8H)
    args.append(dir_mask)

    # h0/c0 packed per layer as (num_layers, B, 2H): [..., :H]=fwd, [..., H:]=bwd.
    h0_cat = jnp.concatenate([h0[0::2], h0[1::2]], axis=-1)
    c0_cat = jnp.concatenate([c0[0::2], c0[1::2]], axis=-1)
    args += [h0_cat, c0_cat]

    kernel = make_cnn_lstm_kernel(num_layers, B, Lc, Cout, H, T)
    return pl.pallas_call(
        kernel,
        out_shape=jax.ShapeDtypeStruct((B, O), jnp.float32),
    )(*args)


# ---------------------------------------------------------------------------
# Pure-JAX reference (correctness check of the fused Pallas kernel).
# ---------------------------------------------------------------------------
def ref_forward(x, conv_w, conv_b, lstm_params, fc_w, fc_b, h0, c0):
    B, L, _ = x.shape
    K, _, Cout = conv_w.shape
    Lc = L - K + 1
    conv = jnp.zeros((B, Lc, Cout), jnp.float32)
    for k in range(K):
        conv = conv + jnp.einsum('blc,co->blo', x[:, k:k + Lc, :], conv_w[k])
    conv = jax.nn.relu(conv + conv_b[0])
    Lp = Lc - 3
    pooled = conv[:, 0:Lp, :]
    for p in range(1, 4):
        pooled = jnp.maximum(pooled, conv[:, p:p + Lp, :])

    def run_dir(xseq, h, c, wih_t, whh_t, b, reverse):
        T = xseq.shape[1]
        H = h.shape[-1]
        order = range(T - 1, -1, -1) if reverse else range(T)
        outs = [None] * T
        for t in order:
            gates = xseq[:, t, :] @ wih_t + h @ whh_t + b[0]
            i = jax.nn.sigmoid(gates[:, 0:H])
            f = jax.nn.sigmoid(gates[:, H:2 * H])
            g = jnp.tanh(gates[:, 2 * H:3 * H])
            o = jax.nn.sigmoid(gates[:, 3 * H:4 * H])
            c = f * c + i * g
            h = o * jnp.tanh(c)
            outs[t] = h
        return jnp.stack(outs, axis=1)

    cur = pooled
    for l, layer in enumerate(lstm_params):
        dirs = []
        for d in range(2):
            wih_t, whh_t, b = layer[d]
            dirs.append(run_dir(cur, h0[2 * l + d], c0[2 * l + d],
                                wih_t, whh_t, b, d == 1))
        cur = jnp.concatenate(dirs, axis=-1)
    return cur[:, -1, :] @ fc_w + fc_b[0]


# ---------------------------------------------------------------------------
# Deterministic parameter construction + run.
# ---------------------------------------------------------------------------
def uniform(key, shape, fan):
    bound = 1.0 / (fan ** 0.5)
    return jax.random.uniform(key, shape, jnp.float32, -bound, bound)


if __name__ == "__main__":
    # args: input_size=4, output_size=8, hidden_size=32, num_layers=2
    B, L = 2, 16
    input_size, output_size, hidden_size, num_layers = 4, 8, 32, 2
    K = 4
    H = hidden_size

    key = jax.random.PRNGKey(0)
    keys = jax.random.split(key, 32)
    ki = iter(keys)

    # Conv1d params: PyTorch weight (Cout, Cin, K); stored here as (K, Cin, Cout).
    conv_w = uniform(next(ki), (K, input_size, output_size), input_size * K)
    conv_b = uniform(next(ki), (1, output_size), input_size * K)

    # Bidirectional multi-layer LSTM params (weights pre-transposed, biases combined).
    lstm_params = []
    for l in range(num_layers):
        d_in = output_size if l == 0 else 2 * H
        layer = []
        for d in range(2):
            wih_t = uniform(next(ki), (d_in, 4 * H), H)
            whh_t = uniform(next(ki), (H, 4 * H), H)
            b = uniform(next(ki), (1, 4 * H), H)   # b_ih + b_hh folded into one bias
            layer.append((wih_t, whh_t, b))
        lstm_params.append(tuple(layer))
    lstm_params = tuple(lstm_params)

    # Linear(2H -> output_size); stored transposed.
    fc_w = uniform(next(ki), (2 * H, output_size), 2 * H)
    fc_b = uniform(next(ki), (1, output_size), 2 * H)

    # TODO(synk): the PyTorch module draws h_0/c_0 with torch.randn on every
    # forward; here they are generated deterministically on the host from the
    # PRNG key and passed in explicitly (same semantics given the same draw).
    h0 = jax.random.normal(next(ki), (2 * num_layers, B, H), jnp.float32)
    c0 = jax.random.normal(next(ki), (2 * num_layers, B, H), jnp.float32)

    # Example input: (B, L, input_size), matching the module's batch_first input.
    x = jax.random.normal(next(ki), (B, L, input_size), jnp.float32)

    out = cnn_lstm_forward(x, conv_w, conv_b, lstm_params, fc_w, fc_b, h0, c0)
    out = jax.block_until_ready(out)

    ref = ref_forward(x, conv_w, conv_b, lstm_params, fc_w, fc_b, h0, c0)
    assert out.shape == (B, output_size), out.shape
    assert jnp.allclose(out, ref, atol=1e-4, rtol=1e-4), (out, ref)

    print("KERNEL_OK")
</pallas_src>

<mosaic_0001>
module attributes {stable_mosaic.version = 11 : i64} {
  func.func @kernel(%arg0: memref<26x16xf32, #tpu.memory_space<vmem>>, %arg1: memref<16x8xf32, #tpu.memory_space<vmem>>, %arg2: memref<1x8xf32, #tpu.memory_space<vmem>>, %arg3: memref<8x256xf32, #tpu.memory_space<vmem>>, %arg4: memref<64x256xf32, #tpu.memory_space<vmem>>, %arg5: memref<1x256xf32, #tpu.memory_space<vmem>>, %arg6: memref<64x256xf32, #tpu.memory_space<vmem>>, %arg7: memref<64x256xf32, #tpu.memory_space<vmem>>, %arg8: memref<1x256xf32, #tpu.memory_space<vmem>>, %arg9: memref<64x8xf32, #tpu.memory_space<vmem>>, %arg10: memref<1x8xf32, #tpu.memory_space<vmem>>, %arg11: memref<1x256xf32, #tpu.memory_space<vmem>>, %arg12: memref<2x2x64xf32, #tpu.memory_space<vmem>>, %arg13: memref<2x2x64xf32, #tpu.memory_space<vmem>>, %arg14: memref<2x8xf32, #tpu.memory_space<vmem>>) attributes {dimension_semantics = [], scalar_prefetch = 0 : i64, scratch_operands = 0 : i64, tpu.core_type = #tpu.core_type<tc>} {
    %c0 = arith.constant 0 : index
    %c0_0 = arith.constant 0 : index
    %0 = vector.load %arg11[%c0, %c0_0] : memref<1x256xf32, #tpu.memory_space<vmem>>, vector<1x256xf32>
    %cst = arith.constant 0.000000e+00 : f32
    %1 = vector.broadcast %cst : f32 to vector<1x256xf32>
    %2 = arith.cmpf one, %0, %1 : vector<1x256xf32>
    %3 = vector.shape_cast %2 : vector<1x256xi1> to vector<1x256xi1>
    %4 = vector.broadcast %3 : vector<1x256xi1> to vector<2x256xi1>
    %c0_1 = arith.constant 0 : index
    %c0_2 = arith.constant 0 : index
    %5 = vector.load %arg0[%c0_1, %c0_2] : memref<26x16xf32, #tpu.memory_space<vmem>>, vector<26x16xf32>
    %c0_3 = arith.constant 0 : index
    %c0_4 = arith.constant 0 : index
    %6 = vector.load %arg1[%c0_3, %c0_4] : memref<16x8xf32, #tpu.memory_space<vmem>>, vector<16x8xf32>
    %cst_5 = arith.constant dense<0.000000e+00> : vector<26x8xf32>
    %7 = tpu.matmul %5, %6, %cst_5 {dimension_numbers = #tpu.dot_dimension_numbers<[1], [0], [0], [1], [0, 0, 1, 1], [], []>} : vector<26x16xf32>, vector<16x8xf32>, vector<26x8xf32> -> vector<26x8xf32>
    %c0_6 = arith.constant 0 : index
    %c0_7 = arith.constant 0 : index
    %8 = vector.load %arg2[%c0_6, %c0_7] : memref<1x8xf32, #tpu.memory_space<vmem>>, vector<1x8xf32>
    %9 = vector.broadcast %8 : vector<1x8xf32> to vector<26x8xf32>
    %10 = arith.addf %7, %9 : vector<26x8xf32>
    %cst_8 = arith.constant 0.000000e+00 : f32
    %11 = vector.broadcast %cst_8 : f32 to vector<26x8xf32>
    %12 = arith.maximumf %10, %11 : vector<26x8xf32>
    %13 = vector.extract_strided_slice %12 {offsets = [0, 0], sizes = [20, 8], strides = [1, 1]} : vector<26x8xf32> to vector<20x8xf32>
    %14 = vector.extract_strided_slice %12 {offsets = [2, 0], sizes = [20, 8], strides = [1, 1]} : vector<26x8xf32> to vector<20x8xf32>
    %15 = arith.maximumf %13, %14 : vector<20x8xf32>
    %16 = vector.extract_strided_slice %12 {offsets = [4, 0], sizes = [20, 8], strides = [1, 1]} : vector<26x8xf32> to vector<20x8xf32>
    %17 = arith.maximumf %15, %16 : vector<20x8xf32>
    %18 = vector.extract_strided_slice %12 {offsets = [6, 0], sizes = [20, 8], strides = [1, 1]} : vector<26x8xf32> to vector<20x8xf32>
    %19 = arith.maximumf %17, %18 : vector<20x8xf32>
    %c0_9 = arith.constant 0 : index
    %c0_10 = arith.constant 0 : index
    %20 = vector.load %arg3[%c0_9, %c0_10] : memref<8x256xf32, #tpu.memory_space<vmem>>, vector<8x256xf32>
    %cst_11 = arith.constant dense<0.000000e+00> : vector<20x256xf32>
    %21 = tpu.matmul %19, %20, %cst_11 {dimension_numbers = #tpu.dot_dimension_numbers<[1], [0], [0], [1], [0, 0, 1, 1], [], []>} : vector<20x8xf32>, vector<8x256xf32>, vector<20x256xf32> -> vector<20x256xf32>
    %c0_12 = arith.constant 0 : index
    %c0_13 = arith.constant 0 : index
    %22 = vector.load %arg5[%c0_12, %c0_13] : memref<1x256xf32, #tpu.memory_space<vmem>>, vector<1x256xf32>
    %23 = vector.broadcast %22 : vector<1x256xf32> to vector<20x256xf32>
    %24 = arith.addf %21, %23 : vector<20x256xf32>
    %c0_14 = arith.constant 0 : index
    %c0_15 = arith.constant 0 : index
    %25 = vector.load %arg4[%c0_14, %c0_15] : memref<64x256xf32, #tpu.memory_space<vmem>>, vector<64x256xf32>
    %c0_16 = arith.constant 0 : index
    %c0_17 = arith.constant 0 : index
    %c0_18 = arith.constant 0 : index
    %26 = vector.load %arg12[%c0_16, %c0_17, %c0_18] : memref<2x2x64xf32, #tpu.memory_space<vmem>>, vector<1x2x64xf32>
    %27 = vector.shape_cast %26 : vector<1x2x64xf32> to vector<2x64xf32>
    %c0_19 = arith.constant 0 : index
    %c0_20 = arith.constant 0 : index
    %c0_21 = arith.constant 0 : index
    %28 = vector.load %arg13[%c0_19, %c0_20, %c0_21] : memref<2x2x64xf32, #tpu.memory_space<vmem>>, vector<1x2x64xf32>
    %29 = vector.shape_cast %28 : vector<1x2x64xf32> to vector<2x64xf32>
    %cst_22 = arith.constant dense<0.000000e+00> : vector<2x256xf32>
    %30 = tpu.matmul %27, %25, %cst_22 {dimension_numbers = #tpu.dot_dimension_numbers<[1], [0], [0], [1], [0, 0, 1, 1], [], []>} : vector<2x64xf32>, vector<64x256xf32>, vector<2x256xf32> -> vector<2x256xf32>
    %31 = vector.extract_strided_slice %24 {offsets = [0, 0], sizes = [2, 256], strides = [1, 1]} : vector<20x256xf32> to vector<2x256xf32>
    %32 = vector.extract_strided_slice %24 {offsets = [18, 0], sizes = [2, 256], strides = [1, 1]} : vector<20x256xf32> to vector<2x256xf32>
    %33 = arith.select %4, %32, %31 : vector<2x256xi1>, vector<2x256xf32>
    %34 = arith.addf %33, %30 : vector<2x256xf32>
    %35 = vector.extract_strided_slice %34 {offsets = [0, 0], sizes = [2, 192], strides = [1, 1]} : vector<2x256xf32> to vector<2x192xf32>
    %cst_23 = arith.constant 5.000000e-01 : f32
    %36 = vector.broadcast %cst_23 : f32 to vector<2x192xf32>
    %37 = arith.mulf %36, %35 : vector<2x192xf32>
    %38 = math.tanh %37 : vector<2x192xf32>
    %cst_24 = arith.constant 5.000000e-01 : f32
    %39 = vector.broadcast %cst_24 : f32 to vector<2x192xf32>
    %40 = arith.mulf %39, %38 : vector<2x192xf32>
    %cst_25 = arith.constant 5.000000e-01 : f32
    %41 = vector.broadcast %cst_25 : f32 to vector<2x192xf32>
    %42 = arith.addf %40, %41 : vector<2x192xf32>
    %43 = vector.extract_strided_slice %42 {offsets = [0, 0], sizes = [2, 64], strides = [1, 1]} : vector<2x192xf32> to vector<2x64xf32>
    %44 = vector.extract_strided_slice %42 {offsets = [0, 64], sizes = [2, 64], strides = [1, 1]} : vector<2x192xf32> to vector<2x64xf32>
    %45 = vector.extract_strided_slice %42 {offsets = [0, 128], sizes = [2, 64], strides = [1, 1]} : vector<2x192xf32> to vector<2x64xf32>
    %46 = vector.extract_strided_slice %34 {offsets = [0, 192], sizes = [2, 64], strides = [1, 1]} : vector<2x256xf32> to vector<2x64xf32>
    %47 = math.tanh %46 : vector<2x64xf32>
    %48 = arith.mulf %44, %29 : vector<2x64xf32>
    %49 = arith.mulf %43, %47 : vector<2x64xf32>
    %50 = arith.addf %48, %49 : vector<2x64xf32>
    %51 = math.tanh %50 : vector<2x64xf32>
    %52 = arith.mulf %45, %51 : vector<2x64xf32>
    %53 = vector.extract_strided_slice %52 {offsets = [0, 0], sizes = [2, 32], strides = [1, 1]} : vector<2x64xf32> to vector<2x32xf32>
    %54 = vector.extract_strided_slice %52 {offsets = [0, 32], sizes = [2, 32], strides = [1, 1]} : vector<2x64xf32> to vector<2x32xf32>
    %cst_26 = arith.constant dense<0.000000e+00> : vector<2x256xf32>
    %55 = tpu.matmul %52, %25, %cst_26 {dimension_numbers = #tpu.dot_dimension_numbers<[1], [0], [0], [1], [0, 0, 1, 1], [], []>} : vector<2x64xf32>, vector<64x256xf32>, vector<2x256xf32> -> vector<2x256xf32>
    %56 = vector.extract_strided_slice %24 {offsets = [2, 0], sizes = [2, 256], strides = [1, 1]} : vector<20x256xf32> to vector<2x256xf32>
    %57 = vector.extract_strided_slice %24 {offsets = [16, 0], sizes = [2, 256], strides = [1, 1]} : vector<20x256xf32> to vector<2x256xf32>
    %58 = arith.select %4, %57, %56 : vector<2x256xi1>, vector<2x256xf32>
    %59 = arith.addf %58, %55 : vector<2x256xf32>
    %60 = vector.extract_strided_slice %59 {offsets = [0, 0], sizes = [2, 192], strides = [1, 1]} : vector<2x256xf32> to vector<2x192xf32>
    %cst_27 = arith.constant 5.000000e-01 : f32
    %61 = vector.broadcast %cst_27 : f32 to vector<2x192xf32>
    %62 = arith.mulf %61, %60 : vector<2x192xf32>
    %63 = math.tanh %62 : vector<2x192xf32>
    %cst_28 = arith.constant 5.000000e-01 : f32
    %64 = vector.broadcast %cst_28 : f32 to vector<2x192xf32>
    %65 = arith.mulf %64, %63 : vector<2x192xf32>
    %cst_29 = arith.constant 5.000000e-01 : f32
    %66 = vector.broadcast %cst_29 : f32 to vector<2x192xf32>
    %67 = arith.addf %65, %66 : vector<2x192xf32>
    %68 = vector.extract_strided_slice %67 {offsets = [0, 0], sizes = [2, 64], strides = [1, 1]} : vector<2x192xf32> to vector<2x64xf32>
    %69 = vector.extract_strided_slice %67 {offsets = [0, 64], sizes = [2, 64], strides = [1, 1]} : vector<2x192xf32> to vector<2x64xf32>
    %70 = vector.extract_strided_slice %67 {offsets = [0, 128], sizes = [2, 64], strides = [1, 1]} : vector<2x192xf32> to vector<2x64xf32>
    %71 = vector.extract_strided_slice %59 {offsets = [0, 192], sizes = [2, 64], strides = [1, 1]} : vector<2x256xf32> to vector<2x64xf32>
    %72 = math.tanh %71 : vector<2x64xf32>
    %73 = arith.mulf %69, %50 : vector<2x64xf32>
    %74 = arith.mulf %68, %72 : vector<2x64xf32>
    %75 = arith.addf %73, %74 : vector<2x64xf32>
    %76 = math.tanh %75 : vector<2x64xf32>
    %77 = arith.mulf %70, %76 : vector<2x64xf32>
    %78 = vector.extract_strided_slice %77 {offsets = [0, 0], sizes = [2, 32], strides = [1, 1]} : vector<2x64xf32> to vector<2x32xf32>
    %79 = vector.extract_strided_slice %77 {offsets = [0, 32], sizes = [2, 32], strides = [1, 1]} : vector<2x64xf32> to vector<2x32xf32>
    %cst_30 = arith.constant dense<0.000000e+00> : vector<2x256xf32>
    %80 = tpu.matmul %77, %25, %cst_30 {dimension_numbers = #tpu.dot_dimension_numbers<[1], [0], [0], [1], [0, 0, 1, 1], [], []>} : vector<2x64xf32>, vector<64x256xf32>, vector<2x256xf32> -> vector<2x256xf32>
    %81 = vector.extract_strided_slice %24 {offsets = [4, 0], sizes = [2, 256], strides = [1, 1]} : vector<20x256xf32> to vector<2x256xf32>
    %82 = vector.extract_strided_slice %24 {offsets = [14, 0], sizes = [2, 256], strides = [1, 1]} : vector<20x256xf32> to vector<2x256xf32>
    %83 = arith.select %4, %82, %81 : vector<2x256xi1>, vector<2x256xf32>
    %84 = arith.addf %83, %80 : vector<2x256xf32>
    %85 = vector.extract_strided_slice %84 {offsets = [0, 0], sizes = [2, 192], strides = [1, 1]} : vector<2x256xf32> to vector<2x192xf32>
    %cst_31 = arith.constant 5.000000e-01 : f32
    %86 = vector.broadcast %cst_31 : f32 to vector<2x192xf32>
    %87 = arith.mulf %86, %85 : vector<2x192xf32>
    %88 = math.tanh %87 : vector<2x192xf32>
    %cst_32 = arith.constant 5.000000e-01 : f32
    %89 = vector.broadcast %cst_32 : f32 to vector<2x192xf32>
    %90 = arith.mulf %89, %88 : vector<2x192xf32>
    %cst_33 = arith.constant 5.000000e-01 : f32
    %91 = vector.broadcast %cst_33 : f32 to vector<2x192xf32>
    %92 = arith.addf %90, %91 : vector<2x192xf32>
    %93 = vector.extract_strided_slice %92 {offsets = [0, 0], sizes = [2, 64], strides = [1, 1]} : vector<2x192xf32> to vector<2x64xf32>
    %94 = vector.extract_strided_slice %92 {offsets = [0, 64], sizes = [2, 64], strides = [1, 1]} : vector<2x192xf32> to vector<2x64xf32>
    %95 = vector.extract_strided_slice %92 {offsets = [0, 128], sizes = [2, 64], strides = [1, 1]} : vector<2x192xf32> to vector<2x64xf32>
    %96 = vector.extract_strided_slice %84 {offsets = [0, 192], sizes = [2, 64], strides = [1, 1]} : vector<2x256xf32> to vector<2x64xf32>
    %97 = math.tanh %96 : vector<2x64xf32>
    %98 = arith.mulf %94, %75 : vector<2x64xf32>
    %99 = arith.mulf %93, %97 : vector<2x64xf32>
    %100 = arith.addf %98, %99 : vector<2x64xf32>
    %101 = math.tanh %100 : vector<2x64xf32>
    %102 = arith.mulf %95, %101 : vector<2x64xf32>
    %103 = vector.extract_strided_slice %102 {offsets = [0, 0], sizes = [2, 32], strides = [1, 1]} : vector<2x64xf32> to vector<2x32xf32>
    %104 = vector.extract_strided_slice %102 {offsets = [0, 32], sizes = [2, 32], strides = [1, 1]} : vector<2x64xf32> to vector<2x32xf32>
    %cst_34 = arith.constant dense<0.000000e+00> : vector<2x256xf32>
    %105 = tpu.matmul %102, %25, %cst_34 {dimension_numbers = #tpu.dot_dimension_numbers<[1], [0], [0], [1], [0, 0, 1, 1], [], []>} : vector<2x64xf32>, vector<64x256xf32>, vector<2x256xf32> -> vector<2x256xf32>
    %106 = vector.extract_strided_slice %24 {offsets = [6, 0], sizes = [2, 256], strides = [1, 1]} : vector<20x256xf32> to vector<2x256xf32>
    %107 = vector.extract_strided_slice %24 {offsets = [12, 0], sizes = [2, 256], strides = [1, 1]} : vector<20x256xf32> to vector<2x256xf32>
    %108 = arith.select %4, %107, %106 : vector<2x256xi1>, vector<2x256xf32>
    %109 = arith.addf %108, %105 : vector<2x256xf32>
    %110 = vector.extract_strided_slice %109 {offsets = [0, 0], sizes = [2, 192], strides = [1, 1]} : vector<2x256xf32> to vector<2x192xf32>
    %cst_35 = arith.constant 5.000000e-01 : f32
    %111 = vector.broadcast %cst_35 : f32 to vector<2x192xf32>
    %112 = arith.mulf %111, %110 : vector<2x192xf32>
    %113 = math.tanh %112 : vector<2x192xf32>
    %cst_36 = arith.constant 5.000000e-01 : f32
    %114 = vector.broadcast %cst_36 : f32 to vector<2x192xf32>
    %115 = arith.mulf %114, %113 : vector<2x192xf32>
    %cst_37 = arith.constant 5.000000e-01 : f32
    %116 = vector.broadcast %cst_37 : f32 to vector<2x192xf32>
    %117 = arith.addf %115, %116 : vector<2x192xf32>
    %118 = vector.extract_strided_slice %117 {offsets = [0, 0], sizes = [2, 64], strides = [1, 1]} : vector<2x192xf32> to vector<2x64xf32>
    %119 = vector.extract_strided_slice %117 {offsets = [0, 64], sizes = [2, 64], strides = [1, 1]} : vector<2x192xf32> to vector<2x64xf32>
    %120 = vector.extract_strided_slice %117 {offsets = [0, 128], sizes = [2, 64], strides = [1, 1]} : vector<2x192xf32> to vector<2x64xf32>
    %121 = vector.extract_strided_slice %109 {offsets = [0, 192], sizes = [2, 64], strides = [1, 1]} : vector<2x256xf32> to vector<2x64xf32>
    %122 = math.tanh %121 : vector<2x64xf32>
    %123 = arith.mulf %119, %100 : vector<2x64xf32>
    %124 = arith.mulf %118, %122 : vector<2x64xf32>
    %125 = arith.addf %123, %124 : vector<2x64xf32>
    %126 = math.tanh %125 : vector<2x64xf32>
    %127 = arith.mulf %120, %126 : vector<2x64xf32>
    %128 = vector.extract_strided_slice %127 {offsets = [0, 0], sizes = [2, 32], strides = [1, 1]} : vector<2x64xf32> to vector<2x32xf32>
    %129 = vector.extract_strided_slice %127 {offsets = [0, 32], sizes = [2, 32], strides = [1, 1]} : vector<2x64xf32> to vector<2x32xf32>
    %cst_38 = arith.constant dense<0.000000e+00> : vector<2x256xf32>
    %130 = tpu.matmul %127, %25, %cst_38 {dimension_numbers = #tpu.dot_dimension_numbers<[1], [0], [0], [1], [0, 0, 1, 1], [], []>} : vector<2x64xf32>, vector<64x256xf32>, vector<2x256xf32> -> vector<2x256xf32>
    %131 = vector.extract_strided_slice %24 {offsets = [8, 0], sizes = [2, 256], strides = [1, 1]} : vector<20x256xf32> to vector<2x256xf32>
    %132 = vector.extract_strided_slice %24 {offsets = [10, 0], sizes = [2, 256], strides = [1, 1]} : vector<20x256xf32> to vector<2x256xf32>
    %133 = arith.select %4, %132, %131 : vector<2x256xi1>, vector<2x256xf32>
    %134 = arith.addf %133, %130 : vector<2x256xf32>
    %135 = vector.extract_strided_slice %134 {offsets = [0, 0], sizes = [2, 192], strides = [1, 1]} : vector<2x256xf32> to vector<2x192xf32>
    %cst_39 = arith.constant 5.000000e-01 : f32
    %136 = vector.broadcast %cst_39 : f32 to vector<2x192xf32>
    %137 = arith.mulf %136, %135 : vector<2x192xf32>
    %138 = math.tanh %137 : vector<2x192xf32>
    %cst_40 = arith.constant 5.000000e-01 : f32
    %139 = vector.broadcast %cst_40 : f32 to vector<2x192xf32>
    %140 = arith.mulf %139, %138 : vector<2x192xf32>
    %cst_41 = arith.constant 5.000000e-01 : f32
    %141 = vector.broadcast %cst_41 : f32 to vector<2x192xf32>
    %142 = arith.addf %140, %141 : vector<2x192xf32>
    %143 = vector.extract_strided_slice %142 {offsets = [0, 0], sizes = [2, 64], strides = [1, 1]} : vector<2x192xf32> to vector<2x64xf32>
    %144 = vector.extract_strided_slice %142 {offsets = [0, 64], sizes = [2, 64], strides = [1, 1]} : vector<2x192xf32> to vector<2x64xf32>
    %145 = vector.extract_strided_slice %142 {offsets = [0, 128], sizes = [2, 64], strides = [1, 1]} : vector<2x192xf32> to vector<2x64xf32>
    %146 = vector.extract_strided_slice %134 {offsets = [0, 192], sizes = [2, 64], strides = [1, 1]} : vector<2x256xf32> to vector<2x64xf32>
    %147 = math.tanh %146 : vector<2x64xf32>
    %148 = arith.mulf %144, %125 : vector<2x64xf32>
    %149 = arith.mulf %143, %147 : vector<2x64xf32>
    %150 = arith.addf %148, %149 : vector<2x64xf32>
    %151 = math.tanh %150 : vector<2x64xf32>
    %152 = arith.mulf %145, %151 : vector<2x64xf32>
    %153 = vector.extract_strided_slice %152 {offsets = [0, 0], sizes = [2, 32], strides = [1, 1]} : vector<2x64xf32> to vector<2x32xf32>
    %154 = vector.extract_strided_slice %152 {offsets = [0, 32], sizes = [2, 32], strides = [1, 1]} : vector<2x64xf32> to vector<2x32xf32>
    %cst_42 = arith.constant dense<0.000000e+00> : vector<2x256xf32>
    %155 = tpu.matmul %152, %25, %cst_42 {dimension_numbers = #tpu.dot_dimension_numbers<[1], [0], [0], [1], [0, 0, 1, 1], [], []>} : vector<2x64xf32>, vector<64x256xf32>, vector<2x256xf32> -> vector<2x256xf32>
    %156 = vector.extract_strided_slice %24 {offsets = [10, 0], sizes = [2, 256], strides = [1, 1]} : vector<20x256xf32> to vector<2x256xf32>
    %157 = vector.extract_strided_slice %24 {offsets = [8, 0], sizes = [2, 256], strides = [1, 1]} : vector<20x256xf32> to vector<2x256xf32>
    %158 = arith.select %4, %157, %156 : vector<2x256xi1>, vector<2x256xf32>
    %159 = arith.addf %158, %155 : vector<2x256xf32>
    %160 = vector.extract_strided_slice %159 {offsets = [0, 0], sizes = [2, 192], strides = [1, 1]} : vector<2x256xf32> to vector<2x192xf32>
    %cst_43 = arith.constant 5.000000e-01 : f32
    %161 = vector.broadcast %cst_43 : f32 to vector<2x192xf32>
    %162 = arith.mulf %161, %160 : vector<2x192xf32>
    %163 = math.tanh %162 : vector<2x192xf32>
    %cst_44 = arith.constant 5.000000e-01 : f32
    %164 = vector.broadcast %cst_44 : f32 to vector<2x192xf32>
    %165 = arith.mulf %164, %163 : vector<2x192xf32>
    %cst_45 = arith.constant 5.000000e-01 : f32
    %166 = vector.broadcast %cst_45 : f32 to vector<2x192xf32>
    %167 = arith.addf %165, %166 : vector<2x192xf32>
    %168 = vector.extract_strided_slice %167 {offsets = [0, 0], sizes = [2, 64], strides = [1, 1]} : vector<2x192xf32> to vector<2x64xf32>
    %169 = vector.extract_strided_slice %167 {offsets = [0, 64], sizes = [2, 64], strides = [1, 1]} : vector<2x192xf32> to vector<2x64xf32>
    %170 = vector.extract_strided_slice %167 {offsets = [0, 128], sizes = [2, 64], strides = [1, 1]} : vector<2x192xf32> to vector<2x64xf32>
    %171 = vector.extract_strided_slice %159 {offsets = [0, 192], sizes = [2, 64], strides = [1, 1]} : vector<2x256xf32> to vector<2x64xf32>
    %172 = math.tanh %171 : vector<2x64xf32>
    %173 = arith.mulf %169, %150 : vector<2x64xf32>
    %174 = arith.mulf %168, %172 : vector<2x64xf32>
    %175 = arith.addf %173, %174 : vector<2x64xf32>
    %176 = math.tanh %175 : vector<2x64xf32>
    %177 = arith.mulf %170, %176 : vector<2x64xf32>
    %178 = vector.extract_strided_slice %177 {offsets = [0, 0], sizes = [2, 32], strides = [1, 1]} : vector<2x64xf32> to vector<2x32xf32>
    %179 = vector.extract_strided_slice %177 {offsets = [0, 32], sizes = [2, 32], strides = [1, 1]} : vector<2x64xf32> to vector<2x32xf32>
    %cst_46 = arith.constant dense<0.000000e+00> : vector<2x256xf32>
    %180 = tpu.matmul %177, %25, %cst_46 {dimension_numbers = #tpu.dot_dimension_numbers<[1], [0], [0], [1], [0, 0, 1, 1], [], []>} : vector<2x64xf32>, vector<64x256xf32>, vector<2x256xf32> -> vector<2x256xf32>
    %181 = vector.extract_strided_slice %24 {offsets = [12, 0], sizes = [2, 256], strides = [1, 1]} : vector<20x256xf32> to vector<2x256xf32>
    %182 = vector.extract_strided_slice %24 {offsets = [6, 0], sizes = [2, 256], strides = [1, 1]} : vector<20x256xf32> to vector<2x256xf32>
    %183 = arith.select %4, %182, %181 : vector<2x256xi1>, vector<2x256xf32>
    %184 = arith.addf %183, %180 : vector<2x256xf32>
    %185 = vector.extract_strided_slice %184 {offsets = [0, 0], sizes = [2, 192], strides = [1, 1]} : vector<2x256xf32> to vector<2x192xf32>
    %cst_47 = arith.constant 5.000000e-01 : f32
    %186 = vector.broadcast %cst_47 : f32 to vector<2x192xf32>
    %187 = arith.mulf %186, %185 : vector<2x192xf32>
    %188 = math.tanh %187 : vector<2x192xf32>
    %cst_48 = arith.constant 5.000000e-01 : f32
    %189 = vector.broadcast %cst_48 : f32 to vector<2x192xf32>
    %190 = arith.mulf %189, %188 : vector<2x192xf32>
    %cst_49 = arith.constant 5.000000e-01 : f32
    %191 = vector.broadcast %cst_49 : f32 to vector<2x192xf32>
    %192 = arith.addf %190, %191 : vector<2x192xf32>
    %193 = vector.extract_strided_slice %192 {offsets = [0, 0], sizes = [2, 64], strides = [1, 1]} : vector<2x192xf32> to vector<2x64xf32>
    %194 = vector.extract_strided_slice %192 {offsets = [0, 64], sizes = [2, 64], strides = [1, 1]} : vector<2x192xf32> to vector<2x64xf32>
    %195 = vector.extract_strided_slice %192 {offsets = [0, 128], sizes = [2, 64], strides = [1, 1]} : vector<2x192xf32> to vector<2x64xf32>
    %196 = vector.extract_strided_slice %184 {offsets = [0, 192], sizes = [2, 64], strides = [1, 1]} : vector<2x256xf32> to vector<2x64xf32>
    %197 = math.tanh %196 : vector<2x64xf32>
    %198 = arith.mulf %194, %175 : vector<2x64xf32>
    %199 = arith.mulf %193, %197 : vector<2x64xf32>
    %200 = arith.addf %198, %199 : vector<2x64xf32>
    %201 = math.tanh %200 : vector<2x64xf32>
    %202 = arith.mulf %195, %201 : vector<2x64xf32>
    %203 = vector.extract_strided_slice %202 {offsets = [0, 0], sizes = [2, 32], strides = [1, 1]} : vector<2x64xf32> to vector<2x32xf32>
    %204 = vector.extract_strided_slice %202 {offsets = [0, 32], sizes = [2, 32], strides = [1, 1]} : vector<2x64xf32> to vector<2x32xf32>
    %cst_50 = arith.constant dense<0.000000e+00> : vector<2x256xf32>
    %205 = tpu.matmul %202, %25, %cst_50 {dimension_numbers = #tpu.dot_dimension_numbers<[1], [0], [0], [1], [0, 0, 1, 1], [], []>} : vector<2x64xf32>, vector<64x256xf32>, vector<2x256xf32> -> vector<2x256xf32>
    %206 = vector.extract_strided_slice %24 {offsets = [14, 0], sizes = [2, 256], strides = [1, 1]} : vector<20x256xf32> to vector<2x256xf32>
    %207 = vector.extract_strided_slice %24 {offsets = [4, 0], sizes = [2, 256], strides = [1, 1]} : vector<20x256xf32> to vector<2x256xf32>
    %208 = arith.select %4, %207, %206 : vector<2x256xi1>, vector<2x256xf32>
    %209 = arith.addf %208, %205 : vector<2x256xf32>
    %210 = vector.extract_strided_slice %209 {offsets = [0, 0], sizes = [2, 192], strides = [1, 1]} : vector<2x256xf32> to vector<2x192xf32>
    %cst_51 = arith.constant 5.000000e-01 : f32
    %211 = vector.broadcast %cst_51 : f32 to vector<2x192xf32>
    %212 = arith.mulf %211, %210 : vector<2x192xf32>
    %213 = math.tanh %212 : vector<2x192xf32>
    %cst_52 = arith.constant 5.000000e-01 : f32
    %214 = vector.broadcast %cst_52 : f32 to vector<2x192xf32>
    %215 = arith.mulf %214, %213 : vector<2x192xf32>
    %cst_53 = arith.constant 5.000000e-01 : f32
    %216 = vector.broadcast %cst_53 : f32 to vector<2x192xf32>
    %217 = arith.addf %215, %216 : vector<2x192xf32>
    %218 = vector.extract_strided_slice %217 {offsets = [0, 0], sizes = [2, 64], strides = [1, 1]} : vector<2x192xf32> to vector<2x64xf32>
    %219 = vector.extract_strided_slice %217 {offsets = [0, 64], sizes = [2, 64], strides = [1, 1]} : vector<2x192xf32> to vector<2x64xf32>
    %220 = vector.extract_strided_slice %217 {offsets = [0, 128], sizes = [2, 64], strides = [1, 1]} : vector<2x192xf32> to vector<2x64xf32>
    %221 = vector.extract_strided_slice %209 {offsets = [0, 192], sizes = [2, 64], strides = [1, 1]} : vector<2x256xf32> to vector<2x64xf32>
    %222 = math.tanh %221 : vector<2x64xf32>
    %223 = arith.mulf %219, %200 : vector<2x64xf32>
    %224 = arith.mulf %218, %222 : vector<2x64xf32>
    %225 = arith.addf %223, %224 : vector<2x64xf32>
    %226 = math.tanh %225 : vector<2x64xf32>
    %227 = arith.mulf %220, %226 : vector<2x64xf32>
    %228 = vector.extract_strided_slice %227 {offsets = [0, 0], sizes = [2, 32], strides = [1, 1]} : vector<2x64xf32> to vector<2x32xf32>
    %229 = vector.extract_strided_slice %227 {offsets = [0, 32], sizes = [2, 32], strides = [1, 1]} : vector<2x64xf32> to vector<2x32xf32>
    %cst_54 = arith.constant dense<0.000000e+00> : vector<2x256xf32>
    %230 = tpu.matmul %227, %25, %cst_54 {dimension_numbers = #tpu.dot_dimension_numbers<[1], [0], [0], [1], [0, 0, 1, 1], [], []>} : vector<2x64xf32>, vector<64x256xf32>, vector<2x256xf32> -> vector<2x256xf32>
    %231 = vector.extract_strided_slice %24 {offsets = [16, 0], sizes = [2, 256], strides = [1, 1]} : vector<20x256xf32> to vector<2x256xf32>
    %232 = vector.extract_strided_slice %24 {offsets = [2, 0], sizes = [2, 256], strides = [1, 1]} : vector<20x256xf32> to vector<2x256xf32>
    %233 = arith.select %4, %232, %231 : vector<2x256xi1>, vector<2x256xf32>
    %234 = arith.addf %233, %230 : vector<2x256xf32>
    %235 = vector.extract_strided_slice %234 {offsets = [0, 0], sizes = [2, 192], strides = [1, 1]} : vector<2x256xf32> to vector<2x192xf32>
    %cst_55 = arith.constant 5.000000e-01 : f32
    %236 = vector.broadcast %cst_55 : f32 to vector<2x192xf32>
    %237 = arith.mulf %236, %235 : vector<2x192xf32>
    %238 = math.tanh %237 : vector<2x192xf32>
    %cst_56 = arith.constant 5.000000e-01 : f32
    %239 = vector.broadcast %cst_56 : f32 to vector<2x192xf32>
    %240 = arith.mulf %239, %238 : vector<2x192xf32>
    %cst_57 = arith.constant 5.000000e-01 : f32
    %241 = vector.broadcast %cst_57 : f32 to vector<2x192xf32>
    %242 = arith.addf %240, %241 : vector<2x192xf32>
    %243 = vector.extract_strided_slice %242 {offsets = [0, 0], sizes = [2, 64], strides = [1, 1]} : vector<2x192xf32> to vector<2x64xf32>
    %244 = vector.extract_strided_slice %242 {offsets = [0, 64], sizes = [2, 64], strides = [1, 1]} : vector<2x192xf32> to vector<2x64xf32>
    %245 = vector.extract_strided_slice %242 {offsets = [0, 128], sizes = [2, 64], strides = [1, 1]} : vector<2x192xf32> to vector<2x64xf32>
    %246 = vector.extract_strided_slice %234 {offsets = [0, 192], sizes = [2, 64], strides = [1, 1]} : vector<2x256xf32> to vector<2x64xf32>
    %247 = math.tanh %246 : vector<2x64xf32>
    %248 = arith.mulf %244, %225 : vector<2x64xf32>
    %249 = arith.mulf %243, %247 : vector<2x64xf32>
    %250 = arith.addf %248, %249 : vector<2x64xf32>
    %251 = math.tanh %250 : vector<2x64xf32>
    %252 = arith.mulf %245, %251 : vector<2x64xf32>
    %253 = vector.extract_strided_slice %252 {offsets = [0, 0], sizes = [2, 32], strides = [1, 1]} : vector<2x64xf32> to vector<2x32xf32>
    %254 = vector.extract_strided_slice %252 {offsets = [0, 32], sizes = [2, 32], strides = [1, 1]} : vector<2x64xf32> to vector<2x32xf32>
    %cst_58 = arith.constant dense<0.000000e+00> : vector<2x256xf32>
    %255 = tpu.matmul %252, %25, %cst_58 {dimension_numbers = #tpu.dot_dimension_numbers<[1], [0], [0], [1], [0, 0, 1, 1], [], []>} : vector<2x64xf32>, vector<64x256xf32>, vector<2x256xf32> -> vector<2x256xf32>
    %256 = vector.extract_strided_slice %24 {offsets = [18, 0], sizes = [2, 256], strides = [1, 1]} : vector<20x256xf32> to vector<2x256xf32>
    %257 = vector.extract_strided_slice %24 {offsets = [0, 0], sizes = [2, 256], strides = [1, 1]} : vector<20x256xf32> to vector<2x256xf32>
    %258 = arith.select %4, %257, %256 : vector<2x256xi1>, vector<2x256xf32>
    %259 = arith.addf %258, %255 : vector<2x256xf32>
    %260 = vector.extract_strided_slice %259 {offsets = [0, 0], sizes = [2, 192], strides = [1, 1]} : vector<2x256xf32> to vector<2x192xf32>
    %cst_59 = arith.constant 5.000000e-01 : f32
    %261 = vector.broadcast %cst_59 : f32 to vector<2x192xf32>
    %262 = arith.mulf %261, %260 : vector<2x192xf32>
    %263 = math.tanh %262 : vector<2x192xf32>
    %cst_60 = arith.constant 5.000000e-01 : f32
    %264 = vector.broadcast %cst_60 : f32 to vector<2x192xf32>
    %265 = arith.mulf %264, %263 : vector<2x192xf32>
    %cst_61 = arith.constant 5.000000e-01 : f32
    %266 = vector.broadcast %cst_61 : f32 to vector<2x192xf32>
    %267 = arith.addf %265, %266 : vector<2x192xf32>
    %268 = vector.extract_strided_slice %267 {offsets = [0, 0], sizes = [2, 64], strides = [1, 1]} : vector<2x192xf32> to vector<2x64xf32>
    %269 = vector.extract_strided_slice %267 {offsets = [0, 64], sizes = [2, 64], strides = [1, 1]} : vector<2x192xf32> to vector<2x64xf32>
    %270 = vector.extract_strided_slice %267 {offsets = [0, 128], sizes = [2, 64], strides = [1, 1]} : vector<2x192xf32> to vector<2x64xf32>
    %271 = vector.extract_strided_slice %259 {offsets = [0, 192], sizes = [2, 64], strides = [1, 1]} : vector<2x256xf32> to vector<2x64xf32>
    %272 = math.tanh %271 : vector<2x64xf32>
    %273 = arith.mulf %269, %250 : vector<2x64xf32>
    %274 = arith.mulf %268, %272 : vector<2x64xf32>
    %275 = arith.addf %273, %274 : vector<2x64xf32>
    %276 = math.tanh %275 : vector<2x64xf32>
    %277 = arith.mulf %270, %276 : vector<2x64xf32>
    %278 = vector.extract_strided_slice %277 {offsets = [0, 0], sizes = [2, 32], strides = [1, 1]} : vector<2x64xf32> to vector<2x32xf32>
    %279 = vector.extract_strided_slice %277 {offsets = [0, 32], sizes = [2, 32], strides = [1, 1]} : vector<2x64xf32> to vector<2x32xf32>
    %280 = vector.shape_cast %53 : vector<2x32xf32> to vector<1x2x32xf32>
    %281 = vector.shape_cast %78 : vector<2x32xf32> to vector<1x2x32xf32>
    %282 = vector.shape_cast %103 : vector<2x32xf32> to vector<1x2x32xf32>
    %283 = vector.shape_cast %128 : vector<2x32xf32> to vector<1x2x32xf32>
    %284 = vector.shape_cast %153 : vector<2x32xf32> to vector<1x2x32xf32>
    %285 = vector.shape_cast %178 : vector<2x32xf32> to vector<1x2x32xf32>
    %286 = vector.shape_cast %203 : vector<2x32xf32> to vector<1x2x32xf32>
    %287 = vector.shape_cast %228 : vector<2x32xf32> to vector<1x2x32xf32>
    %288 = vector.shape_cast %253 : vector<2x32xf32> to vector<1x2x32xf32>
    %289 = vector.shape_cast %278 : vector<2x32xf32> to vector<1x2x32xf32>
    %290 = tpu.concatenate %280, %281, %282, %283, %284, %285, %286, %287, %288, %289 in 0 : vector<1x2x32xf32>, vector<1x2x32xf32>, vector<1x2x32xf32>, vector<1x2x32xf32>, vector<1x2x32xf32>, vector<1x2x32xf32>, vector<1x2x32xf32>, vector<1x2x32xf32>, vector<1x2x32xf32>, vector<1x2x32xf32> -> vector<10x2x32xf32>
    %291 = vector.shape_cast %279 : vector<2x32xf32> to vector<1x2x32xf32>
    %292 = vector.shape_cast %254 : vector<2x32xf32> to vector<1x2x32xf32>
    %293 = vector.shape_cast %229 : vector<2x32xf32> to vector<1x2x32xf32>
    %294 = vector.shape_cast %204 : vector<2x32xf32> to vector<1x2x32xf32>
    %295 = vector.shape_cast %179 : vector<2x32xf32> to vector<1x2x32xf32>
    %296 = vector.shape_cast %154 : vector<2x32xf32> to vector<1x2x32xf32>
    %297 = vector.shape_cast %129 : vector<2x32xf32> to vector<1x2x32xf32>
    %298 = vector.shape_cast %104 : vector<2x32xf32> to vector<1x2x32xf32>
    %299 = vector.shape_cast %79 : vector<2x32xf32> to vector<1x2x32xf32>
    %300 = vector.shape_cast %54 : vector<2x32xf32> to vector<1x2x32xf32>
    %301 = tpu.concatenate %291, %292, %293, %294, %295, %296, %297, %298, %299, %300 in 0 : vector<1x2x32xf32>, vector<1x2x32xf32>, vector<1x2x32xf32>, vector<1x2x32xf32>, vector<1x2x32xf32>, vector<1x2x32xf32>, vector<1x2x32xf32>, vector<1x2x32xf32>, vector<1x2x32xf32>, vector<1x2x32xf32> -> vector<10x2x32xf32>
    %302 = tpu.concatenate %290, %301 in 2 : vector<10x2x32xf32>, vector<10x2x32xf32> -> vector<10x2x64xf32>
    %303 = vector.shape_cast %302 : vector<10x2x64xf32> to vector<20x64xf32>
    %c0_62 = arith.constant 0 : index
    %c0_63 = arith.constant 0 : index
    %304 = vector.load %arg6[%c0_62, %c0_63] : memref<64x256xf32, #tpu.memory_space<vmem>>, vector<64x256xf32>
    %cst_64 = arith.constant dense<0.000000e+00> : vector<20x256xf32>
    %305 = tpu.matmul %303, %304, %cst_64 {dimension_numbers = #tpu.dot_dimension_numbers<[1], [0], [0], [1], [0, 0, 1, 1], [], []>} : vector<20x64xf32>, vector<64x256xf32>, vector<20x256xf32> -> vector<20x256xf32>
    %c0_65 = arith.constant 0 : index
    %c0_66 = arith.constant 0 : index
    %306 = vector.load %arg8[%c0_65, %c0_66] : memref<1x256xf32, #tpu.memory_space<vmem>>, vector<1x256xf32>
    %307 = vector.broadcast %306 : vector<1x256xf32> to vector<20x256xf32>
    %308 = arith.addf %305, %307 : vector<20x256xf32>
    %c0_67 = arith.constant 0 : index
    %c0_68 = arith.constant 0 : index
    %309 = vector.load %arg7[%c0_67, %c0_68] : memref<64x256xf32, #tpu.memory_space<vmem>>, vector<64x256xf32>
    %c1 = arith.constant 1 : index
    %c0_69 = arith.constant 0 : index
    %c0_70 = arith.constant 0 : index
    %310 = vector.load %arg12[%c1, %c0_69, %c0_70] : memref<2x2x64xf32, #tpu.memory_space<vmem>>, vector<1x2x64xf32>
    %311 = vector.shape_cast %310 : vector<1x2x64xf32> to vector<2x64xf32>
    %c1_71 = arith.constant 1 : index
    %c0_72 = arith.constant 0 : index
    %c0_73 = arith.constant 0 : index
    %312 = vector.load %arg13[%c1_71, %c0_72, %c0_73] : memref<2x2x64xf32, #tpu.memory_space<vmem>>, vector<1x2x64xf32>
    %313 = vector.shape_cast %312 : vector<1x2x64xf32> to vector<2x64xf32>
    %cst_74 = arith.constant dense<0.000000e+00> : vector<2x256xf32>
    %314 = tpu.matmul %311, %309, %cst_74 {dimension_numbers = #tpu.dot_dimension_numbers<[1], [0], [0], [1], [0, 0, 1, 1], [], []>} : vector<2x64xf32>, vector<64x256xf32>, vector<2x256xf32> -> vector<2x256xf32>
    %315 = vector.extract_strided_slice %308 {offsets = [0, 0], sizes = [2, 256], strides = [1, 1]} : vector<20x256xf32> to vector<2x256xf32>
    %316 = vector.extract_strided_slice %308 {offsets = [18, 0], sizes = [2, 256], strides = [1, 1]} : vector<20x256xf32> to vector<2x256xf32>
    %317 = arith.select %4, %316, %315 : vector<2x256xi1>, vector<2x256xf32>
    %318 = arith.addf %317, %314 : vector<2x256xf32>
    %319 = vector.extract_strided_slice %318 {offsets = [0, 0], sizes = [2, 192], strides = [1, 1]} : vector<2x256xf32> to vector<2x192xf32>
    %cst_75 = arith.constant 5.000000e-01 : f32
    %320 = vector.broadcast %cst_75 : f32 to vector<2x192xf32>
    %321 = arith.mulf %320, %319 : vector<2x192xf32>
    %322 = math.tanh %321 : vector<2x192xf32>
    %cst_76 = arith.constant 5.000000e-01 : f32
    %323 = vector.broadcast %cst_76 : f32 to vector<2x192xf32>
    %324 = arith.mulf %323, %322 : vector<2x192xf32>
    %cst_77 = arith.constant 5.000000e-01 : f32
    %325 = vector.broadcast %cst_77 : f32 to vector<2x192xf32>
    %326 = arith.addf %324, %325 : vector<2x192xf32>
    %327 = vector.extract_strided_slice %326 {offsets = [0, 0], sizes = [2, 64], strides = [1, 1]} : vector<2x192xf32> to vector<2x64xf32>
    %328 = vector.extract_strided_slice %326 {offsets = [0, 64], sizes = [2, 64], strides = [1, 1]} : vector<2x192xf32> to vector<2x64xf32>
    %329 = vector.extract_strided_slice %326 {offsets = [0, 128], sizes = [2, 64], strides = [1, 1]} : vector<2x192xf32> to vector<2x64xf32>
    %330 = vector.extract_strided_slice %318 {offsets = [0, 192], sizes = [2, 64], strides = [1, 1]} : vector<2x256xf32> to vector<2x64xf32>
    %331 = math.tanh %330 : vector<2x64xf32>
    %332 = arith.mulf %328, %313 : vector<2x64xf32>
    %333 = arith.mulf %327, %331 : vector<2x64xf32>
    %334 = arith.addf %332, %333 : vector<2x64xf32>
    %335 = math.tanh %334 : vector<2x64xf32>
    %336 = arith.mulf %329, %335 : vector<2x64xf32>
    %337 = vector.extract_strided_slice %336 {offsets = [0, 32], sizes = [2, 32], strides = [1, 1]} : vector<2x64xf32> to vector<2x32xf32>
    %cst_78 = arith.constant dense<0.000000e+00> : vector<2x256xf32>
    %338 = tpu.matmul %336, %309, %cst_78 {dimension_numbers = #tpu.dot_dimension_numbers<[1], [0], [0], [1], [0, 0, 1, 1], [], []>} : vector<2x64xf32>, vector<64x256xf32>, vector<2x256xf32> -> vector<2x256xf32>
    %339 = vector.extract_strided_slice %308 {offsets = [2, 0], sizes = [2, 256], strides = [1, 1]} : vector<20x256xf32> to vector<2x256xf32>
    %340 = vector.extract_strided_slice %308 {offsets = [16, 0], sizes = [2, 256], strides = [1, 1]} : vector<20x256xf32> to vector<2x256xf32>
    %341 = arith.select %4, %340, %339 : vector<2x256xi1>, vector<2x256xf32>
    %342 = arith.addf %341, %338 : vector<2x256xf32>
    %343 = vector.extract_strided_slice %342 {offsets = [0, 0], sizes = [2, 192], strides = [1, 1]} : vector<2x256xf32> to vector<2x192xf32>
    %cst_79 = arith.constant 5.000000e-01 : f32
    %344 = vector.broadcast %cst_79 : f32 to vector<2x192xf32>
    %345 = arith.mulf %344, %343 : vector<2x192xf32>
    %346 = math.tanh %345 : vector<2x192xf32>
    %cst_80 = arith.constant 5.000000e-01 : f32
    %347 = vector.broadcast %cst_80 : f32 to vector<2x192xf32>
    %348 = arith.mulf %347, %346 : vector<2x192xf32>
    %cst_81 = arith.constant 5.000000e-01 : f32
    %349 = vector.broadcast %cst_81 : f32 to vector<2x192xf32>
    %350 = arith.addf %348, %349 : vector<2x192xf32>
    %351 = vector.extract_strided_slice %350 {offsets = [0, 0], sizes = [2, 64], strides = [1, 1]} : vector<2x192xf32> to vector<2x64xf32>
    %352 = vector.extract_strided_slice %350 {offsets = [0, 64], sizes = [2, 64], strides = [1, 1]} : vector<2x192xf32> to vector<2x64xf32>
    %353 = vector.extract_strided_slice %350 {offsets = [0, 128], sizes = [2, 64], strides = [1, 1]} : vector<2x192xf32> to vector<2x64xf32>
    %354 = vector.extract_strided_slice %342 {offsets = [0, 192], sizes = [2, 64], strides = [1, 1]} : vector<2x256xf32> to vector<2x64xf32>
    %355 = math.tanh %354 : vector<2x64xf32>
    %356 = arith.mulf %352, %334 : vector<2x64xf32>
    %357 = arith.mulf %351, %355 : vector<2x64xf32>
    %358 = arith.addf %356, %357 : vector<2x64xf32>
    %359 = math.tanh %358 : vector<2x64xf32>
    %360 = arith.mulf %353, %359 : vector<2x64xf32>
    %cst_82 = arith.constant dense<0.000000e+00> : vector<2x256xf32>
    %361 = tpu.matmul %360, %309, %cst_82 {dimension_numbers = #tpu.dot_dimension_numbers<[1], [0], [0], [1], [0, 0, 1, 1], [], []>} : vector<2x64xf32>, vector<64x256xf32>, vector<2x256xf32> -> vector<2x256xf32>
    %362 = vector.extract_strided_slice %308 {offsets = [4, 0], sizes = [2, 256], strides = [1, 1]} : vector<20x256xf32> to vector<2x256xf32>
    %363 = vector.extract_strided_slice %308 {offsets = [14, 0], sizes = [2, 256], strides = [1, 1]} : vector<20x256xf32> to vector<2x256xf32>
    %364 = arith.select %4, %363, %362 : vector<2x256xi1>, vector<2x256xf32>
    %365 = arith.addf %364, %361 : vector<2x256xf32>
    %366 = vector.extract_strided_slice %365 {offsets = [0, 0], sizes = [2, 192], strides = [1, 1]} : vector<2x256xf32> to vector<2x192xf32>
    %cst_83 = arith.constant 5.000000e-01 : f32
    %367 = vector.broadcast %cst_83 : f32 to vector<2x192xf32>
    %368 = arith.mulf %367, %366 : vector<2x192xf32>
    %369 = math.tanh %368 : vector<2x192xf32>
    %cst_84 = arith.constant 5.000000e-01 : f32
    %370 = vector.broadcast %cst_84 : f32 to vector<2x192xf32>
    %371 = arith.mulf %370, %369 : vector<2x192xf32>
    %cst_85 = arith.constant 5.000000e-01 : f32
    %372 = vector.broadcast %cst_85 : f32 to vector<2x192xf32>
    %373 = arith.addf %371, %372 : vector<2x192xf32>
    %374 = vector.extract_strided_slice %373 {offsets = [0, 0], sizes = [2, 64], strides = [1, 1]} : vector<2x192xf32> to vector<2x64xf32>
    %375 = vector.extract_strided_slice %373 {offsets = [0, 64], sizes = [2, 64], strides = [1, 1]} : vector<2x192xf32> to vector<2x64xf32>
    %376 = vector.extract_strided_slice %373 {offsets = [0, 128], sizes = [2, 64], strides = [1, 1]} : vector<2x192xf32> to vector<2x64xf32>
    %377 = vector.extract_strided_slice %365 {offsets = [0, 192], sizes = [2, 64], strides = [1, 1]} : vector<2x256xf32> to vector<2x64xf32>
    %378 = math.tanh %377 : vector<2x64xf32>
    %379 = arith.mulf %375, %358 : vector<2x64xf32>
    %380 = arith.mulf %374, %378 : vector<2x64xf32>
    %381 = arith.addf %379, %380 : vector<2x64xf32>
    %382 = math.tanh %381 : vector<2x64xf32>
    %383 = arith.mulf %376, %382 : vector<2x64xf32>
    %cst_86 = arith.constant dense<0.000000e+00> : vector<2x256xf32>
    %384 = tpu.matmul %383, %309, %cst_86 {dimension_numbers = #tpu.dot_dimension_numbers<[1], [0], [0], [1], [0, 0, 1, 1], [], []>} : vector<2x64xf32>, vector<64x256xf32>, vector<2x256xf32> -> vector<2x256xf32>
    %385 = vector.extract_strided_slice %308 {offsets = [6, 0], sizes = [2, 256], strides = [1, 1]} : vector<20x256xf32> to vector<2x256xf32>
    %386 = vector.extract_strided_slice %308 {offsets = [12, 0], sizes = [2, 256], strides = [1, 1]} : vector<20x256xf32> to vector<2x256xf32>
    %387 = arith.select %4, %386, %385 : vector<2x256xi1>, vector<2x256xf32>
    %388 = arith.addf %387, %384 : vector<2x256xf32>
    %389 = vector.extract_strided_slice %388 {offsets = [0, 0], sizes = [2, 192], strides = [1, 1]} : vector<2x256xf32> to vector<2x192xf32>
    %cst_87 = arith.constant 5.000000e-01 : f32
    %390 = vector.broadcast %cst_87 : f32 to vector<2x192xf32>
    %391 = arith.mulf %390, %389 : vector<2x192xf32>
    %392 = math.tanh %391 : vector<2x192xf32>
    %cst_88 = arith.constant 5.000000e-01 : f32
    %393 = vector.broadcast %cst_88 : f32 to vector<2x192xf32>
    %394 = arith.mulf %393, %392 : vector<2x192xf32>
    %cst_89 = arith.constant 5.000000e-01 : f32
    %395 = vector.broadcast %cst_89 : f32 to vector<2x192xf32>
    %396 = arith.addf %394, %395 : vector<2x192xf32>
    %397 = vector.extract_strided_slice %396 {offsets = [0, 0], sizes = [2, 64], strides = [1, 1]} : vector<2x192xf32> to vector<2x64xf32>
    %398 = vector.extract_strided_slice %396 {offsets = [0, 64], sizes = [2, 64], strides = [1, 1]} : vector<2x192xf32> to vector<2x64xf32>
    %399 = vector.extract_strided_slice %396 {offsets = [0, 128], sizes = [2, 64], strides = [1, 1]} : vector<2x192xf32> to vector<2x64xf32>
    %400 = vector.extract_strided_slice %388 {offsets = [0, 192], sizes = [2, 64], strides = [1, 1]} : vector<2x256xf32> to vector<2x64xf32>
    %401 = math.tanh %400 : vector<2x64xf32>
    %402 = arith.mulf %398, %381 : vector<2x64xf32>
    %403 = arith.mulf %397, %401 : vector<2x64xf32>
    %404 = arith.addf %402, %403 : vector<2x64xf32>
    %405 = math.tanh %404 : vector<2x64xf32>
    %406 = arith.mulf %399, %405 : vector<2x64xf32>
    %cst_90 = arith.constant dense<0.000000e+00> : vector<2x256xf32>
    %407 = tpu.matmul %406, %309, %cst_90 {dimension_numbers = #tpu.dot_dimension_numbers<[1], [0], [0], [1], [0, 0, 1, 1], [], []>} : vector<2x64xf32>, vector<64x256xf32>, vector<2x256xf32> -> vector<2x256xf32>
    %408 = vector.extract_strided_slice %308 {offsets = [8, 0], sizes = [2, 256], strides = [1, 1]} : vector<20x256xf32> to vector<2x256xf32>
    %409 = vector.extract_strided_slice %308 {offsets = [10, 0], sizes = [2, 256], strides = [1, 1]} : vector<20x256xf32> to vector<2x256xf32>
    %410 = arith.select %4, %409, %408 : vector<2x256xi1>, vector<2x256xf32>
    %411 = arith.addf %410, %407 : vector<2x256xf32>
    %412 = vector.extract_strided_slice %411 {offsets = [0, 0], sizes = [2, 192], strides = [1, 1]} : vector<2x256xf32> to vector<2x192xf32>
    %cst_91 = arith.constant 5.000000e-01 : f32
    %413 = vector.broadcast %cst_91 : f32 to vector<2x192xf32>
    %414 = arith.mulf %413, %412 : vector<2x192xf32>
    %415 = math.tanh %414 : vector<2x192xf32>
    %cst_92 = arith.constant 5.000000e-01 : f32
    %416 = vector.broadcast %cst_92 : f32 to vector<2x192xf32>
    %417 = arith.mulf %416, %415 : vector<2x192xf32>
    %cst_93 = arith.constant 5.000000e-01 : f32
    %418 = vector.broadcast %cst_93 : f32 to vector<2x192xf32>
    %419 = arith.addf %417, %418 : vector<2x192xf32>
    %420 = vector.extract_strided_slice %419 {offsets = [0, 0], sizes = [2, 64], strides = [1, 1]} : vector<2x192xf32> to vector<2x64xf32>
    %421 = vector.extract_strided_slice %419 {offsets = [0, 64], sizes = [2, 64], strides = [1, 1]} : vector<2x192xf32> to vector<2x64xf32>
    %422 = vector.extract_strided_slice %419 {offsets = [0, 128], sizes = [2, 64], strides = [1, 1]} : vector<2x192xf32> to vector<2x64xf32>
    %423 = vector.extract_strided_slice %411 {offsets = [0, 192], sizes = [2, 64], strides = [1, 1]} : vector<2x256xf32> to vector<2x64xf32>
    %424 = math.tanh %423 : vector<2x64xf32>
    %425 = arith.mulf %421, %404 : vector<2x64xf32>
    %426 = arith.mulf %420, %424 : vector<2x64xf32>
    %427 = arith.addf %425, %426 : vector<2x64xf32>
    %428 = math.tanh %427 : vector<2x64xf32>
    %429 = arith.mulf %422, %428 : vector<2x64xf32>
    %cst_94 = arith.constant dense<0.000000e+00> : vector<2x256xf32>
    %430 = tpu.matmul %429, %309, %cst_94 {dimension_numbers = #tpu.dot_dimension_numbers<[1], [0], [0], [1], [0, 0, 1, 1], [], []>} : vector<2x64xf32>, vector<64x256xf32>, vector<2x256xf32> -> vector<2x256xf32>
    %431 = vector.extract_strided_slice %308 {offsets = [10, 0], sizes = [2, 256], strides = [1, 1]} : vector<20x256xf32> to vector<2x256xf32>
    %432 = vector.extract_strided_slice %308 {offsets = [8, 0], sizes = [2, 256], strides = [1, 1]} : vector<20x256xf32> to vector<2x256xf32>
    %433 = arith.select %4, %432, %431 : vector<2x256xi1>, vector<2x256xf32>
    %434 = arith.addf %433, %430 : vector<2x256xf32>
    %435 = vector.extract_strided_slice %434 {offsets = [0, 0], sizes = [2, 192], strides = [1, 1]} : vector<2x256xf32> to vector<2x192xf32>
    %cst_95 = arith.constant 5.000000e-01 : f32
    %436 = vector.broadcast %cst_95 : f32 to vector<2x192xf32>
    %437 = arith.mulf %436, %435 : vector<2x192xf32>
    %438 = math.tanh %437 : vector<2x192xf32>
    %cst_96 = arith.constant 5.000000e-01 : f32
    %439 = vector.broadcast %cst_96 : f32 to vector<2x192xf32>
    %440 = arith.mulf %439, %438 : vector<2x192xf32>
    %cst_97 = arith.constant 5.000000e-01 : f32
    %441 = vector.broadcast %cst_97 : f32 to vector<2x192xf32>
    %442 = arith.addf %440, %441 : vector<2x192xf32>
    %443 = vector.extract_strided_slice %442 {offsets = [0, 0], sizes = [2, 64], strides = [1, 1]} : vector<2x192xf32> to vector<2x64xf32>
    %444 = vector.extract_strided_slice %442 {offsets = [0, 64], sizes = [2, 64], strides = [1, 1]} : vector<2x192xf32> to vector<2x64xf32>
    %445 = vector.extract_strided_slice %442 {offsets = [0, 128], sizes = [2, 64], strides = [1, 1]} : vector<2x192xf32> to vector<2x64xf32>
    %446 = vector.extract_strided_slice %434 {offsets = [0, 192], sizes = [2, 64], strides = [1, 1]} : vector<2x256xf32> to vector<2x64xf32>
    %447 = math.tanh %446 : vector<2x64xf32>
    %448 = arith.mulf %444, %427 : vector<2x64xf32>
    %449 = arith.mulf %443, %447 : vector<2x64xf32>
    %450 = arith.addf %448, %449 : vector<2x64xf32>
    %451 = math.tanh %450 : vector<2x64xf32>
    %452 = arith.mulf %445, %451 : vector<2x64xf32>
    %cst_98 = arith.constant dense<0.000000e+00> : vector<2x256xf32>
    %453 = tpu.matmul %452, %309, %cst_98 {dimension_numbers = #tpu.dot_dimension_numbers<[1], [0], [0], [1], [0, 0, 1, 1], [], []>} : vector<2x64xf32>, vector<64x256xf32>, vector<2x256xf32> -> vector<2x256xf32>
    %454 = vector.extract_strided_slice %308 {offsets = [12, 0], sizes = [2, 256], strides = [1, 1]} : vector<20x256xf32> to vector<2x256xf32>
    %455 = vector.extract_strided_slice %308 {offsets = [6, 0], sizes = [2, 256], strides = [1, 1]} : vector<20x256xf32> to vector<2x256xf32>
    %456 = arith.select %4, %455, %454 : vector<2x256xi1>, vector<2x256xf32>
    %457 = arith.addf %456, %453 : vector<2x256xf32>
    %458 = vector.extract_strided_slice %457 {offsets = [0, 0], sizes = [2, 192], strides = [1, 1]} : vector<2x256xf32> to vector<2x192xf32>
    %cst_99 = arith.constant 5.000000e-01 : f32
    %459 = vector.broadcast %cst_99 : f32 to vector<2x192xf32>
    %460 = arith.mulf %459, %458 : vector<2x192xf32>
    %461 = math.tanh %460 : vector<2x192xf32>
    %cst_100 = arith.constant 5.000000e-01 : f32
    %462 = vector.broadcast %cst_100 : f32 to vector<2x192xf32>
    %463 = arith.mulf %462, %461 : vector<2x192xf32>
    %cst_101 = arith.constant 5.000000e-01 : f32
    %464 = vector.broadcast %cst_101 : f32 to vector<2x192xf32>
    %465 = arith.addf %463, %464 : vector<2x192xf32>
    %466 = vector.extract_strided_slice %465 {offsets = [0, 0], sizes = [2, 64], strides = [1, 1]} : vector<2x192xf32> to vector<2x64xf32>
    %467 = vector.extract_strided_slice %465 {offsets = [0, 64], sizes = [2, 64], strides = [1, 1]} : vector<2x192xf32> to vector<2x64xf32>
    %468 = vector.extract_strided_slice %465 {offsets = [0, 128], sizes = [2, 64], strides = [1, 1]} : vector<2x192xf32> to vector<2x64xf32>
    %469 = vector.extract_strided_slice %457 {offsets = [0, 192], sizes = [2, 64], strides = [1, 1]} : vector<2x256xf32> to vector<2x64xf32>
    %470 = math.tanh %469 : vector<2x64xf32>
    %471 = arith.mulf %467, %450 : vector<2x64xf32>
    %472 = arith.mulf %466, %470 : vector<2x64xf32>
    %473 = arith.addf %471, %472 : vector<2x64xf32>
    %474 = math.tanh %473 : vector<2x64xf32>
    %475 = arith.mulf %468, %474 : vector<2x64xf32>
    %cst_102 = arith.constant dense<0.000000e+00> : vector<2x256xf32>
    %476 = tpu.matmul %475, %309, %cst_102 {dimension_numbers = #tpu.dot_dimension_numbers<[1], [0], [0], [1], [0, 0, 1, 1], [], []>} : vector<2x64xf32>, vector<64x256xf32>, vector<2x256xf32> -> vector<2x256xf32>
    %477 = vector.extract_strided_slice %308 {offsets = [14, 0], sizes = [2, 256], strides = [1, 1]} : vector<20x256xf32> to vector<2x256xf32>
    %478 = vector.extract_strided_slice %308 {offsets = [4, 0], sizes = [2, 256], strides = [1, 1]} : vector<20x256xf32> to vector<2x256xf32>
    %479 = arith.select %4, %478, %477 : vector<2x256xi1>, vector<2x256xf32>
    %480 = arith.addf %479, %476 : vector<2x256xf32>
    %481 = vector.extract_strided_slice %480 {offsets = [0, 0], sizes = [2, 192], strides = [1, 1]} : vector<2x256xf32> to vector<2x192xf32>
    %cst_103 = arith.constant 5.000000e-01 : f32
    %482 = vector.broadcast %cst_103 : f32 to vector<2x192xf32>
    %483 = arith.mulf %482, %481 : vector<2x192xf32>
    %484 = math.tanh %483 : vector<2x192xf32>
    %cst_104 = arith.constant 5.000000e-01 : f32
    %485 = vector.broadcast %cst_104 : f32 to vector<2x192xf32>
    %486 = arith.mulf %485, %484 : vector<2x192xf32>
    %cst_105 = arith.constant 5.000000e-01 : f32
    %487 = vector.broadcast %cst_105 : f32 to vector<2x192xf32>
    %488 = arith.addf %486, %487 : vector<2x192xf32>
    %489 = vector.extract_strided_slice %488 {offsets = [0, 0], sizes = [2, 64], strides = [1, 1]} : vector<2x192xf32> to vector<2x64xf32>
    %490 = vector.extract_strided_slice %488 {offsets = [0, 64], sizes = [2, 64], strides = [1, 1]} : vector<2x192xf32> to vector<2x64xf32>
    %491 = vector.extract_strided_slice %488 {offsets = [0, 128], sizes = [2, 64], strides = [1, 1]} : vector<2x192xf32> to vector<2x64xf32>
    %492 = vector.extract_strided_slice %480 {offsets = [0, 192], sizes = [2, 64], strides = [1, 1]} : vector<2x256xf32> to vector<2x64xf32>
    %493 = math.tanh %492 : vector<2x64xf32>
    %494 = arith.mulf %490, %473 : vector<2x64xf32>
    %495 = arith.mulf %489, %493 : vector<2x64xf32>
    %496 = arith.addf %494, %495 : vector<2x64xf32>
    %497 = math.tanh %496 : vector<2x64xf32>
    %498 = arith.mulf %491, %497 : vector<2x64xf32>
    %cst_106 = arith.constant dense<0.000000e+00> : vector<2x256xf32>
    %499 = tpu.matmul %498, %309, %cst_106 {dimension_numbers = #tpu.dot_dimension_numbers<[1], [0], [0], [1], [0, 0, 1, 1], [], []>} : vector<2x64xf32>, vector<64x256xf32>, vector<2x256xf32> -> vector<2x256xf32>
    %500 = vector.extract_strided_slice %308 {offsets = [16, 0], sizes = [2, 256], strides = [1, 1]} : vector<20x256xf32> to vector<2x256xf32>
    %501 = vector.extract_strided_slice %308 {offsets = [2, 0], sizes = [2, 256], strides = [1, 1]} : vector<20x256xf32> to vector<2x256xf32>
    %502 = arith.select %4, %501, %500 : vector<2x256xi1>, vector<2x256xf32>
    %503 = arith.addf %502, %499 : vector<2x256xf32>
    %504 = vector.extract_strided_slice %503 {offsets = [0, 0], sizes = [2, 192], strides = [1, 1]} : vector<2x256xf32> to vector<2x192xf32>
    %cst_107 = arith.constant 5.000000e-01 : f32
    %505 = vector.broadcast %cst_107 : f32 to vector<2x192xf32>
    %506 = arith.mulf %505, %504 : vector<2x192xf32>
    %507 = math.tanh %506 : vector<2x192xf32>
    %cst_108 = arith.constant 5.000000e-01 : f32
    %508 = vector.broadcast %cst_108 : f32 to vector<2x192xf32>
    %509 = arith.mulf %508, %507 : vector<2x192xf32>
    %cst_109 = arith.constant 5.000000e-01 : f32
    %510 = vector.broadcast %cst_109 : f32 to vector<2x192xf32>
    %511 = arith.addf %509, %510 : vector<2x192xf32>
    %512 = vector.extract_strided_slice %511 {offsets = [0, 0], sizes = [2, 64], strides = [1, 1]} : vector<2x192xf32> to vector<2x64xf32>
    %513 = vector.extract_strided_slice %511 {offsets = [0, 64], sizes = [2, 64], strides = [1, 1]} : vector<2x192xf32> to vector<2x64xf32>
    %514 = vector.extract_strided_slice %511 {offsets = [0, 128], sizes = [2, 64], strides = [1, 1]} : vector<2x192xf32> to vector<2x64xf32>
    %515 = vector.extract_strided_slice %503 {offsets = [0, 192], sizes = [2, 64], strides = [1, 1]} : vector<2x256xf32> to vector<2x64xf32>
    %516 = math.tanh %515 : vector<2x64xf32>
    %517 = arith.mulf %513, %496 : vector<2x64xf32>
    %518 = arith.mulf %512, %516 : vector<2x64xf32>
    %519 = arith.addf %517, %518 : vector<2x64xf32>
    %520 = math.tanh %519 : vector<2x64xf32>
    %521 = arith.mulf %514, %520 : vector<2x64xf32>
    %cst_110 = arith.constant dense<0.000000e+00> : vector<2x256xf32>
    %522 = tpu.matmul %521, %309, %cst_110 {dimension_numbers = #tpu.dot_dimension_numbers<[1], [0], [0], [1], [0, 0, 1, 1], [], []>} : vector<2x64xf32>, vector<64x256xf32>, vector<2x256xf32> -> vector<2x256xf32>
    %523 = vector.extract_strided_slice %308 {offsets = [18, 0], sizes = [2, 256], strides = [1, 1]} : vector<20x256xf32> to vector<2x256xf32>
    %524 = vector.extract_strided_slice %308 {offsets = [0, 0], sizes = [2, 256], strides = [1, 1]} : vector<20x256xf32> to vector<2x256xf32>
    %525 = arith.select %4, %524, %523 : vector<2x256xi1>, vector<2x256xf32>
    %526 = arith.addf %525, %522 : vector<2x256xf32>
    %527 = vector.extract_strided_slice %526 {offsets = [0, 0], sizes = [2, 192], strides = [1, 1]} : vector<2x256xf32> to vector<2x192xf32>
    %cst_111 = arith.constant 5.000000e-01 : f32
    %528 = vector.broadcast %cst_111 : f32 to vector<2x192xf32>
    %529 = arith.mulf %528, %527 : vector<2x192xf32>
    %530 = math.tanh %529 : vector<2x192xf32>
    %cst_112 = arith.constant 5.000000e-01 : f32
    %531 = vector.broadcast %cst_112 : f32 to vector<2x192xf32>
    %532 = arith.mulf %531, %530 : vector<2x192xf32>
    %cst_113 = arith.constant 5.000000e-01 : f32
    %533 = vector.broadcast %cst_113 : f32 to vector<2x192xf32>
    %534 = arith.addf %532, %533 : vector<2x192xf32>
    %535 = vector.extract_strided_slice %534 {offsets = [0, 0], sizes = [2, 64], strides = [1, 1]} : vector<2x192xf32> to vector<2x64xf32>
    %536 = vector.extract_strided_slice %534 {offsets = [0, 64], sizes = [2, 64], strides = [1, 1]} : vector<2x192xf32> to vector<2x64xf32>
    %537 = vector.extract_strided_slice %534 {offsets = [0, 128], sizes = [2, 64], strides = [1, 1]} : vector<2x192xf32> to vector<2x64xf32>
    %538 = vector.extract_strided_slice %526 {offsets = [0, 192], sizes = [2, 64], strides = [1, 1]} : vector<2x256xf32> to vector<2x64xf32>
    %539 = math.tanh %538 : vector<2x64xf32>
    %540 = arith.mulf %536, %519 : vector<2x64xf32>
    %541 = arith.mulf %535, %539 : vector<2x64xf32>
    %542 = arith.addf %540, %541 : vector<2x64xf32>
    %543 = math.tanh %542 : vector<2x64xf32>
    %544 = arith.mulf %537, %543 : vector<2x64xf32>
    %545 = vector.extract_strided_slice %544 {offsets = [0, 0], sizes = [2, 32], strides = [1, 1]} : vector<2x64xf32> to vector<2x32xf32>
    %546 = tpu.concatenate %545, %337 in 1 : vector<2x32xf32>, vector<2x32xf32> -> vector<2x64xf32>
    %c0_114 = arith.constant 0 : index
    %c0_115 = arith.constant 0 : index
    %547 = vector.load %arg9[%c0_114, %c0_115] : memref<64x8xf32, #tpu.memory_space<vmem>>, vector<64x8xf32>
    %cst_116 = arith.constant dense<0.000000e+00> : vector<2x8xf32>
    %548 = tpu.matmul %546, %547, %cst_116 {dimension_numbers = #tpu.dot_dimension_numbers<[1], [0], [0], [1], [0, 0, 1, 1], [], []>} : vector<2x64xf32>, vector<64x8xf32>, vector<2x8xf32> -> vector<2x8xf32>
    %c0_117 = arith.constant 0 : index
    %c0_118 = arith.constant 0 : index
    %549 = vector.load %arg10[%c0_117, %c0_118] : memref<1x8xf32, #tpu.memory_space<vmem>>, vector<1x8xf32>
    %550 = vector.broadcast %549 : vector<1x8xf32> to vector<2x8xf32>
    %551 = arith.addf %548, %550 : vector<2x8xf32>
    %c0_119 = arith.constant 0 : index
    %c0_120 = arith.constant 0 : index
    %552 = vector.load %arg14[%c0_119, %c0_120] : memref<2x8xf32, #tpu.memory_space<vmem>>, vector<2x8xf32>
    tpu.vector_store %arg14[%c0_119, %c0_120], %551 {strides = array<i32>} : memref<2x8xf32, #tpu.memory_space<vmem>>, vector<2x8xf32>,
    return
  }
}

</mosaic_0001>

<bundles_post_ra>
// kernel: cnn_lstm_forward.1
= control target key start
LH: loop header
LB: loop body
LE: loop exit
PB: predicated region body
PF: predicated region fallthrough
CT: control target
= control target key end

     0   :  { %vm65_vm0 = vcmask 130048   ;;  %s3555_s0 = inlined_call_operand.vmem [shape: f32[26,16], index: 0, kind: input, shape index: {}]   ;;  %s3556_s1 = inlined_call_operand.vmem [shape: f32[16,8], index: 1, kind: input, shape index: {}]   ;;  %s3557_s2 = inlined_call_operand.vmem [shape: f32[1,8], index: 2, kind: input, shape index: {}]   ;;  %s3558_s3 = inlined_call_operand.vmem [shape: f32[8,256], index: 3, kind: input, shape index: {}]   ;;  %s3559_s4 = inlined_call_operand.vmem [shape: f32[64,256], index: 4, kind: input, shape index: {}]   ;;  %s3560_s5 = inlined_call_operand.vmem [shape: f32[1,256], index: 5, kind: input, shape index: {}]   ;;  %s3561_s6 = inlined_call_operand.vmem [shape: f32[64,256], index: 6, kind: input, shape index: {}]   ;;  %s3562_s7 = inlined_call_operand.vmem [shape: f32[64,256], index: 7, kind: input, shape index: {}]   ;;  %s3563_s8 = inlined_call_operand.vmem [shape: f32[1,256], index: 8, kind: input, shape index: {}]   ;;  %s3564_s9 = inlined_call_operand.vmem [shape: f32[64,8], index: 9, kind: input, shape index: {}]   ;;  %s3565_s10 = inlined_call_operand.vmem [shape: f32[1,8], index: 10, kind: input, shape index: {}]   ;;  %s3566_s11 = inlined_call_operand.vmem [shape: f32[1,256], index: 11, kind: input, shape index: {}]   ;;  %s3567_s12 = inlined_call_operand.vmem [shape: f32[2,2,64], index: 12, kind: input, shape index: {}]   ;;  %s3568_s13 = inlined_call_operand.vmem [shape: f32[2,2,64], index: 13, kind: input, shape index: {}]   ;;  %s3569_s14 = inlined_call_operand.hbm [shape: f32[2,8], index: 14, kind: output, shape index: {}]  }
   0x1   :  { %v60_v0 = vld [vmem:[%s3556_s1 + $0x8] sm:$0xff]  ;;  %v59_v1 = vld [vmem:[%s3556_s1] sm:$0xff] }
   0x2   :  { %92 = vmatpush.msra.mxu0 %v60_v0  ;;  %v55_v2 = vld [vmem:[%s3555_s0] sm:$0xff] }
   0x4   :  { %93 = vmatpush.msra.mxu0 %v59_v1 }
   0x5   :  { %19 = vsyncpa [#allocation3], 0  ;;  %2171 = vmatmul.msk.f32.vlgmr.msra.gmra.mxu0 %vm65_vm0, %v55_v2  ;;  %v56_v3 = vld [vmem:[%s3555_s0 + $0x8] sm:$0xff]  ;;  %v57_v4 = vld [vmem:[%s3555_s0 + $0x10] sm:$0xff]  ;;  %vm241_vm1 = vcmask 523264   ;;  %vm114_vm2 = vcmask 1045504  }
   0x6   :  { %v58_v5 = vld [vmem:[%s3555_s0 + $0x18] sm:$0x3]  ;;  %v2520_v6 = vld [vmem:[%s3559_s4 + $0x70] sm:$0xff]  ;;  %v2527_v7 = vld [vmem:[%s3559_s4 + $0x60] sm:$0xff]  ;;  %vm126_vm3 = vcmask 1043456   ;;  %vm139_vm4 = vcmask 1041408  }
   0x7   :  { %253 = vmatpush.msra.mxu3 %v2520_v6  ;;  %424 = vmatpush.msrb.mxu0 %v2520_v6  ;;  %v153_v8 = vld [vmem:[%s3558_s3] sm:$0xff]  ;;  %v154_v9 = vld [vmem:[%s3558_s3 + $0x8] sm:$0xff]  ;;  %v2540_v10 = vld [vmem:[%s3559_s4 + $0x50] sm:$0xff]  ;;  %vm161_vm5 = vcmask 64512   ;;  %vm1112_vm9 = vcmask 261120   ;;  %s2423_s24 = smov [#allocation2]  }
   0x8   :  { %186 = vmatpush.msra.mxu1 %v153_v8  ;;  %212 = vmatpush.msra.mxu2 %v154_v9  ;;  %v2546_v11 = vld [vmem:[%s3559_s4 + $0x78] sm:$0xff]  ;;  %v2553_v12 = vld [vmem:[%s3559_s4 + $0x40] sm:$0xff]  ;;  %v2561_v13 = vld [vmem:[%s3559_s4 + $0x30] sm:$0xff]  ;;  %s2162_s26 = sshll.u32 %s3569_s14, 4  ;;  %vm2153_vm10 = vcmask 58368   ;;  %s2163_s26 = int_to_ptr.hbm [resolvable:$true] %s2162_s26 }
   0x9   :  { %254 = vmatpush.msra.mxu3 %v2527_v7  ;;  %425 = vmatpush.msrb.mxu0 %v2527_v7  ;;  %v2569_v14 = vld [vmem:[%s3559_s4 + $0x20] sm:$0xff]  ;;  %v2577_v15 = vld [vmem:[%s3559_s4 + $0x68] sm:$0xff]  ;;  %v2582_v16 = vld [vmem:[%s3559_s4 + $0x58] sm:$0xff] }
   0xa   :  { %344 = vmatpush.msrb.mxu2 %v2520_v6  ;;  %273 = vmatpush.msrb.mxu1 %v2546_v11  ;;  %v2587_v17 = vld [vmem:[%s3559_s4 + $0x10] sm:$0xff]  ;;  %v2595_v18 = vld [vmem:[%s3559_s4] sm:$0xff]  ;;  %v2605_v20 = vld [vmem:[%s3559_s4 + $0x48] sm:$0xff] }
   0xb   :  { %255 = vmatpush.msra.mxu3 %v2540_v10  ;;  %426 = vmatpush.msrb.mxu0 %v2540_v10  ;;  %v2600_v19 = vld [vmem:[%s3567_s12] sm:$0x3]  ;;  %v2621_v23 = vld [vmem:[%s3559_s4 + $0x38] sm:$0xff]  ;;  %v2629_v24 = vld [vmem:[%s3559_s4 + $0x28] sm:$0xff] }
   0xc   :  { %345 = vmatpush.msrb.mxu2 %v2527_v7  ;;  %274 = vmatpush.msrb.mxu1 %v2577_v15  ;;  %v2614_v22 = vld [vmem:[%s3557_s2] ss:$0 sm:$0xff]  ;;  %v2642_v26 = vld [vmem:[%s3559_s4 + $0x18] sm:$0xff]  ;;  %v2648_v27 = vld [vmem:[%s3559_s4 + $0x8] sm:$0xff]  ;;  %s2160_s4 = sshll.u32 %s2423_s24, 4  ;;  %s2161_s4 = int_to_ptr.vmem [resolvable:$true] %s2160_s4 }
   0xd   :  { %2172 = vmatmul.msk.f32.gmra.mxu0 %vm65_vm0, %v56_v3  ;;  %256 = vmatpush.msra.mxu3 %v2553_v12  ;;  %v48_v0 = vld [vmem:[%s3566_s11] sm:$0x3] }
   0xe   :  { %427 = vmatpush.msrb.mxu0 %v2553_v12  ;;  %346 = vmatpush.msrb.mxu2 %v2540_v10  ;;  %v155_v1 = vld [vmem:[%s3560_s5] sm:$0x3]  ;;  %vm49_vm6 = vcmp.ne.f32.partialorder %v48_v0, 0.0  ;;  %s2422_s5 = smov 64  }
   0xf   :  { %257 = vmatpush.msra.mxu3 %v2561_v13  ;;  %275 = vmatpush.msrb.mxu1 %v2582_v16  ;;  %v157_v3 = vperm.slane %v155_v1, 0 }
  0x10   :  { %428 = vmatpush.msrb.mxu0 %v2561_v13  ;;  %347 = vmatpush.msrb.mxu2 %v2553_v12 }
  0x11   :  { %258 = vmatpush.msra.mxu3 %v2569_v14  ;;  %276 = vmatpush.msrb.mxu1 %v2605_v20 }
  0x12   :  { %429 = vmatpush.msrb.mxu0 %v2569_v14  ;;  %348 = vmatpush.msrb.mxu2 %v2561_v13 }
  0x13   :  { %259 = vmatpush.msra.mxu3 %v2587_v17  ;;  %277 = vmatpush.msrb.mxu1 %v2621_v23 }
  0x14   :  { %430 = vmatpush.msrb.mxu0 %v2587_v17  ;;  %349 = vmatpush.msrb.mxu2 %v2569_v14 }
  0x15   :  { %2173 = vmatmul.msk.f32.gmra.mxu0 %vm65_vm0, %v57_v4  ;;  %260 = vmatpush.msra.mxu3 %v2595_v18  ;;  %v2421_v4 = vmov 0  }
  0x16   :  { %2181 = vmatmul.msk.f32.vlgmr.msra.gmra.mxu3 %vm241_vm1, %v2600_v19  ;;  %350 = vmatpush.msrb.mxu2 %v2587_v17 }
  0x17   :  { %364 = vmatpush.msrb.mxu3 %v2546_v11  ;;  %431 = vmatpush.msrb.mxu0 %v2595_v18 }
  0x18   :  { %351 = vmatpush.msrb.mxu2 %v2595_v18  ;;  %278 = vmatpush.msrb.mxu1 %v2629_v24 }
  0x19   :  { %365 = vmatpush.msrb.mxu3 %v2577_v15  ;;  %590 = vmatpush.msra.mxu0 %v2520_v6 }
  0x1a   :  { %279 = vmatpush.msrb.mxu1 %v2642_v26 }
  0x1b   :  { %366 = vmatpush.msrb.mxu3 %v2582_v16  ;;  %591 = vmatpush.msra.mxu0 %v2527_v7 }
  0x1c   :  { %280 = vmatpush.msrb.mxu1 %v2648_v27 }
  0x1d   :  { %2174 = vmatmul.msk.f32.gmra.mxu0 %vm65_vm0, %v58_v5  ;;  %367 = vmatpush.msrb.mxu3 %v2605_v20  ;;  %v50_v5 = vsel %vm49_vm6, 1, %v2421_v4 }
  0x1e   :  { %592 = vmatpush.msra.mxu0 %v2540_v10  ;;  %v51_v8 = vperm.slane %v50_v5, 0 }
  0x1f   :  { %368 = vmatpush.msrb.mxu3 %v2621_v23 }
  0x20   :  { %593 = vmatpush.msra.mxu0 %v2553_v12  ;;  %vm2720_vm7 = vcmp.eq.s32.totalorder %v51_v8, 1  ;;  %v240_v8 = vld [vmem:[%s3568_s13] sm:$0x3] }
  0x21   :  { %369 = vmatpush.msrb.mxu3 %v2629_v24 }
  0x22   :  { %594 = vmatpush.msra.mxu0 %v2561_v13 }
  0x23   :  { %370 = vmatpush.msrb.mxu3 %v2642_v26 }
  0x24   :  { %595 = vmatpush.msra.mxu0 %v2569_v14 }
  0x25   :  { %371 = vmatpush.msrb.mxu3 %v2648_v27 }
  0x26   :  { %596 = vmatpush.msra.mxu0 %v2587_v17 }
  0x27   :  { %527 = vmatpush.msra.mxu3 %v2546_v11 }
  0x28   :  { %597 = vmatpush.msra.mxu0 %v2595_v18 }
  0x29   :  { %528 = vmatpush.msra.mxu3 %v2577_v15 }
  0x2b   :  { %529 = vmatpush.msra.mxu3 %v2582_v16 }
  0x2d   :  { %530 = vmatpush.msra.mxu3 %v2605_v20 }
  0x2f   :  { %531 = vmatpush.msra.mxu3 %v2621_v23 }
  0x31   :  { %532 = vmatpush.msra.mxu3 %v2629_v24 }
  0x33   :  { %533 = vmatpush.msra.mxu3 %v2642_v26 }
  0x35   :  { %534 = vmatpush.msra.mxu3 %v2648_v27 }
  0x82   :  { %v95_v21 = vpop.f32.mrf.mxu0 }
  0x83   :  { %v96_v25 = vadd.f32 %v2614_v22, %v95_v21 }
  0x85   :  { %v107_v29 = vmax.f32 %v96_v25, 0.0 }
  0x87   :  { %v115_v32 = vrot.slane %v107_v29, 2  ;;  %v127_v35 = vrot.slane %v107_v29, 4  ;;  %v140_v40 = vrot.slane %v107_v29, 6 }
  0x8a   :  { %v98_v28 = vpop.f32.mrf.mxu0 }
  0x8b   :  { %v99_v30 = vadd.f32 %v2614_v22, %v98_v28 }
  0x8d   :  { %v108_v31 = vmax.f32 %v99_v30, 0.0 }
  0x8f   :  { %v116_v33 = vrot.slane %v108_v31, 2  ;;  %v128_v34 = vrot.slane %v108_v31, 4  ;;  %v141_v36 = vrot.slane %v108_v31, 6 }
  0x91   :  { %v117_v37 = vsel %vm114_vm2, %v115_v32, %v116_v33  ;;  %v129_v42 = vsel %vm126_vm3, %v127_v35, %v128_v34  ;;  %v142_v45 = vsel %vm139_vm4, %v140_v40, %v141_v36  ;;  %v52_v32 = vperm.slane %v50_v5, 1 }
  0x92   :  { %v101_v38 = vpop.f32.mrf.mxu0  ;;  %v123_v39 = vmax.f32 %v107_v29, %v117_v37 }
  0x93   :  { %v102_v41 = vadd.f32 %v2614_v22, %v101_v38  ;;  %vm2750_vm8 = vcmp.eq.s32.totalorder %v52_v32, 1 }
  0x94   :  { %v135_v43 = vmax.f32 %v123_v39, %v129_v42 }
  0x95   :  { %v109_v44 = vmax.f32 %v102_v41, 0.0 }
  0x96   :  { %v150_v46 = vmax.f32 %v135_v43, %v142_v45 }
  0x97   :  { %v118_v47 = vrot.slane %v109_v44, 2  ;;  %v130_v48 = vrot.slane %v109_v44, 4  ;;  %v143_v49 = vrot.slane %v109_v44, 6 }
  0x98   :  { %2175 = vmatmul.msk.f32.vlgmr.msra.gmra.mxu1 %vm161_vm5, %v150_v46  ;;  %2178 = vmatmul.msk.f32.vlgmr.msra.gmra.mxu2 %vm161_vm5, %v150_v46 }
  0x99   :  { %v119_v50 = vsel %vm114_vm2, %v116_v33, %v118_v47  ;;  %444 = vmatpush.msra.mxu1 %v2546_v11  ;;  %507 = vmatpush.msra.mxu2 %v2520_v6  ;;  %v131_v54 = vsel %vm126_vm3, %v128_v34, %v130_v48  ;;  %v144_v57 = vsel %vm139_vm4, %v141_v36, %v143_v49 }
  0x9a   :  { %v104_v51 = vpop.f32.mrf.mxu0  ;;  %v124_v52 = vmax.f32 %v108_v31, %v119_v50  ;;  %v125_v60 = vmax.f32 %v109_v44, %v118_v47 }
  0x9b   :  { %v105_v53 = vadd.f32 %v2614_v22, %v104_v51  ;;  %445 = vmatpush.msra.mxu1 %v2577_v15  ;;  %508 = vmatpush.msra.mxu2 %v2527_v7 }
  0x9c   :  { %v136_v55 = vmax.f32 %v124_v52, %v131_v54  ;;  %v137_v62 = vmax.f32 %v125_v60, %v130_v48 }
  0x9d   :  { %v110_v56 = vmax.f32 %v105_v53, 0.0  ;;  %446 = vmatpush.msra.mxu1 %v2582_v16  ;;  %509 = vmatpush.msra.mxu2 %v2540_v10 }
  0x9e   :  { %v151_v58 = vmax.f32 %v136_v55, %v144_v57 }
  0x9f   :  { %v145_v59 = vrot.slane %v110_v56, 6  ;;  %447 = vmatpush.msra.mxu1 %v2605_v20  ;;  %510 = vmatpush.msra.mxu2 %v2553_v12 }
  0xa0   :  { %2176 = vmatmul.msk.f32.gmra.mxu1 %vm161_vm5, %v151_v58  ;;  %2179 = vmatmul.msk.f32.gmra.mxu2 %vm161_vm5, %v151_v58 }
  0xa1   :  { %448 = vmatpush.msra.mxu1 %v2621_v23  ;;  %v146_v61 = vsel %vm139_vm4, %v143_v49, %v145_v59  ;;  %511 = vmatpush.msra.mxu2 %v2561_v13 }
  0xa2   :  { %v152_v63 = vmax.f32 %v137_v62, %v146_v61 }
  0xa3   :  { %449 = vmatpush.msra.mxu1 %v2629_v24  ;;  %512 = vmatpush.msra.mxu2 %v2569_v14 }
  0xa5   :  { %450 = vmatpush.msra.mxu1 %v2642_v26  ;;  %513 = vmatpush.msra.mxu2 %v2587_v17 }
  0xa7   :  { %451 = vmatpush.msra.mxu1 %v2648_v27  ;;  %514 = vmatpush.msra.mxu2 %v2595_v18 }
  0xa8   :  { %2177 = vmatmul.msk.f32.gmra.mxu1 %vm161_vm5, %v152_v63  ;;  %2180 = vmatmul.msk.f32.gmra.mxu2 %vm161_vm5, %v152_v63 }
  0xb0   :  { %2182 = vmatmul.msk.f32.vlgmr.msrb.gmra.mxu1 %vm241_vm1, %v2600_v19  ;;  %v158_v19 = vperm.slane %v155_v1, 1 }
  0xb1   :  { %610 = vmatpush.msrb.mxu1 %v2546_v11 }
  0xb3   :  { %611 = vmatpush.msrb.mxu1 %v2577_v15 }
  0xb5   :  { %612 = vmatpush.msrb.mxu1 %v2582_v16 }
  0xb7   :  { %613 = vmatpush.msrb.mxu1 %v2605_v20 }
  0xb9   :  { %614 = vmatpush.msrb.mxu1 %v2621_v23 }
  0xbb   :  { %615 = vmatpush.msrb.mxu1 %v2629_v24 }
  0xbd   :  { %616 = vmatpush.msrb.mxu1 %v2642_v26 }
  0xbf   :  { %617 = vmatpush.msrb.mxu1 %v2648_v27 }
 0x115   :  { %v188_v2 = vpop.f32.mrf.mxu1 }
 0x116   :  { %v189_v9 = vadd.f32 %v188_v2, %v157_v3 }
 0x118   :  { %v287_v29 = vrot.slane %v189_v9, 6  ;;  %v376_v30 = vrot.slane %v189_v9, 2 }
 0x11b   :  { %v214_v21 = vpop.f32.mrf.mxu2 }
 0x11c   :  { %v215_v31 = vadd.f32 %v214_v21, %v158_v19 }
 0x11d   :  { %v191_v22 = vpop.f32.mrf.mxu1 }
 0x11e   :  { %v2724_v28 = vadd.f32 %v191_v22, %v157_v3  ;;  %v288_v42 = vrot.slane %v215_v31, 6  ;;  %v377_v43 = vrot.slane %v215_v31, 2 }
 0x120   :  { %v2729_v33 = vsel %vm2720_vm7, %v2724_v28, %v287_v29  ;;  %v2734_v34 = vsel %vm2720_vm7, %v2724_v28, %v376_v30  ;;  %v624_v35 = vrot.slane %v2724_v28, 6  ;;  %v711_v36 = vrot.slane %v2724_v28, 2 }
 0x122   :  { %v2742_v37 = vsel %vm2720_vm7, %v189_v9, %v624_v35  ;;  %v2748_v38 = vsel %vm2720_vm7, %v189_v9, %v711_v36 }
 0x123   :  { %v217_v39 = vpop.f32.mrf.mxu2 }
 0x124   :  { %v2754_v41 = vadd.f32 %v217_v39, %v158_v19 }
 0x125   :  { %v194_v44 = vpop.f32.mrf.mxu1 }
 0x126   :  { %v195_v45 = vadd.f32 %v194_v44, %v157_v3  ;;  %v2759_v46 = vsel %vm2750_vm8, %v2754_v41, %v288_v42  ;;  %v2764_v47 = vsel %vm2750_vm8, %v2754_v41, %v377_v43  ;;  %v625_v48 = vrot.slane %v2754_v41, 6 }
 0x127   :  { %v712_v49 = vrot.slane %v2754_v41, 2 }
 0x128   :  { %v291_v50 = vsel %vm2720_vm7, %v195_v45, %v287_v29  ;;  %v2772_v51 = vsel %vm2720_vm7, %v195_v45, %v376_v30  ;;  %v2778_v52 = vsel %vm2750_vm8, %v215_v31, %v625_v48  ;;  %v959_v54 = vrot.slane %v195_v45, 6 }
 0x129   :  { %v2784_v53 = vsel %vm2750_vm8, %v215_v31, %v712_v49  ;;  %v1046_v55 = vrot.slane %v195_v45, 2 }
 0x12a   :  { %v2788_v57 = vsel %vm2720_vm7, %v189_v9, %v959_v54 }
 0x12b   :  { %v220_v56 = vpop.f32.mrf.mxu2  ;;  %v2792_v59 = vsel %vm2720_vm7, %v189_v9, %v1046_v55  ;;  %v311_v9 = vrot.slane %v240_v8, 6 }
 0x12c   :  { %v221_v58 = vadd.f32 %v220_v56, %v158_v19  ;;  %v262_v19 = vpop.f32.mrf.mxu3 }
 0x12d   :  { %v282_v60 = vpop.f32.mrf.mxu1  ;;  %v295_v21 = vrot.slane %v262_v19, 6 }
 0x12e   :  { %v292_v61 = vsel %vm2750_vm8, %v221_v58, %v288_v42  ;;  %v296_v62 = vrot.slane %v282_v60, 6  ;;  %v381_v63 = vsel %vm2750_vm8, %v221_v58, %v377_v43  ;;  %v960_v0 = vrot.slane %v221_v58, 6 }
 0x12f   :  { %v1047_v1 = vrot.slane %v221_v58, 2  ;;  %v299_v22 = vadd.f32 %v295_v21, %v291_v50 }
 0x130   :  { %v300_v2 = vadd.f32 %v296_v62, %v292_v61  ;;  %v2800_v3 = vsel %vm2750_vm8, %v215_v31, %v960_v0 }
 0x131   :  { %v2804_v4 = vsel %vm2750_vm8, %v215_v31, %v1047_v1  ;;  %v301_v29 = vmul.f32 0.5, %v299_v22 }
 0x132   :  { %2235 = vtanh.f32 %v300_v2  ;;  %v302_v56 = vmul.f32 0.5, %v300_v2 }
 0x133   :  { %2237 = vtanh.f32 %v301_v29 }
 0x138   :  { %v2236_v5 = vpop.eup %2235 }
 0x139   :  { %317 = vrot.lane.b32.xlu0 %v2236_v5, %s2422_s5  ;;  %v2238_v30 = vpop.eup %2237 }
 0x13a   :  { %v305_v31 = vmul.f32 0.5, %v2238_v30 }
 0x13c   :  { %v307_v32 = vadd.f32 0.5, %v305_v31 }
 0x141   :  { %312 = vrot.lane.b32.xlu0 %v311_v9, %s2422_s5 }
 0x1ab   :  { %v318_v39 = vpop.permute.xlu0 %317 }
 0x1ac   :  { %v320_v42 = vmul.f32 %v318_v39, %v307_v32 }
 0x1ae   :  { %322 = vrot.lane.b32.xlu1 %v320_v42, %s2422_s5 }
 0x1b3   :  { %v313_v43 = vpop.permute.xlu0 %312 }
 0x1b4   :  { %v315_v44 = vmul.f32 %v313_v43, %v307_v32 }
 0x220   :  { %v323_v45 = vpop.permute.xlu1 %322 }
 0x221   :  { %v325_v54 = vadd.f32 %v323_v45, %v315_v44 }
 0x223   :  { %2239 = vtanh.f32 %v325_v54  ;;  %v394_v32 = vrot.slane %v325_v54, 2 }
 0x224   :  { %2241 = vtanh.f32 %v302_v56 }
 0x229   :  { %v2240_v55 = vpop.eup %2239 }
 0x22a   :  { %328 = vrot.lane.b32.xlu1 %v2240_v55, %s2422_s5  ;;  %v2242_v50 = vpop.eup %2241 }
 0x22b   :  { %v306_v58 = vmul.f32 0.5, %v2242_v50 }
 0x22d   :  { %v308_v60 = vadd.f32 0.5, %v306_v58 }
 0x29c   :  { %v329_v61 = vpop.permute.xlu1 %328 }
 0x29d   :  { %v2813_v62 = vmul.f32 %v329_v61, %v308_v60 }
 0x29f   :  { %v2816_v0 = vrot.slane %v2813_v62, 2 }
 0x2a1   :  { %2183 = vmatmul.msk.f32.vlgmr.msrb.gmra.mxu2 %vm241_vm1, %v2816_v0  ;;  %2184 = vmatmul.msk.f32.vlgmr.msrb.gmra.mxu3 %vm241_vm1, %v2816_v0 }
 0x2a2   :  { %679 = vmatpush.msrb.mxu2 %v2520_v6  ;;  %699 = vmatpush.msrb.mxu3 %v2546_v11 }
 0x2a4   :  { %680 = vmatpush.msrb.mxu2 %v2527_v7  ;;  %700 = vmatpush.msrb.mxu3 %v2577_v15 }
 0x2a6   :  { %681 = vmatpush.msrb.mxu2 %v2540_v10  ;;  %701 = vmatpush.msrb.mxu3 %v2582_v16 }
 0x2a8   :  { %682 = vmatpush.msrb.mxu2 %v2553_v12  ;;  %702 = vmatpush.msrb.mxu3 %v2605_v20 }
 0x2aa   :  { %683 = vmatpush.msrb.mxu2 %v2561_v13  ;;  %703 = vmatpush.msrb.mxu3 %v2621_v23 }
 0x2ac   :  { %684 = vmatpush.msrb.mxu2 %v2569_v14  ;;  %704 = vmatpush.msrb.mxu3 %v2629_v24 }
 0x2ae   :  { %685 = vmatpush.msrb.mxu2 %v2587_v17  ;;  %705 = vmatpush.msrb.mxu3 %v2642_v26 }
 0x2b0   :  { %686 = vmatpush.msrb.mxu2 %v2595_v18  ;;  %706 = vmatpush.msrb.mxu3 %v2648_v27 }
 0x324   :  { %v373_v1 = vpop.f32.mrf.mxu3  ;;  %v353_v8 = vpop.f32.mrf.mxu2 }
 0x325   :  { %v383_v2 = vadd.f32 %v381_v63, %v373_v1  ;;  %v382_v9 = vadd.f32 %v2772_v51, %v353_v8 }
 0x327   :  { %2243 = vtanh.f32 %v383_v2  ;;  %v384_v19 = vmul.f32 0.5, %v382_v9  ;;  %v385_v44 = vmul.f32 0.5, %v383_v2 }
 0x329   :  { %2245 = vtanh.f32 %v384_v19 }
 0x32d   :  { %v2244_v5 = vpop.eup %2243 }
 0x32e   :  { %398 = vrot.lane.b32.xlu2 %v2244_v5, %s2422_s5 }
 0x32f   :  { %v2246_v21 = vpop.eup %2245 }
 0x330   :  { %v388_v22 = vmul.f32 0.5, %v2246_v21 }
 0x332   :  { %v390_v29 = vadd.f32 0.5, %v388_v22 }
 0x334   :  { %v396_v39 = vmul.f32 %v394_v32, %v390_v29 }
 0x388   :  { %v399_v30 = vpop.permute.xlu2 %398 }
 0x389   :  { %v401_v31 = vmul.f32 %v399_v30, %v390_v29 }
 0x38b   :  { %403 = vrot.lane.b32.xlu2 %v401_v31, %s2422_s5 }
 0x3e5   :  { %v404_v42 = vpop.permute.xlu2 %403 }
 0x3e6   :  { %v406_v63 = vadd.f32 %v404_v42, %v396_v39 }
 0x3e8   :  { %2247 = vtanh.f32 %v406_v63  ;;  %v476_v30 = vrot.slane %v406_v63, 2 }
 0x3e9   :  { %2249 = vtanh.f32 %v385_v44 }
 0x3ee   :  { %v2248_v43 = vpop.eup %2247 }
 0x3ef   :  { %409 = vrot.lane.b32.xlu0 %v2248_v43, %s2422_s5  ;;  %v2250_v51 = vpop.eup %2249 }
 0x3f0   :  { %v389_v45 = vmul.f32 0.5, %v2250_v51 }
 0x3f2   :  { %v391_v55 = vadd.f32 0.5, %v389_v45 }
 0x461   :  { %v410_v56 = vpop.permute.xlu0 %409 }
 0x462   :  { %v2842_v50 = vmul.f32 %v410_v56, %v391_v55 }
 0x464   :  { %2185 = vmatmul.msk.f32.vlgmr.msrb.gmra.mxu0 %vm241_vm1, %v2842_v50  ;;  %2186 = vmatmul.msk.f32.vlgmr.msra.gmra.mxu1 %vm241_vm1, %v2842_v50 }
 0x465   :  { %759 = vmatpush.msrb.mxu0 %v2520_v6  ;;  %779 = vmatpush.msra.mxu1 %v2546_v11 }
 0x467   :  { %760 = vmatpush.msrb.mxu0 %v2527_v7  ;;  %780 = vmatpush.msra.mxu1 %v2577_v15 }
 0x469   :  { %761 = vmatpush.msrb.mxu0 %v2540_v10  ;;  %781 = vmatpush.msra.mxu1 %v2582_v16 }
 0x46b   :  { %762 = vmatpush.msrb.mxu0 %v2553_v12  ;;  %782 = vmatpush.msra.mxu1 %v2605_v20 }
 0x46d   :  { %763 = vmatpush.msrb.mxu0 %v2561_v13  ;;  %783 = vmatpush.msra.mxu1 %v2621_v23 }
 0x46f   :  { %764 = vmatpush.msrb.mxu0 %v2569_v14  ;;  %784 = vmatpush.msra.mxu1 %v2629_v24 }
 0x471   :  { %765 = vmatpush.msrb.mxu0 %v2587_v17  ;;  %785 = vmatpush.msra.mxu1 %v2642_v26 }
 0x473   :  { %766 = vmatpush.msrb.mxu0 %v2595_v18  ;;  %786 = vmatpush.msra.mxu1 %v2648_v27 }
 0x4e1   :  { %v453_v54 = vpop.f32.mrf.mxu1  ;;  %v433_v1 = vpop.f32.mrf.mxu0 }
 0x4e2   :  { %v461_v58 = vrot.slane %v453_v54, 2  ;;  %v460_v2 = vrot.slane %v433_v1, 2 }
 0x4e4   :  { %v465_v60 = vadd.f32 %v461_v58, %v2759_v46  ;;  %v464_v5 = vadd.f32 %v460_v2, %v2729_v33 }
 0x4e6   :  { %2251 = vtanh.f32 %v465_v60  ;;  %v466_v8 = vmul.f32 0.5, %v464_v5  ;;  %v467_v42 = vmul.f32 0.5, %v465_v60 }
 0x4e8   :  { %2253 = vtanh.f32 %v466_v8 }
 0x4ec   :  { %v2252_v61 = vpop.eup %2251 }
 0x4ed   :  { %480 = vrot.lane.b32.xlu1 %v2252_v61, %s2422_s5 }
 0x4ee   :  { %v2254_v9 = vpop.eup %2253 }
 0x4ef   :  { %v470_v19 = vmul.f32 0.5, %v2254_v9 }
 0x4f1   :  { %v472_v21 = vadd.f32 0.5, %v470_v19 }
 0x4f3   :  { %v478_v31 = vmul.f32 %v476_v30, %v472_v21 }
 0x55f   :  { %v481_v22 = vpop.permute.xlu1 %480 }
 0x560   :  { %v483_v29 = vmul.f32 %v481_v22, %v472_v21 }
 0x562   :  { %485 = vrot.lane.b32.xlu2 %v483_v29, %s2422_s5 }
 0x5bc   :  { %v486_v46 = vpop.permute.xlu2 %485 }
 0x5bd   :  { %v488_v32 = vadd.f32 %v486_v46, %v478_v31 }
 0x5bf   :  { %2255 = vtanh.f32 %v488_v32  ;;  %v559_v22 = vrot.slane %v488_v32, 2 }
 0x5c0   :  { %2257 = vtanh.f32 %v467_v42 }
 0x5c5   :  { %v2256_v39 = vpop.eup %2255 }
 0x5c6   :  { %491 = vrot.lane.b32.xlu0 %v2256_v39, %s2422_s5  ;;  %v2258_v33 = vpop.eup %2257 }
 0x5c7   :  { %v471_v43 = vmul.f32 0.5, %v2258_v33 }
 0x5c9   :  { %v473_v44 = vadd.f32 0.5, %v471_v43 }
 0x638   :  { %v492_v51 = vpop.permute.xlu0 %491 }
 0x639   :  { %v2869_v45 = vmul.f32 %v492_v51, %v473_v44 }
 0x63b   :  { %v2872_v55 = vrot.slane %v2869_v45, 6 }
 0x63d   :  { %2187 = vmatmul.msk.f32.vlgmr.msra.gmra.mxu2 %vm241_vm1, %v2872_v55  ;;  %2188 = vmatmul.msk.f32.vlgmr.msra.gmra.mxu3 %vm241_vm1, %v2872_v55 }
 0x63e   :  { %842 = vmatpush.msra.mxu2 %v2520_v6  ;;  %862 = vmatpush.msra.mxu3 %v2546_v11 }
 0x640   :  { %843 = vmatpush.msra.mxu2 %v2527_v7  ;;  %863 = vmatpush.msra.mxu3 %v2577_v15 }
 0x642   :  { %844 = vmatpush.msra.mxu2 %v2540_v10  ;;  %864 = vmatpush.msra.mxu3 %v2582_v16 }
 0x644   :  { %845 = vmatpush.msra.mxu2 %v2553_v12  ;;  %865 = vmatpush.msra.mxu3 %v2605_v20 }
 0x646   :  { %846 = vmatpush.msra.mxu2 %v2561_v13  ;;  %866 = vmatpush.msra.mxu3 %v2621_v23 }
 0x648   :  { %847 = vmatpush.msra.mxu2 %v2569_v14  ;;  %867 = vmatpush.msra.mxu3 %v2629_v24 }
 0x64a   :  { %848 = vmatpush.msra.mxu2 %v2587_v17  ;;  %868 = vmatpush.msra.mxu3 %v2642_v26 }
 0x64c   :  { %849 = vmatpush.msra.mxu2 %v2595_v18  ;;  %869 = vmatpush.msra.mxu3 %v2648_v27 }
 0x6c0   :  { %v536_v63 = vpop.f32.mrf.mxu3  ;;  %v516_v60 = vpop.f32.mrf.mxu2 }
 0x6c1   :  { %v544_v56 = vrot.slane %v536_v63, 4  ;;  %v543_v61 = vrot.slane %v516_v60, 4  ;;  %v629_v63 = vsel %vm2750_vm8, %v2754_v41, %v625_v48 }
 0x6c3   :  { %v548_v54 = vadd.f32 %v544_v56, %v2764_v47  ;;  %v547_v1 = vadd.f32 %v543_v61, %v2734_v34  ;;  %v628_v61 = vsel %vm2720_vm7, %v2724_v28, %v624_v35 }
 0x6c5   :  { %2259 = vtanh.f32 %v548_v54  ;;  %v549_v2 = vmul.f32 0.5, %v547_v1  ;;  %v550_v46 = vmul.f32 0.5, %v548_v54 }
 0x6c7   :  { %2261 = vtanh.f32 %v549_v2 }
 0x6cb   :  { %v2260_v58 = vpop.eup %2259 }
 0x6cc   :  { %563 = vrot.lane.b32.xlu1 %v2260_v58, %s2422_s5 }
 0x6cd   :  { %v2262_v5 = vpop.eup %2261 }
 0x6ce   :  { %v553_v8 = vmul.f32 0.5, %v2262_v5 }
 0x6d0   :  { %v555_v9 = vadd.f32 0.5, %v553_v8 }
 0x6d2   :  { %v561_v29 = vmul.f32 %v559_v22, %v555_v9 }
 0x73e   :  { %v564_v19 = vpop.permute.xlu1 %563 }
 0x73f   :  { %v566_v21 = vmul.f32 %v564_v19, %v555_v9 }
 0x741   :  { %568 = vrot.lane.b32.xlu2 %v566_v21, %s2422_s5 }
 0x79b   :  { %v569_v47 = vpop.permute.xlu2 %568 }
 0x79c   :  { %v571_v30 = vadd.f32 %v569_v47, %v561_v29 }
 0x79e   :  { %2263 = vtanh.f32 %v571_v30  ;;  %v648_v21 = vrot.slane %v571_v30, 2 }
 0x79f   :  { %2265 = vtanh.f32 %v550_v46 }
 0x7a4   :  { %v2264_v31 = vpop.eup %2263 }
 0x7a5   :  { %574 = vrot.lane.b32.xlu0 %v2264_v31, %s2422_s5  ;;  %v2266_v34 = vpop.eup %2265 }
 0x7a6   :  { %v554_v39 = vmul.f32 0.5, %v2266_v34 }
 0x7a8   :  { %v556_v42 = vadd.f32 0.5, %v554_v39 }
 0x817   :  { %v575_v33 = vpop.permute.xlu0 %574 }
 0x818   :  { %v2899_v43 = vmul.f32 %v575_v33, %v556_v42 }
 0x81a   :  { %v2902_v44 = vrot.slane %v2899_v43, 4 }
 0x81c   :  { %2189 = vmatmul.msk.f32.vlgmr.msra.gmra.mxu0 %vm241_vm1, %v2902_v44  ;;  %2190 = vmatmul.msk.f32.vlgmr.msrb.gmra.mxu1 %vm241_vm1, %v2902_v44 }
 0x81d   :  { %925 = vmatpush.msra.mxu0 %v2520_v6  ;;  %945 = vmatpush.msrb.mxu1 %v2546_v11 }
 0x81f   :  { %926 = vmatpush.msra.mxu0 %v2527_v7  ;;  %946 = vmatpush.msrb.mxu1 %v2577_v15 }
 0x821   :  { %927 = vmatpush.msra.mxu0 %v2540_v10  ;;  %947 = vmatpush.msrb.mxu1 %v2582_v16 }
 0x823   :  { %928 = vmatpush.msra.mxu0 %v2553_v12  ;;  %948 = vmatpush.msrb.mxu1 %v2605_v20 }
 0x825   :  { %929 = vmatpush.msra.mxu0 %v2561_v13  ;;  %949 = vmatpush.msrb.mxu1 %v2621_v23 }
 0x827   :  { %930 = vmatpush.msra.mxu0 %v2569_v14  ;;  %950 = vmatpush.msrb.mxu1 %v2629_v24 }
 0x829   :  { %931 = vmatpush.msra.mxu0 %v2587_v17  ;;  %951 = vmatpush.msrb.mxu1 %v2642_v26 }
 0x82b   :  { %932 = vmatpush.msra.mxu0 %v2595_v18  ;;  %952 = vmatpush.msrb.mxu1 %v2648_v27 }
 0x899   :  { %v619_v32 = vpop.f32.mrf.mxu1  ;;  %v599_v58 = vpop.f32.mrf.mxu0 }
 0x89a   :  { %v633_v51 = vrot.slane %v619_v32, 6  ;;  %v632_v60 = vrot.slane %v599_v58, 6 }
 0x89c   :  { %v637_v56 = vadd.f32 %v633_v51, %v629_v63  ;;  %v636_v1 = vadd.f32 %v632_v60, %v628_v61 }
 0x89e   :  { %2267 = vtanh.f32 %v637_v56  ;;  %v638_v2 = vmul.f32 0.5, %v636_v1  ;;  %v639_v46 = vmul.f32 0.5, %v637_v56 }
 0x8a0   :  { %2269 = vtanh.f32 %v638_v2 }
 0x8a4   :  { %v2268_v54 = vpop.eup %2267 }
 0x8a5   :  { %652 = vrot.lane.b32.xlu1 %v2268_v54, %s2422_s5 }
 0x8a6   :  { %v2270_v5 = vpop.eup %2269 }
 0x8a7   :  { %v642_v8 = vmul.f32 0.5, %v2270_v5 }
 0x8a9   :  { %v644_v9 = vadd.f32 0.5, %v642_v8 }
 0x8ab   :  { %v650_v22 = vmul.f32 %v648_v21, %v644_v9 }
 0x917   :  { %v653_v48 = vpop.permute.xlu1 %652 }
 0x918   :  { %v655_v19 = vmul.f32 %v653_v48, %v644_v9 }
 0x91a   :  { %657 = vrot.lane.b32.xlu2 %v655_v19, %s2422_s5 }
 0x974   :  { %v658_v29 = vpop.permute.xlu2 %657 }
 0x975   :  { %v660_v47 = vadd.f32 %v658_v29, %v650_v22 }
 0x977   :  { %2271 = vtanh.f32 %v660_v47 }
 0x978   :  { %2273 = vtanh.f32 %v639_v46 }
 0x97d   :  { %v2272_v31 = vpop.eup %2271 }
 0x97e   :  { %663 = vrot.lane.b32.xlu0 %v2272_v31, %s2422_s5  ;;  %v2274_v35 = vpop.eup %2273 }
 0x97f   :  { %v643_v34 = vmul.f32 0.5, %v2274_v35 }
 0x981   :  { %v645_v39 = vadd.f32 0.5, %v643_v34 }
 0x9f0   :  { %v664_v42 = vpop.permute.xlu0 %663 }
 0x9f1   :  { %v2937_v33 = vmul.f32 %v664_v42, %v645_v39 }
 0x9f3   :  { %v668_v32 = vrot.slane %v2937_v33, 2 }
 0x9f5   :  { %2191 = vmatmul.msk.f32.vlgmr.msrb.gmra.mxu2 %vm241_vm1, %v668_v32  ;;  %2192 = vmatmul.msk.f32.vlgmr.msrb.gmra.mxu3 %vm241_vm1, %v668_v32  ;;  %v1101_v54 = vrot.slane %v668_v32, 6 }
 0x9f6   :  { %1014 = vmatpush.msrb.mxu2 %v2520_v6  ;;  %1034 = vmatpush.msrb.mxu3 %v2546_v11 }
 0x9f8   :  { %1015 = vmatpush.msrb.mxu2 %v2527_v7  ;;  %1035 = vmatpush.msrb.mxu3 %v2577_v15  ;;  %v716_v7 = vsel %vm2750_vm8, %v2754_v41, %v712_v49 }
 0x9fa   :  { %1016 = vmatpush.msrb.mxu2 %v2540_v10  ;;  %1036 = vmatpush.msrb.mxu3 %v2582_v16 }
 0x9fc   :  { %1017 = vmatpush.msrb.mxu2 %v2553_v12  ;;  %1037 = vmatpush.msrb.mxu3 %v2605_v20 }
 0x9fe   :  { %1018 = vmatpush.msrb.mxu2 %v2561_v13  ;;  %1038 = vmatpush.msrb.mxu3 %v2621_v23  ;;  %v715_v13 = vsel %vm2720_vm7, %v2724_v28, %v711_v36 }
 0xa00   :  { %1019 = vmatpush.msrb.mxu2 %v2569_v14  ;;  %1039 = vmatpush.msrb.mxu3 %v2629_v24  ;;  %v729_v24 = vrot.slane %v660_v47, 2 }
 0xa02   :  { %1020 = vmatpush.msrb.mxu2 %v2587_v17  ;;  %1040 = vmatpush.msrb.mxu3 %v2642_v26 }
 0xa04   :  { %1021 = vmatpush.msrb.mxu2 %v2595_v18  ;;  %1041 = vmatpush.msrb.mxu3 %v2648_v27 }
 0xa78   :  { %v708_v6 = vpop.f32.mrf.mxu3  ;;  %v688_v12 = vpop.f32.mrf.mxu2 }
 0xa79   :  { %v718_v10 = vadd.f32 %v716_v7, %v708_v6  ;;  %v717_v14 = vadd.f32 %v715_v13, %v688_v12 }
 0xa7b   :  { %2275 = vtanh.f32 %v718_v10  ;;  %v719_v15 = vmul.f32 0.5, %v717_v14  ;;  %v720_v30 = vmul.f32 0.5, %v718_v10  ;;  %v1087_v14 = vrot.slane %v2899_v43, 2 }
 0xa7d   :  { %2277 = vtanh.f32 %v719_v15 }
 0xa81   :  { %v2276_v11 = vpop.eup %2275 }
 0xa82   :  { %733 = vrot.lane.b32.xlu1 %v2276_v11, %s2422_s5  ;;  %v1102_v11 = vrot.slane %v2902_v44, 6 }
 0xa83   :  { %v2278_v16 = vpop.eup %2277 }
 0xa84   :  { %v723_v17 = vmul.f32 0.5, %v2278_v16 }
 0xa86   :  { %v725_v18 = vadd.f32 0.5, %v723_v17 }
 0xa88   :  { %v731_v26 = vmul.f32 %v729_v24, %v725_v18 }
 0xaf4   :  { %v734_v20 = vpop.permute.xlu1 %733 }
 0xaf5   :  { %v736_v23 = vmul.f32 %v734_v20, %v725_v18 }
 0xaf7   :  { %738 = vrot.lane.b32.xlu2 %v736_v23, %s2422_s5 }
 0xb51   :  { %v739_v27 = vpop.permute.xlu2 %738 }
 0xb52   :  { %v741_v41 = vadd.f32 %v739_v27, %v731_v26 }
 0xb54   :  { %2279 = vtanh.f32 %v741_v41  ;;  %v811_v46 = vrot.slane %v741_v41, 2 }
 0xb55   :  { %2281 = vtanh.f32 %v720_v30 }
 0xb5a   :  { %v2280_v49 = vpop.eup %2279 }
 0xb5b   :  { %744 = vrot.lane.b32.xlu0 %v2280_v49, %s2422_s5  ;;  %v2282_v28 = vpop.eup %2281 }
 0xb5c   :  { %v724_v36 = vmul.f32 0.5, %v2282_v28 }
 0xb5e   :  { %v726_v51 = vadd.f32 0.5, %v724_v36 }
 0xbcd   :  { %v745_v63 = vpop.permute.xlu0 %744 }
 0xbce   :  { %v2971_v56 = vmul.f32 %v745_v63, %v726_v51 }
 0xbd0   :  { %v1089_v58 = vrot.slane %v2971_v56, 6  ;;  %2193 = vmatmul.msk.f32.vlgmr.msrb.gmra.mxu0 %vm241_vm1, %v2971_v56  ;;  %2194 = vmatmul.msk.f32.vlgmr.msra.gmra.mxu1 %vm241_vm1, %v2971_v56  ;;  %v3127_v56 = vld [vmem:[%s3562_s7 + $0x58] sm:$0xff] }
 0xbd2   :  { %v2981_v60 = vsel %vm1112_vm9, %v1089_v58, %v1101_v54 }
 0xc4d   :  { %v788_v61 = vpop.f32.mrf.mxu1  ;;  %v768_v8 = vpop.f32.mrf.mxu0 }
 0xc4e   :  { %v796_v1 = vrot.slane %v788_v61, 2  ;;  %v795_v9 = vrot.slane %v768_v8, 2 }
 0xc50   :  { %v800_v2 = vadd.f32 %v796_v1, %v2778_v52  ;;  %v799_v48 = vadd.f32 %v795_v9, %v2742_v37 }
 0xc52   :  { %2283 = vtanh.f32 %v800_v2  ;;  %v801_v19 = vmul.f32 0.5, %v799_v48  ;;  %v802_v42 = vmul.f32 0.5, %v800_v2  ;;  %v1103_v48 = vrot.slane %v2872_v55, 6 }
 0xc54   :  { %2285 = vtanh.f32 %v801_v19 }
 0xc58   :  { %v2284_v5 = vpop.eup %2283 }
 0xc59   :  { %815 = vrot.lane.b32.xlu1 %v2284_v5, %s2422_s5 }
 0xc5a   :  { %v2286_v21 = vpop.eup %2285 }
 0xc5b   :  { %v805_v22 = vmul.f32 0.5, %v2286_v21 }
 0xc5d   :  { %v807_v29 = vadd.f32 0.5, %v805_v22  ;;  %v1085_v22 = vrot.slane %v2869_v45, 4 }
 0xc5f   :  { %v813_v35 = vmul.f32 %v811_v46, %v807_v29 }
 0xccb   :  { %v816_v47 = vpop.permute.xlu1 %815 }
 0xccc   :  { %v818_v31 = vmul.f32 %v816_v47, %v807_v29 }
 0xcce   :  { %820 = vrot.lane.b32.xlu2 %v818_v31, %s2422_s5 }
 0xd28   :  { %v821_v52 = vpop.permute.xlu2 %820 }
 0xd29   :  { %v823_v34 = vadd.f32 %v821_v52, %v813_v35 }
 0xd2b   :  { %2287 = vtanh.f32 %v823_v34  ;;  %v894_v51 = vrot.slane %v823_v34, 2 }
 0xd2c   :  { %2289 = vtanh.f32 %v802_v42 }
 0xd31   :  { %v2288_v39 = vpop.eup %2287 }
 0xd32   :  { %826 = vrot.lane.b32.xlu0 %v2288_v39, %s2422_s5  ;;  %v2290_v37 = vpop.eup %2289 }
 0xd33   :  { %v806_v32 = vmul.f32 0.5, %v2290_v37 }
 0xd35   :  { %v808_v6 = vadd.f32 0.5, %v806_v32 }
 0xda4   :  { %v827_v7 = vpop.permute.xlu0 %826 }
 0xda5   :  { %v829_v10 = vmul.f32 %v827_v7, %v808_v6 }
 0xda7   :  { %v831_v12 = vrot.slane %v829_v10, 6  ;;  %v1091_v13 = vrot.slane %v829_v10, 4 }
 0xda9   :  { %v1100_v15 = vrot.slane %v831_v12, 6  ;;  %v2991_v16 = vsel %vm1112_vm9, %v1091_v13, %v1102_v11  ;;  %2195 = vmatmul.msk.f32.vlgmr.msra.gmra.mxu2 %vm241_vm1, %v831_v12  ;;  %2196 = vmatmul.msk.f32.vlgmr.msra.gmra.mxu3 %vm241_vm1, %v831_v12 }
 0xdab   :  { %v2996_v17 = vsel %vm1112_vm9, %v1087_v14, %v1100_v15 }
 0xe2c   :  { %v871_v18 = vpop.f32.mrf.mxu3  ;;  %v851_v43 = vpop.f32.mrf.mxu2 }
 0xe2d   :  { %v879_v20 = vrot.slane %v871_v18, 4  ;;  %v878_v24 = vrot.slane %v851_v43, 4 }
 0xe2f   :  { %v883_v23 = vadd.f32 %v879_v20, %v2784_v53  ;;  %v882_v26 = vadd.f32 %v878_v24, %v2748_v38 }
 0xe31   :  { %2291 = vtanh.f32 %v883_v23  ;;  %v884_v27 = vmul.f32 0.5, %v882_v26  ;;  %v885_v1 = vmul.f32 0.5, %v883_v23 }
 0xe33   :  { %2293 = vtanh.f32 %v884_v27 }
 0xe37   :  { %v2292_v44 = vpop.eup %2291 }
 0xe38   :  { %898 = vrot.lane.b32.xlu1 %v2292_v44, %s2422_s5  ;;  %v1083_v44 = vrot.slane %v2842_v50, 6 }
 0xe39   :  { %v2294_v41 = vpop.eup %2293 }
 0xe3a   :  { %v888_v49 = vmul.f32 0.5, %v2294_v41 }
 0xe3c   :  { %v890_v30 = vadd.f32 0.5, %v888_v49 }
 0xe3e   :  { %v896_v63 = vmul.f32 %v894_v51, %v890_v30 }
 0xeaa   :  { %v899_v28 = vpop.permute.xlu1 %898 }
 0xeab   :  { %v901_v36 = vmul.f32 %v899_v28, %v890_v30 }
 0xead   :  { %903 = vrot.lane.b32.xlu2 %v901_v36, %s2422_s5 }
 0xf07   :  { %v904_v53 = vpop.permute.xlu2 %903 }
 0xf08   :  { %v906_v54 = vadd.f32 %v904_v53, %v896_v63 }
 0xf0a   :  { %2295 = vtanh.f32 %v906_v54  ;;  %v983_v11 = vrot.slane %v906_v54, 2 }
 0xf0b   :  { %2297 = vtanh.f32 %v885_v1 }
 0xf10   :  { %v2296_v61 = vpop.eup %2295 }
 0xf11   :  { %909 = vrot.lane.b32.xlu0 %v2296_v61, %s2422_s5  ;;  %v2298_v38 = vpop.eup %2297 }
 0xf12   :  { %v889_v2 = vmul.f32 0.5, %v2298_v38 }
 0xf14   :  { %v891_v5 = vadd.f32 0.5, %v889_v2 }
 0xf83   :  { %v910_v8 = vpop.permute.xlu0 %909 }
 0xf84   :  { %v912_v9 = vmul.f32 %v910_v8, %v891_v5 }
 0xf86   :  { %v914_v19 = vrot.slane %v912_v9, 4  ;;  %v1093_v21 = vrot.slane %v912_v9, 2 }
 0xf88   :  { %v1099_v29 = vrot.slane %v914_v19, 6  ;;  %v1120_v47 = vsel %vm1112_vm9, %v1093_v21, %v1103_v48  ;;  %2197 = vmatmul.msk.f32.vlgmr.msra.gmra.mxu0 %vm241_vm1, %v914_v19  ;;  %2198 = vmatmul.msk.f32.vlgmr.msrb.gmra.mxu1 %vm241_vm1, %v914_v19 }
 0xf8a   :  { %v3009_v31 = vsel %vm1112_vm9, %v1085_v22, %v1099_v29 }
0x1005   :  { %v954_v46 = vpop.f32.mrf.mxu1  ;;  %v934_v34 = vpop.f32.mrf.mxu0 }
0x1006   :  { %v968_v35 = vrot.slane %v954_v46, 6  ;;  %v967_v45 = vrot.slane %v934_v34, 6  ;;  %v1169_v34 = vld [vmem:[%s3561_s6 + $0x70] sm:$0xff] }
0x1007   :  { %1211 = vmatpush.msrb.mxu0 %v1169_v34 }
0x1008   :  { %v972_v52 = vadd.f32 %v968_v35, %v2800_v3  ;;  %v971_v39 = vadd.f32 %v967_v45, %v2788_v57  ;;  %v1170_v45 = vld [vmem:[%s3561_s6 + $0x78] sm:$0xff] }
0x1009   :  { %1237 = vmatpush.msra.mxu1 %v1170_v45 }
0x100a   :  { %2299 = vtanh.f32 %v972_v52  ;;  %v973_v42 = vmul.f32 0.5, %v971_v39  ;;  %v974_v15 = vmul.f32 0.5, %v972_v52  ;;  %v1165_v39 = vld [vmem:[%s3561_s6 + $0x50] sm:$0xff] }
0x100c   :  { %2301 = vtanh.f32 %v973_v42  ;;  %v1166_v42 = vld [vmem:[%s3561_s6 + $0x58] sm:$0xff] }
0x1010   :  { %v2300_v55 = vpop.eup %2299 }
0x1011   :  { %987 = vrot.lane.b32.xlu1 %v2300_v55, %s2422_s5 }
0x1012   :  { %v2302_v37 = vpop.eup %2301 }
0x1013   :  { %v977_v32 = vmul.f32 0.5, %v2302_v37  ;;  %v1163_v37 = vld [vmem:[%s3561_s6 + $0x40] sm:$0xff] }
0x1015   :  { %v979_v6 = vadd.f32 0.5, %v977_v32  ;;  %v1164_v32 = vld [vmem:[%s3561_s6 + $0x48] sm:$0xff] }
0x1017   :  { %v985_v12 = vmul.f32 %v983_v11, %v979_v6 }
0x1083   :  { %v988_v7 = vpop.permute.xlu1 %987 }
0x1084   :  { %v990_v10 = vmul.f32 %v988_v7, %v979_v6  ;;  %v1161_v7 = vld [vmem:[%s3561_s6 + $0x30] sm:$0xff] }
0x1086   :  { %992 = vrot.lane.b32.xlu2 %v990_v10, %s2422_s5  ;;  %v3070_v10 = vld [vmem:[%s3562_s7 + $0x70] sm:$0xff] }
0x1087   :  { %1286 = vmatpush.msra.mxu2 %v3070_v10 }
0x10e0   :  { %v993_v3 = vpop.permute.xlu2 %992 }
0x10e1   :  { %v995_v13 = vadd.f32 %v993_v3, %v985_v12  ;;  %v3079_v12 = vld [vmem:[%s3562_s7 + $0x78] sm:$0xff] }
0x10e2   :  { %v1162_v3 = vld [vmem:[%s3561_s6 + $0x38] sm:$0xff]  ;;  %1306 = vmatpush.msra.mxu3 %v3079_v12 }
0x10e3   :  { %2303 = vtanh.f32 %v995_v13 }
0x10e4   :  { %2305 = vtanh.f32 %v974_v15  ;;  %v1160_v15 = vld [vmem:[%s3561_s6 + $0x28] sm:$0xff] }
0x10e9   :  { %v2304_v14 = vpop.eup %2303 }
0x10ea   :  { %998 = vrot.lane.b32.xlu0 %v2304_v14, %s2422_s5  ;;  %v2306_v57 = vpop.eup %2305  ;;  %v3097_v14 = vld [vmem:[%s3562_s7 + $0x68] sm:$0xff] }
0x10eb   :  { %v978_v18 = vmul.f32 0.5, %v2306_v57  ;;  %1307 = vmatpush.msra.mxu3 %v3097_v14  ;;  %v1157_v57 = vld [vmem:[%s3561_s6 + $0x10] sm:$0xff] }
0x10ed   :  { %v980_v20 = vadd.f32 0.5, %v978_v18  ;;  %v1158_v18 = vld [vmem:[%s3561_s6 + $0x18] sm:$0xff]  ;;  %1308 = vmatpush.msra.mxu3 %v3127_v56 }
0x115c   :  { %v999_v23 = vpop.permute.xlu0 %998 }
0x115d   :  { %v1001_v43 = vmul.f32 %v999_v23, %v980_v20  ;;  %v1155_v20 = vld [vmem:[%s3561_s6] sm:$0xff]  ;;  %v1117_v23 = vsel %vm1112_vm9, %v2937_v33, %v1089_v58  ;;  %v3140_v58 = vld [vmem:[%s3562_s7 + $0x48] sm:$0xff] }
0x115e   :  { %v3132_v33 = vld [vmem:[%s3562_s7 + $0x40] sm:$0xff]  ;;  %1309 = vmatpush.msra.mxu3 %v3140_v58 }
0x115f   :  { %v1003_v24 = vrot.slane %v1001_v43, 2  ;;  %v3018_v26 = vsel %vm1112_vm9, %v1001_v43, %v1083_v44  ;;  %v1156_v43 = vld [vmem:[%s3561_s6 + $0x8] sm:$0xff] }
0x1161   :  { %v1098_v27 = vrot.slane %v1003_v24, 6  ;;  %2199 = vmatmul.msk.f32.vlgmr.msrb.gmra.mxu2 %vm241_vm1, %v1003_v24  ;;  %2200 = vmatmul.msk.f32.vlgmr.msrb.gmra.mxu3 %vm241_vm1, %v1003_v24  ;;  %v3122_v24 = vld [vmem:[%s3562_s7 + $0x50] sm:$0xff] }
0x1163   :  { %v1114_v41 = vsel %vm1112_vm9, %v1083_v44, %v1098_v27  ;;  %v3145_v27 = vld [vmem:[%s3562_s7 + $0x30] sm:$0xff] }
0x1164   :  { %1136 = vst.sshfl [vmem:[#allocation1 + $0x20] sm:$0xff pattern:$0x73625140] %v1114_v41  ;;  %v3150_v41 = vld [vmem:[%s3562_s7 + $0x38] sm:$0xff] }
0x1165   :  { %1310 = vmatpush.msra.mxu3 %v3150_v41 }
0x116b   :  { %v3023_v49 = vld [vmem:[#allocation1 + $0x21] ss:$4 sm:$0xff] }
0x116c   :  { %1141 = vst.sshfl [vmem:[#allocation1 + $0x20] sm:$0xff pattern:$0x73625140] %v2996_v17 }
0x1173   :  { %v3026_v30 = vld [vmem:[#allocation1 + $0x21] ss:$4 sm:$0xff] }
0x1174   :  { %1145 = vst.sshfl [vmem:[#allocation1 + $0x20] sm:$0xff pattern:$0x73625140] %v2981_v60  ;;  %v1064_v60 = vrot.slane %v995_v13, 2  ;;  %v1159_v13 = vld [vmem:[%s3561_s6 + $0x20] sm:$0xff] }
0x117b   :  { %v1146_v50 = vld [vmem:[#allocation1 + $0x21] ss:$4 sm:$0xff] }
0x117c   :  { %1149 = vst.sshfl [vmem:[#allocation1 + $0x20] sm:$0xff pattern:$0x73625140] %v1120_v47  ;;  %v1104_v47 = vrot.slane %v2816_v0, 6  ;;  %v1168_v0 = vld [vmem:[%s3561_s6 + $0x68] sm:$0xff] }
0x117d   :  { %1238 = vmatpush.msra.mxu1 %v1168_v0 }
0x117f   :  { %1239 = vmatpush.msra.mxu1 %v1166_v42 }
0x1181   :  { %1240 = vmatpush.msra.mxu1 %v1164_v32 }
0x1183   :  { %v1150_v55 = vld [vmem:[#allocation1 + $0x21] ss:$4 sm:$0xff]  ;;  %1241 = vmatpush.msra.mxu1 %v1162_v3 }
0x1185   :  { %1242 = vmatpush.msra.mxu1 %v1160_v15 }
0x1187   :  { %1243 = vmatpush.msra.mxu1 %v1158_v18 }
0x1189   :  { %1244 = vmatpush.msra.mxu1 %v1156_v43 }
0x118b   :  { %1477 = vmatpush.msrb.mxu1 %v3079_v12 }
0x118d   :  { %1478 = vmatpush.msrb.mxu1 %v3097_v14 }
0x118f   :  { %1479 = vmatpush.msrb.mxu1 %v3127_v56 }
0x1191   :  { %1480 = vmatpush.msrb.mxu1 %v3140_v58 }
0x1193   :  { %1481 = vmatpush.msrb.mxu1 %v3150_v41 }
0x11e4   :  { %v1043_v28 = vpop.f32.mrf.mxu3  ;;  %v1023_v63 = vpop.f32.mrf.mxu2 }
0x11e5   :  { %v1053_v36 = vadd.f32 %v2804_v4, %v1043_v28  ;;  %v1052_v53 = vadd.f32 %v2792_v59, %v1023_v63  ;;  %v3164_v28 = vld [vmem:[%s3562_s7 + $0x28] sm:$0xff]  ;;  %v3183_v63 = vld [vmem:[%s3562_s7 + $0x18] sm:$0xff] }
0x11e6   :  { %1311 = vmatpush.msra.mxu3 %v3164_v28  ;;  %1482 = vmatpush.msrb.mxu1 %v3164_v28 }
0x11e7   :  { %2307 = vtanh.f32 %v1053_v36  ;;  %v1054_v54 = vmul.f32 0.5, %v1052_v53  ;;  %v1055_v48 = vmul.f32 0.5, %v1053_v36  ;;  %v3193_v53 = vld [vmem:[%s3562_s7 + $0x8] sm:$0xff] }
0x11e8   :  { %1312 = vmatpush.msra.mxu3 %v3183_v63  ;;  %1483 = vmatpush.msrb.mxu1 %v3183_v63 }
0x11e9   :  { %2309 = vtanh.f32 %v1054_v54  ;;  %v2207_v54 = vld [vmem:[%s3567_s12 + $0x2] sm:$0x3] }
0x11ea   :  { %1313 = vmatpush.msra.mxu3 %v3193_v53  ;;  %1484 = vmatpush.msrb.mxu1 %v3193_v53 }
0x11eb   :  { %2210 = vmatmul.msk.f32.vlgmr.msra.gmra.mxu3 %vm241_vm1, %v2207_v54 }
0x11ec   :  { %1457 = vmatpush.msrb.mxu3 %v3070_v10 }
0x11ed   :  { %v2308_v51 = vpop.eup %2307 }
0x11ee   :  { %1068 = vrot.lane.b32.xlu1 %v2308_v51, %s2422_s5  ;;  %v3178_v51 = vld [vmem:[%s3562_s7 + $0x10] sm:$0xff] }
0x11ef   :  { %v2310_v61 = vpop.eup %2309 }
0x11f0   :  { %v1058_v17 = vmul.f32 0.5, %v2310_v61 }
0x11f2   :  { %v1060_v1 = vadd.f32 0.5, %v1058_v17  ;;  %v2208_v17 = vld [vmem:[%s3568_s13 + $0x2] sm:$0x3] }
0x11f4   :  { %v1066_v5 = vmul.f32 %v1064_v60, %v1060_v1 }
0x1260   :  { %v1069_v38 = vpop.permute.xlu1 %1068 }
0x1261   :  { %v1071_v2 = vmul.f32 %v1069_v38, %v1060_v1  ;;  %v1344_v1 = vrot.slane %v2208_v17, 6 }
0x1263   :  { %1073 = vrot.lane.b32.xlu2 %v1071_v2, %s2422_s5  ;;  %v1171_v2 = vld [vmem:[%s3563_s8] sm:$0x3] }
0x1264   :  { %v1173_v60 = vperm.slane %v1171_v2, 0 }
0x126b   :  { %1345 = vrot.lane.b32.xlu2 %v1344_v1, %s2422_s5 }
0x12bd   :  { %v1074_v8 = vpop.permute.xlu2 %1073 }
0x12be   :  { %v1076_v4 = vadd.f32 %v1074_v8, %v1066_v5  ;;  %v1174_v8 = vperm.slane %v1171_v2, 1 }
0x12c0   :  { %2311 = vtanh.f32 %v1076_v4 }
0x12c1   :  { %2313 = vtanh.f32 %v1055_v48 }
0x12c6   :  { %v2312_v9 = vpop.eup %2311 }
0x12c7   :  { %1079 = vrot.lane.b32.xlu0 %v2312_v9, %s2422_s5  ;;  %v2314_v59 = vpop.eup %2313 }
0x12c8   :  { %v1059_v19 = vmul.f32 0.5, %v2314_v59 }
0x12ca   :  { %v1061_v21 = vadd.f32 0.5, %v1059_v19 }
0x1339   :  { %v1080_v22 = vpop.permute.xlu0 %1079 }
0x133a   :  { %v1082_v29 = vmul.f32 %v1080_v22, %v1061_v21 }
0x133c   :  { %v1096_v46 = vrot.slane %v1082_v29, 6 }
0x133e   :  { %v1113_v35 = vsel %vm1112_vm9, %v2813_v62, %v1096_v46  ;;  %v1122_v52 = vsel %vm1112_vm9, %v1096_v46, %v1104_v47  ;;  %v1167_v62 = vld [vmem:[%s3561_s6 + $0x60] sm:$0xff] }
0x133f   :  { %1133 = vst.sshfl [vmem:[#allocation1] sm:$0xff pattern:$0x73625140] %v1113_v35  ;;  %1212 = vmatpush.msrb.mxu0 %v1167_v62 }
0x1340   :  { %1153 = vst.sshfl [vmem:[#allocation1 + $0x20] sm:$0xff pattern:$0x73625140] %v1122_v52 }
0x1341   :  { %1191 = vst [vmem:[#allocation1 + $0x23] ss:$4 sm:$0xff] %v1150_v55  ;;  %1213 = vmatpush.msrb.mxu0 %v1165_v39 }
0x1343   :  { %1214 = vmatpush.msrb.mxu0 %v1163_v37  ;;  %v1315_v37 = vpop.f32.mrf.mxu3 }
0x1344   :  { %v1329_v15 = vrot.slane %v1315_v37, 6 }
0x1345   :  { %1215 = vmatpush.msrb.mxu0 %v1161_v7 }
0x1346   :  { %v3062_v6 = vld [vmem:[#allocation1 + $0x1] ss:$4 sm:$0xff] }
0x1347   :  { %1139 = vst.sshfl [vmem:[#allocation1] sm:$0xff pattern:$0x73625140] %v3009_v31  ;;  %v3073_v11 = vld [vmem:[#allocation1 + $0x21] ss:$4 sm:$0xff]  ;;  %1216 = vmatpush.msrb.mxu0 %v1159_v13 }
0x1348   :  { %1187 = vst [vmem:[#allocation1 + $0x21] ss:$4 sm:$0xff] %v1146_v50  ;;  %v3088_v31 = vld [vmem:[%s3562_s7 + $0x60] sm:$0xff] }
0x1349   :  { %1287 = vmatpush.msra.mxu2 %v3088_v31  ;;  %1217 = vmatpush.msrb.mxu0 %v1157_v57  ;;  %v3159_v50 = vld [vmem:[%s3562_s7 + $0x20] sm:$0xff] }
0x134a   :  { %1458 = vmatpush.msrb.mxu3 %v3088_v31 }
0x134b   :  { %1218 = vmatpush.msrb.mxu0 %v1155_v20  ;;  %1288 = vmatpush.msra.mxu2 %v3122_v24 }
0x134c   :  { %1459 = vmatpush.msrb.mxu3 %v3122_v24 }
0x134d   :  { %1397 = vmatpush.msra.mxu0 %v3079_v12  ;;  %1289 = vmatpush.msra.mxu2 %v3132_v33 }
0x134e   :  { %v1140_v44 = vld [vmem:[#allocation1 + $0x1] ss:$4 sm:$0xff]  ;;  %1460 = vmatpush.msrb.mxu3 %v3132_v33 }
0x134f   :  { %1143 = vst.sshfl [vmem:[#allocation1] sm:$0xff pattern:$0x73625140] %v1117_v23  ;;  %1398 = vmatpush.msra.mxu0 %v3097_v14  ;;  %1290 = vmatpush.msra.mxu2 %v3145_v27 }
0x1350   :  { %1461 = vmatpush.msrb.mxu3 %v3145_v27 }
0x1351   :  { %1399 = vmatpush.msra.mxu0 %v3127_v56  ;;  %1291 = vmatpush.msra.mxu2 %v3159_v50 }
0x1352   :  { %1462 = vmatpush.msrb.mxu3 %v3159_v50 }
0x1353   :  { %1400 = vmatpush.msra.mxu0 %v3140_v58  ;;  %1292 = vmatpush.msra.mxu2 %v3178_v51 }
0x1354   :  { %1463 = vmatpush.msrb.mxu3 %v3178_v51 }
0x1355   :  { %1401 = vmatpush.msra.mxu0 %v3150_v41 }
0x1356   :  { %v1144_v36 = vld [vmem:[#allocation1 + $0x1] ss:$4 sm:$0xff] }
0x1357   :  { %1147 = vst.sshfl [vmem:[#allocation1] sm:$0xff pattern:$0x73625140] %v2991_v16  ;;  %v3188_v16 = vld [vmem:[%s3562_s7] sm:$0xff]  ;;  %1402 = vmatpush.msra.mxu0 %v3164_v28 }
0x1358   :  { %1185 = vst [vmem:[#allocation1 + $0x20] ss:$4 sm:$0xff] %v1144_v36  ;;  %1293 = vmatpush.msra.mxu2 %v3188_v16  ;;  %1464 = vmatpush.msrb.mxu3 %v3188_v16 }
0x1359   :  { %2209 = vmatmul.msk.f32.vlgmr.msra.gmra.mxu2 %vm241_vm1, %v2207_v54  ;;  %1403 = vmatpush.msra.mxu0 %v3183_v63 }
0x135a   :  { %1377 = vmatpush.msrb.mxu2 %v3070_v10  ;;  %1623 = vmatpush.msra.mxu3 %v3070_v10 }
0x135b   :  { %1404 = vmatpush.msra.mxu0 %v3193_v53 }
0x135c   :  { %1378 = vmatpush.msrb.mxu2 %v3088_v31  ;;  %1624 = vmatpush.msra.mxu3 %v3088_v31 }
0x135e   :  { %v1148_v61 = vld [vmem:[#allocation1 + $0x1] ss:$4 sm:$0xff]  ;;  %1379 = vmatpush.msrb.mxu2 %v3122_v24  ;;  %1625 = vmatpush.msra.mxu3 %v3122_v24 }
0x135f   :  { %1189 = vst [vmem:[#allocation1 + $0x22] ss:$4 sm:$0xff] %v1148_v61 }
0x1360   :  { %1151 = vst.sshfl [vmem:[#allocation1] sm:$0xff pattern:$0x73625140] %v3018_v26  ;;  %1380 = vmatpush.msrb.mxu2 %v3132_v33  ;;  %1626 = vmatpush.msra.mxu3 %v3132_v33 }
0x1361   :  { %1177 = vst [vmem:[#allocation1] ss:$4 sm:$0xff] %v3062_v6 }
0x1362   :  { %1181 = vst [vmem:[#allocation1 + $0x2] ss:$4 sm:$0xff] %v1140_v44  ;;  %1381 = vmatpush.msrb.mxu2 %v3145_v27  ;;  %1627 = vmatpush.msra.mxu3 %v3145_v27 }
0x1363   :  { %1183 = vst [vmem:[#allocation1 + $0x3] ss:$4 sm:$0xff] %v3026_v30 }
0x1364   :  { %1382 = vmatpush.msrb.mxu2 %v3159_v50  ;;  %1628 = vmatpush.msra.mxu3 %v3159_v50 }
0x1366   :  { %1383 = vmatpush.msrb.mxu2 %v3178_v51  ;;  %1629 = vmatpush.msra.mxu3 %v3178_v51 }
0x1367   :  { %v1152_v26 = vld [vmem:[#allocation1 + $0x1] ss:$4 sm:$0xff] }
0x1368   :  { %1179 = vst [vmem:[#allocation1 + $0x1] ss:$4 sm:$0xff] %v3023_v49  ;;  %1384 = vmatpush.msrb.mxu2 %v3188_v16  ;;  %v1193_v49 = vld.sshfl [vmem:[#allocation1 + $0x20] sm:$0xff pattern:$0x73625140]  ;;  %1630 = vmatpush.msra.mxu3 %v3188_v16 }
0x136a   :  { %1540 = vmatpush.msra.mxu2 %v3070_v10 }
0x136c   :  { %1541 = vmatpush.msra.mxu2 %v3088_v31 }
0x136e   :  { %1542 = vmatpush.msra.mxu2 %v3122_v24 }
0x136f   :  { %v1192_v30 = vld.sshfl [vmem:[#allocation1] sm:$0xff pattern:$0x73625140] }
0x1370   :  { %1194 = vst [vmem:[#allocation1] ss:$4 sm:$0xff] %v1152_v26  ;;  %2201 = vmatmul.msk.f32.vlgmr.msrb.gmra.mxu0 %vm241_vm1, %v1192_v30  ;;  %2204 = vmatmul.msk.f32.vlgmr.msra.gmra.mxu1 %vm241_vm1, %v1192_v30 }
0x1371   :  { %1195 = vst [vmem:[#allocation1 + $0x1] ss:$4 sm:$0xff] %v3073_v11  ;;  %1560 = vmatpush.msrb.mxu0 %v3079_v12  ;;  %1643 = vmatpush.msra.mxu1 %v3079_v12 }
0x1372   :  { %1543 = vmatpush.msra.mxu2 %v3132_v33 }
0x1373   :  { %1561 = vmatpush.msrb.mxu0 %v3097_v14  ;;  %1644 = vmatpush.msra.mxu1 %v3097_v14 }
0x1374   :  { %1544 = vmatpush.msra.mxu2 %v3145_v27 }
0x1375   :  { %1562 = vmatpush.msrb.mxu0 %v3127_v56  ;;  %1645 = vmatpush.msra.mxu1 %v3127_v56 }
0x1376   :  { %1545 = vmatpush.msra.mxu2 %v3159_v50 }
0x1377   :  { %1563 = vmatpush.msrb.mxu0 %v3140_v58  ;;  %1646 = vmatpush.msra.mxu1 %v3140_v58 }
0x1378   :  { %2202 = vmatmul.msk.f32.gmra.mxu0 %vm241_vm1, %v1193_v49  ;;  %2205 = vmatmul.msk.f32.gmra.mxu1 %vm241_vm1, %v1193_v49  ;;  %v1196_v38 = vld.sshfl [vmem:[#allocation1] sm:$0xff pattern:$0x73625140] }
0x1379   :  { %1564 = vmatpush.msrb.mxu0 %v3150_v41  ;;  %1546 = vmatpush.msra.mxu2 %v3178_v51 }
0x137a   :  { %1647 = vmatpush.msra.mxu1 %v3150_v41 }
0x137b   :  { %1565 = vmatpush.msrb.mxu0 %v3164_v28  ;;  %1547 = vmatpush.msra.mxu2 %v3188_v16 }
0x137c   :  { %1648 = vmatpush.msra.mxu1 %v3164_v28 }
0x137d   :  { %1566 = vmatpush.msrb.mxu0 %v3183_v63 }
0x137e   :  { %1649 = vmatpush.msra.mxu1 %v3183_v63 }
0x137f   :  { %1567 = vmatpush.msrb.mxu0 %v3193_v53 }
0x1380   :  { %2203 = vmatmul.msk.f32.gmra.mxu0 %vm241_vm1, %v1196_v38  ;;  %2206 = vmatmul.msk.f32.gmra.mxu1 %vm241_vm1, %v1196_v38 }
0x1381   :  { %1650 = vmatpush.msra.mxu1 %v3193_v53 }
0x13dc   :  { %v1295_v2 = vpop.f32.mrf.mxu2 }
0x13ed   :  { %v1220_v5 = vpop.f32.mrf.mxu0  ;;  %v1246_v4 = vpop.f32.mrf.mxu1 }
0x13ee   :  { %v1221_v9 = vadd.f32 %v1220_v5, %v1173_v60  ;;  %v1247_v48 = vadd.f32 %v1246_v4, %v1174_v8 }
0x13f0   :  { %v1320_v21 = vrot.slane %v1221_v9, 6  ;;  %v1321_v22 = vrot.slane %v1247_v48, 6  ;;  %v1410_v46 = vrot.slane %v1247_v48, 2  ;;  %v1409_v35 = vrot.slane %v1221_v9, 2 }
0x13f5   :  { %v1223_v59 = vpop.f32.mrf.mxu0  ;;  %v1249_v19 = vpop.f32.mrf.mxu1 }
0x13f6   :  { %v3279_v29 = vadd.f32 %v1223_v59, %v1173_v60  ;;  %v3281_v47 = vadd.f32 %v1249_v19, %v1174_v8 }
0x13f8   :  { %v3286_v52 = vsel %vm2750_vm8, %v3281_v47, %v1321_v22  ;;  %v3291_v55 = vsel %vm2720_vm7, %v3279_v29, %v1320_v21  ;;  %v3296_v34 = vsel %vm2750_vm8, %v3281_v47, %v1410_v46  ;;  %v3301_v45 = vsel %vm2720_vm7, %v3279_v29, %v1409_v35 }
0x13f9   :  { %v1658_v62 = vrot.slane %v3281_v47, 6  ;;  %v1657_v0 = vrot.slane %v3279_v29, 6  ;;  %v1745_v39 = vrot.slane %v3281_v47, 2  ;;  %v1744_v42 = vrot.slane %v3279_v29, 2 }
0x13fb   :  { %v3311_v32 = vsel %vm2750_vm8, %v1247_v48, %v1658_v62  ;;  %v3317_v6 = vsel %vm2720_vm7, %v1221_v9, %v1657_v0  ;;  %v3323_v7 = vsel %vm2750_vm8, %v1247_v48, %v1745_v39  ;;  %v3329_v11 = vsel %vm2720_vm7, %v1221_v9, %v1744_v42 }
0x13fd   :  { %v1226_v3 = vpop.f32.mrf.mxu0  ;;  %v1252_v13 = vpop.f32.mrf.mxu1 }
0x13fe   :  { %v1227_v57 = vadd.f32 %v1226_v3, %v1173_v60  ;;  %v1253_v18 = vadd.f32 %v1252_v13, %v1174_v8  ;;  %v1328_v60 = vrot.slane %v1295_v2, 6 }
0x1400   :  { %v1325_v20 = vsel %vm2750_vm8, %v1253_v18, %v1321_v22  ;;  %v1414_v23 = vsel %vm2750_vm8, %v1253_v18, %v1410_v46  ;;  %v3337_v44 = vsel %vm2720_vm7, %v1227_v57, %v1409_v35  ;;  %v1993_v36 = vrot.slane %v1253_v18, 6 }
0x1401   :  { %v1333_v43 = vadd.f32 %v1329_v15, %v1325_v20  ;;  %v1992_v54 = vrot.slane %v1227_v57, 6  ;;  %v2080_v61 = vrot.slane %v1253_v18, 2  ;;  %v2079_v17 = vrot.slane %v1227_v57, 2 }
0x1402   :  { %v3341_v1 = vsel %vm2750_vm8, %v1247_v48, %v1993_v36  ;;  %v1324_v5 = vsel %vm2720_vm7, %v1227_v57, %v1320_v21 }
0x1403   :  { %2315 = vtanh.f32 %v1333_v43  ;;  %v3345_v26 = vsel %vm2720_vm7, %v1221_v9, %v1992_v54  ;;  %v3349_v30 = vsel %vm2750_vm8, %v1247_v48, %v2080_v61  ;;  %v3353_v49 = vsel %vm2720_vm7, %v1221_v9, %v2079_v17  ;;  %v1346_v9 = vpop.permute.xlu2 %1345 }
0x1404   :  { %v1332_v8 = vadd.f32 %v1328_v60, %v1324_v5  ;;  %v1335_v15 = vmul.f32 0.5, %v1333_v43 }
0x1406   :  { %v1334_v4 = vmul.f32 0.5, %v1332_v8 }
0x1408   :  { %2317 = vtanh.f32 %v1334_v4 }
0x1409   :  { %v2316_v38 = vpop.eup %2315 }
0x140a   :  { %1350 = vrot.lane.b32.xlu1 %v2316_v38, %s2422_s5 }
0x140e   :  { %v2318_v59 = vpop.eup %2317 }
0x140f   :  { %v1338_v19 = vmul.f32 0.5, %v2318_v59 }
0x1411   :  { %v1340_v22 = vadd.f32 0.5, %v1338_v19 }
0x1413   :  { %v1348_v35 = vmul.f32 %v1346_v9, %v1340_v22 }
0x147c   :  { %v1351_v48 = vpop.permute.xlu1 %1350 }
0x147d   :  { %v1353_v46 = vmul.f32 %v1351_v48, %v1340_v22 }
0x147f   :  { %1355 = vrot.lane.b32.xlu0 %v1353_v46, %s2422_s5 }
0x14f1   :  { %v1356_v37 = vpop.permute.xlu0 %1355 }
0x14f2   :  { %v1358_v3 = vadd.f32 %v1356_v37, %v1348_v35 }
0x14f4   :  { %2319 = vtanh.f32 %v1358_v3  ;;  %v1427_v22 = vrot.slane %v1358_v3, 2 }
0x14f5   :  { %2321 = vtanh.f32 %v1335_v15 }
0x14fa   :  { %v2320_v13 = vpop.eup %2319 }
0x14fb   :  { %1361 = vrot.lane.b32.xlu1 %v2320_v13, %s2422_s5  ;;  %v2322_v21 = vpop.eup %2321 }
0x14fc   :  { %v1339_v57 = vmul.f32 0.5, %v2322_v21 }
0x14fe   :  { %v1341_v18 = vadd.f32 0.5, %v1339_v57 }
0x156d   :  { %v1362_v20 = vpop.permute.xlu1 %1361 }
0x156e   :  { %v1364_v36 = vmul.f32 %v1362_v20, %v1341_v18 }
0x1570   :  { %v3360_v54 = vrot.slane %v1364_v36, 2 }
0x1572   :  { %2211 = vmatmul.msk.f32.vlgmr.msrb.gmra.mxu2 %vm241_vm1, %v3360_v54  ;;  %2212 = vmatmul.msk.f32.vlgmr.msra.gmra.mxu0 %vm241_vm1, %v3360_v54 }
0x1573   :  { %1712 = vmatpush.msrb.mxu2 %v3070_v10  ;;  %1732 = vmatpush.msra.mxu0 %v3079_v12 }
0x1575   :  { %1713 = vmatpush.msrb.mxu2 %v3088_v31  ;;  %1733 = vmatpush.msra.mxu0 %v3097_v14 }
0x1577   :  { %1714 = vmatpush.msrb.mxu2 %v3122_v24  ;;  %1734 = vmatpush.msra.mxu0 %v3127_v56 }
0x1579   :  { %1715 = vmatpush.msrb.mxu2 %v3132_v33  ;;  %1735 = vmatpush.msra.mxu0 %v3140_v58 }
0x157b   :  { %1716 = vmatpush.msrb.mxu2 %v3145_v27  ;;  %1736 = vmatpush.msra.mxu0 %v3150_v41 }
0x157d   :  { %1717 = vmatpush.msrb.mxu2 %v3159_v50  ;;  %1737 = vmatpush.msra.mxu0 %v3164_v28 }
0x157f   :  { %1718 = vmatpush.msrb.mxu2 %v3178_v51  ;;  %1738 = vmatpush.msra.mxu0 %v3183_v63 }
0x1581   :  { %1719 = vmatpush.msrb.mxu2 %v3188_v16  ;;  %1739 = vmatpush.msra.mxu0 %v3193_v53 }
0x15ef   :  { %v1406_v43 = vpop.f32.mrf.mxu0 }
0x15f0   :  { %v1416_v61 = vadd.f32 %v1414_v23, %v1406_v43 }
0x15f2   :  { %2323 = vtanh.f32 %v1416_v61  ;;  %v1418_v35 = vmul.f32 0.5, %v1416_v61 }
0x15f5   :  { %v1386_v38 = vpop.f32.mrf.mxu2 }
0x15f6   :  { %v1415_v2 = vadd.f32 %v3337_v44, %v1386_v38 }
0x15f8   :  { %v2324_v17 = vpop.eup %2323  ;;  %v1417_v60 = vmul.f32 0.5, %v1415_v2 }
0x15f9   :  { %1431 = vrot.lane.b32.xlu2 %v2324_v17, %s2422_s5 }
0x15fa   :  { %2325 = vtanh.f32 %v1417_v60 }
0x1600   :  { %v2326_v5 = vpop.eup %2325 }
0x1601   :  { %v1421_v8 = vmul.f32 0.5, %v2326_v5 }
0x1603   :  { %v1423_v4 = vadd.f32 0.5, %v1421_v8 }
0x1605   :  { %v1429_v48 = vmul.f32 %v1427_v22, %v1423_v4 }
0x1653   :  { %v1432_v59 = vpop.permute.xlu2 %1431 }
0x1654   :  { %v1434_v19 = vmul.f32 %v1432_v59, %v1423_v4 }
0x1656   :  { %1436 = vrot.lane.b32.xlu0 %v1434_v19, %s2422_s5 }
0x16c8   :  { %v1437_v46 = vpop.permute.xlu0 %1436 }
0x16c9   :  { %v1439_v23 = vadd.f32 %v1437_v46, %v1429_v48 }
0x16cb   :  { %2327 = vtanh.f32 %v1439_v23  ;;  %v1509_v4 = vrot.slane %v1439_v23, 2 }
0x16cc   :  { %2329 = vtanh.f32 %v1418_v35 }
0x16d1   :  { %v2328_v9 = vpop.eup %2327 }
0x16d2   :  { %1442 = vrot.lane.b32.xlu1 %v2328_v9, %s2422_s5  ;;  %v2330_v44 = vpop.eup %2329 }
0x16d3   :  { %v1422_v37 = vmul.f32 0.5, %v2330_v44 }
0x16d5   :  { %v1424_v13 = vadd.f32 0.5, %v1422_v37 }
0x1744   :  { %v1443_v15 = vpop.permute.xlu1 %1442 }
0x1745   :  { %v1445_v21 = vmul.f32 %v1443_v15, %v1424_v13 }
0x1747   :  { %2213 = vmatmul.msk.f32.vlgmr.msrb.gmra.mxu3 %vm241_vm1, %v1445_v21  ;;  %2214 = vmatmul.msk.f32.vlgmr.msrb.gmra.mxu1 %vm241_vm1, %v1445_v21 }
0x1748   :  { %1792 = vmatpush.msrb.mxu3 %v3070_v10  ;;  %1812 = vmatpush.msrb.mxu1 %v3079_v12 }
0x174a   :  { %1793 = vmatpush.msrb.mxu3 %v3088_v31  ;;  %1813 = vmatpush.msrb.mxu1 %v3097_v14 }
0x174c   :  { %1794 = vmatpush.msrb.mxu3 %v3122_v24  ;;  %1814 = vmatpush.msrb.mxu1 %v3127_v56 }
0x174e   :  { %1795 = vmatpush.msrb.mxu3 %v3132_v33  ;;  %1815 = vmatpush.msrb.mxu1 %v3140_v58 }
0x1750   :  { %1796 = vmatpush.msrb.mxu3 %v3145_v27  ;;  %1816 = vmatpush.msrb.mxu1 %v3150_v41 }
0x1752   :  { %1797 = vmatpush.msrb.mxu3 %v3159_v50  ;;  %1817 = vmatpush.msrb.mxu1 %v3164_v28 }
0x1754   :  { %1798 = vmatpush.msrb.mxu3 %v3178_v51  ;;  %1818 = vmatpush.msrb.mxu1 %v3183_v63 }
0x1756   :  { %1799 = vmatpush.msrb.mxu3 %v3188_v16  ;;  %1819 = vmatpush.msrb.mxu1 %v3193_v53 }
0x17c4   :  { %v1486_v3 = vpop.f32.mrf.mxu1 }
0x17c5   :  { %v1494_v57 = vrot.slane %v1486_v3, 2 }
0x17c7   :  { %v1498_v18 = vadd.f32 %v1494_v57, %v3286_v52 }
0x17c9   :  { %2331 = vtanh.f32 %v1498_v18  ;;  %v1500_v48 = vmul.f32 0.5, %v1498_v18 }
0x17ca   :  { %v1466_v36 = vpop.f32.mrf.mxu3 }
0x17cb   :  { %v1493_v43 = vrot.slane %v1466_v36, 2 }
0x17cd   :  { %v1497_v61 = vadd.f32 %v1493_v43, %v3291_v55 }
0x17cf   :  { %v2332_v20 = vpop.eup %2331  ;;  %v1499_v17 = vmul.f32 0.5, %v1497_v61 }
0x17d0   :  { %1513 = vrot.lane.b32.xlu2 %v2332_v20, %s2422_s5 }
0x17d1   :  { %2333 = vtanh.f32 %v1499_v17 }
0x17d7   :  { %v2334_v38 = vpop.eup %2333 }
0x17d8   :  { %v1503_v2 = vmul.f32 0.5, %v2334_v38 }
0x17da   :  { %v1505_v60 = vadd.f32 0.5, %v1503_v2 }
0x17dc   :  { %v1511_v59 = vmul.f32 %v1509_v4, %v1505_v60 }
0x182a   :  { %v1514_v5 = vpop.permute.xlu2 %1513 }
0x182b   :  { %v1516_v8 = vmul.f32 %v1514_v5, %v1505_v60 }
0x182d   :  { %1518 = vrot.lane.b32.xlu0 %v1516_v8, %s2422_s5 }
0x189f   :  { %v1519_v52 = vpop.permute.xlu0 %1518 }
0x18a0   :  { %v1521_v19 = vadd.f32 %v1519_v52, %v1511_v59 }
0x18a2   :  { %2335 = vtanh.f32 %v1521_v19  ;;  %v1592_v2 = vrot.slane %v1521_v19, 2 }
0x18a3   :  { %2337 = vtanh.f32 %v1500_v48 }
0x18a8   :  { %v2336_v22 = vpop.eup %2335 }
0x18a9   :  { %1524 = vrot.lane.b32.xlu1 %v2336_v22, %s2422_s5  ;;  %v2338_v55 = vpop.eup %2337 }
0x18aa   :  { %v1504_v46 = vmul.f32 0.5, %v2338_v55 }
0x18ac   :  { %v1506_v9 = vadd.f32 0.5, %v1504_v46 }
0x191b   :  { %v1525_v35 = vpop.permute.xlu1 %1524 }
0x191c   :  { %v1527_v44 = vmul.f32 %v1525_v35, %v1506_v9  ;;  %v1662_v9 = vsel %vm2750_vm8, %v3281_v47, %v1658_v62 }
0x191e   :  { %v1529_v37 = vrot.slane %v1527_v44, 6 }
0x1920   :  { %2215 = vmatmul.msk.f32.vlgmr.msra.gmra.mxu2 %vm241_vm1, %v1529_v37  ;;  %2216 = vmatmul.msk.f32.vlgmr.msrb.gmra.mxu0 %vm241_vm1, %v1529_v37 }
0x1921   :  { %1875 = vmatpush.msra.mxu2 %v3070_v10  ;;  %1895 = vmatpush.msrb.mxu0 %v3079_v12 }
0x1923   :  { %1876 = vmatpush.msra.mxu2 %v3088_v31  ;;  %1896 = vmatpush.msrb.mxu0 %v3097_v14 }
0x1925   :  { %1877 = vmatpush.msra.mxu2 %v3122_v24  ;;  %1897 = vmatpush.msrb.mxu0 %v3127_v56 }
0x1927   :  { %1878 = vmatpush.msra.mxu2 %v3132_v33  ;;  %1898 = vmatpush.msrb.mxu0 %v3140_v58 }
0x1929   :  { %1879 = vmatpush.msra.mxu2 %v3145_v27  ;;  %1899 = vmatpush.msrb.mxu0 %v3150_v41 }
0x192b   :  { %1880 = vmatpush.msra.mxu2 %v3159_v50  ;;  %1900 = vmatpush.msrb.mxu0 %v3164_v28 }
0x192d   :  { %1881 = vmatpush.msra.mxu2 %v3178_v51  ;;  %1901 = vmatpush.msrb.mxu0 %v3183_v63 }
0x192f   :  { %1882 = vmatpush.msra.mxu2 %v3188_v16  ;;  %1902 = vmatpush.msrb.mxu0 %v3193_v53 }
0x199d   :  { %v1569_v23 = vpop.f32.mrf.mxu0 }
0x199e   :  { %v1577_v13 = vrot.slane %v1569_v23, 4 }
0x19a0   :  { %v1581_v15 = vadd.f32 %v1577_v13, %v3296_v34  ;;  %v1661_v13 = vsel %vm2720_vm7, %v3279_v29, %v1657_v0 }
0x19a2   :  { %2339 = vtanh.f32 %v1581_v15  ;;  %v1583_v4 = vmul.f32 0.5, %v1581_v15 }
0x19a3   :  { %v1549_v3 = vpop.f32.mrf.mxu2 }
0x19a4   :  { %v1576_v57 = vrot.slane %v1549_v3, 4 }
0x19a6   :  { %v1580_v18 = vadd.f32 %v1576_v57, %v3301_v45 }
0x19a8   :  { %v2340_v21 = vpop.eup %2339  ;;  %v1582_v20 = vmul.f32 0.5, %v1580_v18 }
0x19a9   :  { %1596 = vrot.lane.b32.xlu2 %v2340_v21, %s2422_s5 }
0x19aa   :  { %2341 = vtanh.f32 %v1582_v20 }
0x19b0   :  { %v2342_v36 = vpop.eup %2341 }
0x19b1   :  { %v1586_v43 = vmul.f32 0.5, %v2342_v36 }
0x19b3   :  { %v1588_v61 = vadd.f32 0.5, %v1586_v43 }
0x19b5   :  { %v1594_v60 = vmul.f32 %v1592_v2, %v1588_v61 }
0x1a03   :  { %v1597_v17 = vpop.permute.xlu2 %1596 }
0x1a04   :  { %v1599_v38 = vmul.f32 %v1597_v17, %v1588_v61 }
0x1a06   :  { %1601 = vrot.lane.b32.xlu0 %v1599_v38, %s2422_s5 }
0x1a78   :  { %v1602_v34 = vpop.permute.xlu0 %1601 }
0x1a79   :  { %v1604_v5 = vadd.f32 %v1602_v34, %v1594_v60 }
0x1a7b   :  { %2343 = vtanh.f32 %v1604_v5  ;;  %v1681_v36 = vrot.slane %v1604_v5, 2 }
0x1a7c   :  { %2345 = vtanh.f32 %v1583_v4 }
0x1a81   :  { %v2344_v8 = vpop.eup %2343 }
0x1a82   :  { %1607 = vrot.lane.b32.xlu1 %v2344_v8, %s2422_s5  ;;  %v2346_v45 = vpop.eup %2345 }
0x1a83   :  { %v1587_v59 = vmul.f32 0.5, %v2346_v45 }
0x1a85   :  { %v1589_v52 = vadd.f32 0.5, %v1587_v59 }
0x1af4   :  { %v1608_v22 = vpop.permute.xlu1 %1607 }
0x1af5   :  { %v1610_v48 = vmul.f32 %v1608_v22, %v1589_v52 }
0x1af7   :  { %v1612_v55 = vrot.slane %v1610_v48, 4 }
0x1af9   :  { %2217 = vmatmul.msk.f32.vlgmr.msra.gmra.mxu3 %vm241_vm1, %v1612_v55  ;;  %2218 = vmatmul.msk.f32.vlgmr.msra.gmra.mxu1 %vm241_vm1, %v1612_v55 }
0x1afa   :  { %1958 = vmatpush.msra.mxu3 %v3070_v10  ;;  %1978 = vmatpush.msra.mxu1 %v3079_v12 }
0x1afc   :  { %1959 = vmatpush.msra.mxu3 %v3088_v31  ;;  %1979 = vmatpush.msra.mxu1 %v3097_v14 }
0x1afe   :  { %1960 = vmatpush.msra.mxu3 %v3122_v24  ;;  %1980 = vmatpush.msra.mxu1 %v3127_v56 }
0x1b00   :  { %1961 = vmatpush.msra.mxu3 %v3132_v33  ;;  %1981 = vmatpush.msra.mxu1 %v3140_v58 }
0x1b02   :  { %1962 = vmatpush.msra.mxu3 %v3145_v27  ;;  %1982 = vmatpush.msra.mxu1 %v3150_v41 }
0x1b04   :  { %1963 = vmatpush.msra.mxu3 %v3159_v50  ;;  %1983 = vmatpush.msra.mxu1 %v3164_v28 }
0x1b06   :  { %1964 = vmatpush.msra.mxu3 %v3178_v51  ;;  %1984 = vmatpush.msra.mxu1 %v3183_v63 }
0x1b08   :  { %1965 = vmatpush.msra.mxu3 %v3188_v16  ;;  %1985 = vmatpush.msra.mxu1 %v3193_v53 }
0x1b76   :  { %v1652_v19 = vpop.f32.mrf.mxu1 }
0x1b77   :  { %v1666_v46 = vrot.slane %v1652_v19, 6 }
0x1b79   :  { %v1670_v35 = vadd.f32 %v1666_v46, %v1662_v9 }
0x1b7b   :  { %2347 = vtanh.f32 %v1670_v35  ;;  %v1672_v2 = vmul.f32 0.5, %v1670_v35 }
0x1b7c   :  { %v1632_v37 = vpop.f32.mrf.mxu3 }
0x1b7d   :  { %v1665_v23 = vrot.slane %v1632_v37, 6 }
0x1b7f   :  { %v1669_v15 = vadd.f32 %v1665_v23, %v1661_v13 }
0x1b81   :  { %v2348_v44 = vpop.eup %2347  ;;  %v1671_v21 = vmul.f32 0.5, %v1669_v15 }
0x1b82   :  { %1685 = vrot.lane.b32.xlu2 %v2348_v44, %s2422_s5 }
0x1b83   :  { %2349 = vtanh.f32 %v1671_v21 }
0x1b89   :  { %v2350_v3 = vpop.eup %2349 }
0x1b8a   :  { %v1675_v57 = vmul.f32 0.5, %v2350_v3 }
0x1b8c   :  { %v1677_v18 = vadd.f32 0.5, %v1675_v57 }
0x1b8e   :  { %v1683_v43 = vmul.f32 %v1681_v36, %v1677_v18 }
0x1bdc   :  { %v1686_v62 = vpop.permute.xlu2 %1685 }
0x1bdd   :  { %v1688_v20 = vmul.f32 %v1686_v62, %v1677_v18 }
0x1bdf   :  { %1690 = vrot.lane.b32.xlu0 %v1688_v20, %s2422_s5 }
0x1c51   :  { %v1691_v61 = vpop.permute.xlu0 %1690 }
0x1c52   :  { %v1693_v17 = vadd.f32 %v1691_v61, %v1683_v43 }
0x1c54   :  { %2351 = vtanh.f32 %v1693_v17 }
0x1c55   :  { %2353 = vtanh.f32 %v1672_v2 }
0x1c5a   :  { %v2352_v38 = vpop.eup %2351 }
0x1c5b   :  { %1696 = vrot.lane.b32.xlu1 %v2352_v38, %s2422_s5  ;;  %v2354_v0 = vpop.eup %2353 }
0x1c5c   :  { %v1676_v60 = vmul.f32 0.5, %v2354_v0 }
0x1c5e   :  { %v1678_v34 = vadd.f32 0.5, %v1676_v60 }
0x1ccd   :  { %v1697_v8 = vpop.permute.xlu1 %1696 }
0x1cce   :  { %v1699_v4 = vmul.f32 %v1697_v8, %v1678_v34 }
0x1cd0   :  { %v1701_v45 = vrot.slane %v1699_v4, 2 }
0x1cd2   :  { %2219 = vmatmul.msk.f32.vlgmr.msrb.gmra.mxu2 %vm241_vm1, %v1701_v45  ;;  %2220 = vmatmul.msk.f32.vlgmr.msra.gmra.mxu0 %vm241_vm1, %v1701_v45 }
0x1cd3   :  { %2047 = vmatpush.msrb.mxu2 %v3070_v10  ;;  %2067 = vmatpush.msra.mxu0 %v3079_v12  ;;  %v1749_v12 = vsel %vm2750_vm8, %v3281_v47, %v1745_v39 }
0x1cd5   :  { %2048 = vmatpush.msrb.mxu2 %v3088_v31  ;;  %2068 = vmatpush.msra.mxu0 %v3097_v14 }
0x1cd7   :  { %2049 = vmatpush.msrb.mxu2 %v3122_v24  ;;  %2069 = vmatpush.msra.mxu0 %v3127_v56  ;;  %v1748_v56 = vsel %vm2720_vm7, %v3279_v29, %v1744_v42 }
0x1cd9   :  { %2050 = vmatpush.msrb.mxu2 %v3132_v33  ;;  %2070 = vmatpush.msra.mxu0 %v3140_v58 }
0x1cdb   :  { %2051 = vmatpush.msrb.mxu2 %v3145_v27  ;;  %2071 = vmatpush.msra.mxu0 %v3150_v41 }
0x1cdd   :  { %2052 = vmatpush.msrb.mxu2 %v3159_v50  ;;  %2072 = vmatpush.msra.mxu0 %v3164_v28 }
0x1cdf   :  { %2053 = vmatpush.msrb.mxu2 %v3178_v51  ;;  %2073 = vmatpush.msra.mxu0 %v3183_v63  ;;  %v1762_v51 = vrot.slane %v1693_v17, 2 }
0x1ce1   :  { %2054 = vmatpush.msrb.mxu2 %v3188_v16  ;;  %2074 = vmatpush.msra.mxu0 %v3193_v53 }
0x1d4f   :  { %v1741_v10 = vpop.f32.mrf.mxu0 }
0x1d50   :  { %v1751_v31 = vadd.f32 %v1749_v12, %v1741_v10 }
0x1d52   :  { %2355 = vtanh.f32 %v1751_v31  ;;  %v1753_v25 = vmul.f32 0.5, %v1751_v31 }
0x1d55   :  { %v1721_v24 = vpop.f32.mrf.mxu2 }
0x1d56   :  { %v1750_v33 = vadd.f32 %v1748_v56, %v1721_v24 }
0x1d58   :  { %v2356_v14 = vpop.eup %2355  ;;  %v1752_v58 = vmul.f32 0.5, %v1750_v33 }
0x1d59   :  { %1766 = vrot.lane.b32.xlu2 %v2356_v14, %s2422_s5 }
0x1d5a   :  { %2357 = vtanh.f32 %v1752_v58 }
0x1d60   :  { %v2358_v27 = vpop.eup %2357 }
0x1d61   :  { %v1756_v41 = vmul.f32 0.5, %v2358_v27 }
0x1d63   :  { %v1758_v50 = vadd.f32 0.5, %v1756_v41 }
0x1d65   :  { %v1764_v63 = vmul.f32 %v1762_v51, %v1758_v50 }
0x1db3   :  { %v1767_v40 = vpop.permute.xlu2 %1766 }
0x1db4   :  { %v1769_v28 = vmul.f32 %v1767_v40, %v1758_v50 }
0x1db6   :  { %1771 = vrot.lane.b32.xlu0 %v1769_v28, %s2422_s5 }
0x1e28   :  { %v1772_v16 = vpop.permute.xlu0 %1771 }
0x1e29   :  { %v1774_v53 = vadd.f32 %v1772_v16, %v1764_v63 }
0x1e2b   :  { %2359 = vtanh.f32 %v1774_v53  ;;  %v1844_v21 = vrot.slane %v1774_v53, 2 }
0x1e2c   :  { %2361 = vtanh.f32 %v1753_v25 }
0x1e31   :  { %v2360_v47 = vpop.eup %2359 }
0x1e32   :  { %1777 = vrot.lane.b32.xlu1 %v2360_v47, %s2422_s5  ;;  %v2362_v29 = vpop.eup %2361 }
0x1e33   :  { %v1757_v39 = vmul.f32 0.5, %v2362_v29 }
0x1e35   :  { %v1759_v42 = vadd.f32 0.5, %v1757_v39 }
0x1ea4   :  { %v1778_v5 = vpop.permute.xlu1 %1777 }
0x1ea5   :  { %v1780_v59 = vmul.f32 %v1778_v5, %v1759_v42 }
0x1ea7   :  { %2221 = vmatmul.msk.f32.vlgmr.msrb.gmra.mxu3 %vm241_vm1, %v1780_v59  ;;  %2222 = vmatmul.msk.f32.vlgmr.msrb.gmra.mxu1 %vm241_vm1, %v1780_v59 }
0x1f24   :  { %v1821_v52 = vpop.f32.mrf.mxu1 }
0x1f25   :  { %v1829_v22 = vrot.slane %v1821_v52, 2 }
0x1f27   :  { %v1833_v48 = vadd.f32 %v1829_v22, %v3311_v32 }
0x1f29   :  { %2363 = vtanh.f32 %v1833_v48  ;;  %v1835_v62 = vmul.f32 0.5, %v1833_v48 }
0x1f2a   :  { %v1801_v19 = vpop.f32.mrf.mxu3 }
0x1f2b   :  { %v1828_v46 = vrot.slane %v1801_v19, 2 }
0x1f2d   :  { %v1832_v9 = vadd.f32 %v1828_v46, %v3317_v6 }
0x1f2f   :  { %v2364_v55 = vpop.eup %2363  ;;  %v1834_v35 = vmul.f32 0.5, %v1832_v9 }
0x1f30   :  { %1848 = vrot.lane.b32.xlu2 %v2364_v55, %s2422_s5 }
0x1f31   :  { %2365 = vtanh.f32 %v1834_v35 }
0x1f37   :  { %v2366_v44 = vpop.eup %2365 }
0x1f38   :  { %v1838_v37 = vmul.f32 0.5, %v2366_v44 }
0x1f3a   :  { %v1840_v23 = vadd.f32 0.5, %v1838_v37 }
0x1f3c   :  { %v1846_v3 = vmul.f32 %v1844_v21, %v1840_v23 }
0x1f8a   :  { %v1849_v13 = vpop.permute.xlu2 %1848 }
0x1f8b   :  { %v1851_v15 = vmul.f32 %v1849_v13, %v1840_v23 }
0x1f8d   :  { %1853 = vrot.lane.b32.xlu0 %v1851_v15, %s2422_s5 }
0x1fff   :  { %v1854_v32 = vpop.permute.xlu0 %1853 }
0x2000   :  { %v1856_v57 = vadd.f32 %v1854_v32, %v1846_v3 }
0x2002   :  { %2367 = vtanh.f32 %v1856_v57  ;;  %v1927_v56 = vrot.slane %v1856_v57, 2 }
0x2003   :  { %2369 = vtanh.f32 %v1835_v62 }
0x2008   :  { %v2368_v18 = vpop.eup %2367 }
0x2009   :  { %1859 = vrot.lane.b32.xlu1 %v2368_v18, %s2422_s5  ;;  %v2370_v6 = vpop.eup %2369 }
0x200a   :  { %v1839_v20 = vmul.f32 0.5, %v2370_v6 }
0x200c   :  { %v1841_v36 = vadd.f32 0.5, %v1839_v20 }
0x207b   :  { %v1860_v43 = vpop.permute.xlu1 %1859 }
0x207c   :  { %v1862_v61 = vmul.f32 %v1860_v43, %v1841_v36 }
0x207e   :  { %v1864_v17 = vrot.slane %v1862_v61, 6 }
0x2080   :  { %2223 = vmatmul.msk.f32.vlgmr.msra.gmra.mxu2 %vm241_vm1, %v1864_v17  ;;  %2224 = vmatmul.msk.f32.vlgmr.msrb.gmra.mxu0 %vm241_vm1, %v1864_v17 }
0x20fd   :  { %v1904_v38 = vpop.f32.mrf.mxu0 }
0x20fe   :  { %v1912_v2 = vrot.slane %v1904_v38, 4  ;;  %v2124_v38 = vld [vmem:[%s3564_s9 + $0x30] sm:$0xff] }
0x2100   :  { %v1916_v0 = vadd.f32 %v1912_v2, %v3323_v7  ;;  %v2122_v2 = vld [vmem:[%s3564_s9 + $0x20] sm:$0xff] }
0x2102   :  { %2371 = vtanh.f32 %v1916_v0  ;;  %v1918_v41 = vmul.f32 0.5, %v1916_v0  ;;  %v2121_v0 = vld [vmem:[%s3564_s9 + $0x18] sm:$0xff] }
0x2103   :  { %v1884_v34 = vpop.f32.mrf.mxu2 }
0x2104   :  { %v1911_v8 = vrot.slane %v1884_v34, 4 }
0x2106   :  { %v1915_v4 = vadd.f32 %v1911_v8, %v3329_v11 }
0x2108   :  { %v2372_v60 = vpop.eup %2371  ;;  %v1917_v45 = vmul.f32 0.5, %v1915_v4 }
0x2109   :  { %1931 = vrot.lane.b32.xlu2 %v2372_v60, %s2422_s5  ;;  %v2120_v60 = vld [vmem:[%s3564_s9 + $0x10] sm:$0xff] }
0x210a   :  { %2373 = vtanh.f32 %v1917_v45 }
0x2110   :  { %v2374_v10 = vpop.eup %2373 }
0x2111   :  { %v1921_v12 = vmul.f32 0.5, %v2374_v10 }
0x2113   :  { %v1923_v31 = vadd.f32 0.5, %v1921_v12  ;;  %v2119_v12 = vld [vmem:[%s3564_s9 + $0x8] sm:$0xff] }
0x2115   :  { %v1929_v33 = vmul.f32 %v1927_v56, %v1923_v31 }
0x2163   :  { %v1932_v14 = vpop.permute.xlu2 %1931 }
0x2164   :  { %v1934_v24 = vmul.f32 %v1932_v14, %v1923_v31  ;;  %v2118_v31 = vld [vmem:[%s3564_s9] sm:$0xff] }
0x2166   :  { %1936 = vrot.lane.b32.xlu0 %v1934_v24, %s2422_s5 }
0x21d8   :  { %v1937_v7 = vpop.permute.xlu0 %1936 }
0x21d9   :  { %v1939_v58 = vadd.f32 %v1937_v7, %v1929_v33 }
0x21db   :  { %2375 = vtanh.f32 %v1939_v58  ;;  %v2016_v19 = vrot.slane %v1939_v58, 2 }
0x21dc   :  { %2377 = vtanh.f32 %v1918_v41  ;;  %v2234_v41 = vld [vmem:[%s3565_s10] ss:$0 sm:$0xff] }
0x21e1   :  { %v2376_v27 = vpop.eup %2375 }
0x21e2   :  { %1942 = vrot.lane.b32.xlu1 %v2376_v27, %s2422_s5  ;;  %v2378_v11 = vpop.eup %2377 }
0x21e3   :  { %v1922_v50 = vmul.f32 0.5, %v2378_v11 }
0x21e5   :  { %v1924_v40 = vadd.f32 0.5, %v1922_v50 }
0x2254   :  { %v1943_v28 = vpop.permute.xlu1 %1942 }
0x2255   :  { %v1945_v51 = vmul.f32 %v1943_v28, %v1924_v40 }
0x2257   :  { %v1947_v63 = vrot.slane %v1945_v51, 4 }
0x2259   :  { %2225 = vmatmul.msk.f32.vlgmr.msra.gmra.mxu3 %vm241_vm1, %v1947_v63  ;;  %2226 = vmatmul.msk.f32.vlgmr.msra.gmra.mxu1 %vm241_vm1, %v1947_v63 }
0x22d6   :  { %v1987_v16 = vpop.f32.mrf.mxu1 }
0x22d7   :  { %v2001_v53 = vrot.slane %v1987_v16, 6 }
0x22d9   :  { %v2005_v47 = vadd.f32 %v2001_v53, %v3341_v1 }
0x22db   :  { %2379 = vtanh.f32 %v2005_v47  ;;  %v2007_v44 = vmul.f32 0.5, %v2005_v47 }
0x22dc   :  { %v1967_v29 = vpop.f32.mrf.mxu3 }
0x22dd   :  { %v2000_v39 = vrot.slane %v1967_v29, 6 }
0x22df   :  { %v2004_v42 = vadd.f32 %v2000_v39, %v3345_v26 }
0x22e1   :  { %v2380_v25 = vpop.eup %2379  ;;  %v2006_v5 = vmul.f32 0.5, %v2004_v42 }
0x22e2   :  { %2020 = vrot.lane.b32.xlu2 %v2380_v25, %s2422_s5 }
0x22e3   :  { %2381 = vtanh.f32 %v2006_v5 }
0x22e9   :  { %v2382_v59 = vpop.eup %2381 }
0x22ea   :  { %v2010_v52 = vmul.f32 0.5, %v2382_v59 }
0x22ec   :  { %v2012_v22 = vadd.f32 0.5, %v2010_v52 }
0x22ee   :  { %v2018_v46 = vmul.f32 %v2016_v19, %v2012_v22 }
0x233c   :  { %v2021_v48 = vpop.permute.xlu2 %2020 }
0x233d   :  { %v2023_v55 = vmul.f32 %v2021_v48, %v2012_v22 }
0x233f   :  { %2025 = vrot.lane.b32.xlu0 %v2023_v55, %s2422_s5 }
0x23b1   :  { %v2026_v1 = vpop.permute.xlu0 %2025 }
0x23b2   :  { %v2028_v9 = vadd.f32 %v2026_v1, %v2018_v46 }
0x23b4   :  { %2383 = vtanh.f32 %v2028_v9  ;;  %v2097_v34 = vrot.slane %v2028_v9, 2 }
0x23b5   :  { %2385 = vtanh.f32 %v2007_v44 }
0x23ba   :  { %v2384_v35 = vpop.eup %2383 }
0x23bb   :  { %2031 = vrot.lane.b32.xlu1 %v2384_v35, %s2422_s5  ;;  %v2386_v26 = vpop.eup %2385 }
0x23bc   :  { %v2011_v37 = vmul.f32 0.5, %v2386_v26 }
0x23be   :  { %v2013_v23 = vadd.f32 0.5, %v2011_v37 }
0x242d   :  { %v2032_v13 = vpop.permute.xlu1 %2031 }
0x242e   :  { %v2034_v15 = vmul.f32 %v2032_v13, %v2013_v23 }
0x2430   :  { %v2036_v21 = vrot.slane %v2034_v15, 2 }
0x2432   :  { %2227 = vmatmul.msk.f32.vlgmr.msrb.gmra.mxu2 %vm241_vm1, %v2036_v21  ;;  %2228 = vmatmul.msk.f32.vlgmr.msra.gmra.mxu0 %vm241_vm1, %v2036_v21 }
0x24af   :  { %v2076_v3 = vpop.f32.mrf.mxu0 }
0x24b0   :  { %v2086_v32 = vadd.f32 %v3349_v30, %v2076_v3  ;;  %v2125_v30 = vld [vmem:[%s3564_s9 + $0x38] sm:$0xff] }
0x24b1   :  { %2141 = vmatpush.msrb.mxu3 %v2125_v30 }
0x24b2   :  { %2387 = vtanh.f32 %v2086_v32  ;;  %v2088_v14 = vmul.f32 0.5, %v2086_v32 }
0x24b3   :  { %2142 = vmatpush.msrb.mxu3 %v2124_v38 }
0x24b5   :  { %v2056_v18 = vpop.f32.mrf.mxu2 }
0x24b6   :  { %v2085_v62 = vadd.f32 %v3353_v49, %v2056_v18  ;;  %v2123_v49 = vld [vmem:[%s3564_s9 + $0x28] sm:$0xff] }
0x24b7   :  { %2143 = vmatpush.msrb.mxu3 %v2123_v49 }
0x24b8   :  { %v2388_v57 = vpop.eup %2387  ;;  %v2087_v6 = vmul.f32 0.5, %v2085_v62 }
0x24b9   :  { %2101 = vrot.lane.b32.xlu2 %v2388_v57, %s2422_s5  ;;  %2144 = vmatpush.msrb.mxu3 %v2122_v2 }
0x24ba   :  { %2389 = vtanh.f32 %v2087_v6 }
0x24bb   :  { %2145 = vmatpush.msrb.mxu3 %v2121_v0 }
0x24bd   :  { %2146 = vmatpush.msrb.mxu3 %v2120_v60 }
0x24bf   :  { %2147 = vmatpush.msrb.mxu3 %v2119_v12 }
0x24c0   :  { %v2390_v20 = vpop.eup %2389 }
0x24c1   :  { %v2091_v36 = vmul.f32 0.5, %v2390_v20  ;;  %2148 = vmatpush.msrb.mxu3 %v2118_v31 }
0x24c3   :  { %v2093_v43 = vadd.f32 0.5, %v2091_v36 }
0x24c5   :  { %v2099_v8 = vmul.f32 %v2097_v34, %v2093_v43 }
0x2513   :  { %v2102_v61 = vpop.permute.xlu2 %2101 }
0x2514   :  { %v2104_v17 = vmul.f32 %v2102_v61, %v2093_v43 }
0x2516   :  { %2106 = vrot.lane.b32.xlu0 %v2104_v17, %s2422_s5 }
0x2588   :  { %v2107_v4 = vpop.permute.xlu0 %2106 }
0x2589   :  { %v2109_v45 = vadd.f32 %v2107_v4, %v2099_v8 }
0x258b   :  { %2391 = vtanh.f32 %v2109_v45 }
0x258c   :  { %2393 = vtanh.f32 %v2088_v14 }
0x2591   :  { %v2392_v10 = vpop.eup %2391 }
0x2592   :  { %2112 = vrot.lane.b32.xlu1 %v2392_v10, %s2422_s5  ;;  %v2394_v24 = vpop.eup %2393 }
0x2593   :  { %v2092_v56 = vmul.f32 0.5, %v2394_v24 }
0x2595   :  { %v2094_v33 = vadd.f32 0.5, %v2092_v56 }
0x2604   :  { %v2113_v7 = vpop.permute.xlu1 %2112 }
0x2605   :  { %v2115_v58 = vmul.f32 %v2113_v7, %v2094_v33 }
0x2607   :  { %v2117_v27 = vsel %vm1112_vm9, %v2115_v58, %v3360_v54 }
0x2608   :  { %2229 = vmatmul.msk.f32.vlgmr.msrb.gmra.mxu3 %vm241_vm1, %v2117_v27 }
0x268b   :  { %v2150_v11 = vpop.f32.mrf.mxu3 }
0x268c   :  { %v2151_v50 = vadd.f32 %v2234_v41, %v2150_v11 }
0x268e   :  { %2154 = vst.msk [vmem:[#allocation2] sm:$0x3] %vm2153_vm10, %v2151_v50 }
0x268f   :  { %2165 = dma.vmem_to_hbm [thread:$0]  %s2161_s4, 32, %s2163_s26, [#allocation3]  }
0x2690   :  { %2419 = dma.done.wait [#allocation3], 32  }
0x2691   :  { %2420 = vsyncadd [#allocation3], 4294967264 }
0x2692   :  { %2170 = vsyncpa [#allocation3], 1 }

</bundles_post_ra>
